<compile_context>
chip_gen: v5e
topology: v5e:2x2
jax: 0.10.0
libtpu: 0.0.40
codegen_flags: <defaults>
</compile_context>

<pallas_src>
import jax
import jax.numpy as jnp
from jax.experimental import pallas as pl
from jax.experimental.pallas import tpu as pltpu

_HIGHEST = jax.lax.Precision.HIGHEST


def _even_trim(x):
    """PyTorch k=2/s=2 semantics: a trailing odd plane/row/column is dropped."""
    N, C, D, H, W = x.shape
    Do, Ho, Wo = D // 2, H // 2, W // 2
    if (D, H, W) != (2 * Do, 2 * Ho, 2 * Wo):
        x = x[:, :, : 2 * Do, : 2 * Ho, : 2 * Wo]
    return x, Do, Ho, Wo


# ----------------------------------------------------------------------------
# with_conv=True : Conv3d(C, C, kernel_size=2, stride=2, padding=0)
# ----------------------------------------------------------------------------
def _conv_kernel(x_ref, w_ref, s_ref, b_ref, o_ref):
    """One (n, do, h-block) tile of the strided 2x2x2 conv.

    x_ref : (1, C, 1, 2, L)   L = 2*hb*W2; both kd planes, lane-flattened (h2, w2)
    w_ref : (C_out, 8*C)      fused weights, K ordered (kd, kh, kw, ci)
    s_ref : (4, L, M)         M = hb*Wo; 0/1 gather matrices, index = kh*2 + kw
    b_ref : (C_out, 1)
    o_ref : (1, 1, C_out, M)  lane-dense output tile
    """
    f32 = jnp.float32
    # One block load per grid step; the two kd planes as (C, L) slabs.
    planes = (x_ref[0, :, 0, 0, :], x_ref[0, :, 0, 1, :])

    # 8 taps: stride-2 gather over (h2, w2) done on the MXU: (C, L) @ (L, M).
    taps = []
    for t in range(8):                       # static unroll over kernel taps
        kd, j = divmod(t, 4)                 # j = kh*2 + kw
        taps.append(jnp.dot(planes[kd], s_ref[j],
                            preferred_element_type=f32, precision=_HIGHEST))
    p = jnp.concatenate(taps, axis=0)        # (8*C, M), rows ordered (kd,kh,kw,ci)

    # Single fused channel matmul: (C_out, 8C) @ (8C, hb*Wo).
    y = jnp.dot(w_ref[...].astype(f32), p,
                preferred_element_type=f32, precision=_HIGHEST)
    y = y + b_ref[...].astype(f32)

    # One lane-dense store for the whole tile.
    o_ref[...] = y[None, None, :, :].astype(o_ref.dtype)


def prepare_conv_params(weight, bias):
    """Fuse PyTorch Conv3d(C, C, 2, 2, 2) params once, outside the hot path."""
    c_out, c_in = weight.shape[0], weight.shape[1]
    # (O, I, kd, kh, kw) -> (O, kd, kh, kw, I) -> (O, 8*I): K index = t*C + ci.
    w8c = jnp.transpose(weight, (0, 2, 3, 4, 1)).reshape(c_out, 8 * c_in)
    b_col = bias.reshape(c_out, 1)
    return w8c, b_col


def _pick_hb(Ho, W2, Wo, budget_bytes=8 * 2**20):
    """Largest divisor of Ho whose gather matrices stay small and tile-aligned."""
    for hb in range(Ho, 0, -1):
        if Ho % hb:
            continue
        L, M = 2 * hb * W2, hb * Wo
        if hb != Ho and (L % 128 or M % 128):   # keep BlockSpec (8,128)-rule clean
            continue
        if 4 * L * M * 4 <= budget_bytes:
            return hb
    # TODO(synk): for very large H*W the selection-matmul gather should be
    # replaced by a blocked-gather variant; fine for this module's shapes.
    return Ho


def _make_sel(hb, W2, Wo, dtype):
    """sel[j, h2*W2+w2, ho*Wo+wo] = 1 iff h2==2*ho+kh and w2==2*wo+kw (j=kh*2+kw)."""
    L, M = 2 * hb * W2, hb * Wo
    l = jnp.arange(L)
    h2, w2 = l // W2, l % W2
    m = jnp.arange(M)
    ho, wo = m // Wo, m % Wo
    mats = []
    for kh in range(2):
        for kw in range(2):
            hit = ((h2[:, None] == 2 * ho[None, :] + kh) &
                   (w2[:, None] == 2 * wo[None, :] + kw))
            mats.append(hit.astype(dtype))
    return jnp.stack(mats, axis=0)           # (4, L, M)


@jax.jit
def downsample_conv(x, w8c, b_col):
    x, Do, Ho, Wo = _even_trim(x)
    N, C = x.shape[0], x.shape[1]
    H2, W2 = 2 * Ho, 2 * Wo
    c_out = w8c.shape[0]

    hb = _pick_hb(Ho, W2, Wo)
    L, M = 2 * hb * W2, hb * Wo
    grid = (N, Do, Ho // hb)

    # Free HBM reshape: D -> (Do, 2) and (H, W) -> H*W (lane-flattened input).
    xr = x.reshape(N, C, Do, 2, H2 * W2)
    sel = _make_sel(hb, W2, Wo, x.dtype)

    # Compute the actual VMEM footprint (double-buffered blocks + constants)
    # and leave headroom under v7x's 64 MiB physical VMEM.
    itemsize = x.dtype.itemsize
    footprint = (2 * (C * 2 * L + c_out * M) * itemsize
                 + 2 * (sel.size * sel.dtype.itemsize
                        + w8c.size * w8c.dtype.itemsize
                        + b_col.size * b_col.dtype.itemsize))
    vmem_limit = int(min(48 * 2**20, max(16 * 2**20, 2 * footprint)))

    # TODO(synk): for production channel counts (C >= 256) add a C-block
    # reduction grid axis with a VMEM accumulator to stay inside v7x VMEM.
    out4 = pl.pallas_call(
        _conv_kernel,
        out_shape=jax.ShapeDtypeStruct((N, Do, c_out, Ho * Wo), x.dtype),
        grid=grid,
        in_specs=[
            pl.BlockSpec((1, C, 1, 2, L), lambda n, d, h: (n, 0, d, 0, h)),
            pl.BlockSpec((c_out, 8 * C), lambda n, d, h: (0, 0)),
            pl.BlockSpec((4, L, M), lambda n, d, h: (0, 0, 0)),
            pl.BlockSpec((c_out, 1), lambda n, d, h: (0, 0)),
        ],
        out_specs=pl.BlockSpec((1, 1, c_out, M), lambda n, d, h: (n, d, 0, h)),
        compiler_params=pltpu.CompilerParams(
            dimension_semantics=("parallel", "parallel", "parallel"),
            vmem_limit_bytes=vmem_limit,
        ),
    )(xr, w8c, sel, b_col)

    # Restore NCDHW on the (8x smaller) output: cheap layout plumbing.
    return out4.reshape(N, Do, c_out, Ho, Wo).transpose(0, 2, 1, 3, 4)


# ----------------------------------------------------------------------------
# with_conv=False : avg_pool3d(kernel_size=2, stride=2)
# ----------------------------------------------------------------------------
def _avgpool_kernel(x_ref, s_ref, o_ref):
    """x_ref: (bm, 2, H2*W2), rows = (n, c, do) triples; s_ref: (H2*W2, Ho*Wo)."""
    f32 = jnp.float32
    v = x_ref[...].astype(f32)               # single block load, no strided refs
    vsum = v[:, 0, :] + v[:, 1, :]           # D-pair sum, (bm, H2*W2)
    # (H, W) 2x2 mean as one matmul with a 0.125 selection matrix -> lane-dense.
    o_ref[...] = jnp.dot(vsum, s_ref[...],
                         preferred_element_type=f32,
                         precision=_HIGHEST).astype(o_ref.dtype)


@jax.jit
def downsample_avgpool(x):
    N, C = x.shape[0], x.shape[1]
    x, Do, Ho, Wo = _even_trim(x)
    H2, W2 = 2 * Ho, 2 * Wo
    HW, M = H2 * W2, Ho * Wo
    M1 = N * C * Do
    xr = x.reshape(M1, 2, HW)                # free HBM reshape

    # Row-block size: ~8 MiB input blocks (feedback: bigger tiles on 128 MiB
    # parts), multiple of 8, and >=2 grid steps so both v7x TCs get work.
    itemsize = x.dtype.itemsize
    row_bytes = 2 * HW * itemsize
    bm = max(8, min((8 * 2**20) // max(row_bytes, 1), 1024) // 8 * 8)
    bm = min(bm, M1)
    if bm >= M1 and M1 > 8:
        bm = max(8, (M1 // 2) // 8 * 8)
    grid = (pl.cdiv(M1, bm),)

    # spool[h2*W2+w2, ho*Wo+wo] = 0.125 iff h2//2==ho and w2//2==wo.
    l = jnp.arange(HW)
    h2, w2 = l // W2, l % W2
    m = jnp.arange(M)
    ho, wo = m // Wo, m % Wo
    spool = ((h2[:, None] // 2 == ho[None, :]) &
             (w2[:, None] // 2 == wo[None, :])).astype(jnp.float32) * 0.125

    footprint = 2 * (bm * 2 * HW + bm * M) * itemsize + 2 * spool.size * 4
    vmem_limit = int(min(48 * 2**20, max(16 * 2**20, 2 * footprint)))

    out = pl.pallas_call(
        _avgpool_kernel,
        out_shape=jax.ShapeDtypeStruct((M1, M), x.dtype),
        grid=grid,
        in_specs=[
            pl.BlockSpec((bm, 2, HW), lambda i: (i, 0, 0)),
            pl.BlockSpec((HW, M), lambda i: (0, 0)),
        ],
        out_specs=pl.BlockSpec((bm, M), lambda i: (i, 0)),
        compiler_params=pltpu.CompilerParams(
            dimension_semantics=("parallel",),
            vmem_limit_bytes=vmem_limit,
        ),
    )(xr, spool)
    return out.reshape(N, C, Do, Ho, Wo)


def downsample(x, params=None, with_conv=False):
    """Forward pass of Downsample. `params` = prepare_conv_params(weight, bias)."""
    if with_conv:
        w8c, b_col = params
        return downsample_conv(x, w8c, b_col)
    return downsample_avgpool(x)


# ----------------------------------------------------------------------------
# Demo / correctness check
# ----------------------------------------------------------------------------
if __name__ == "__main__":
    key = jax.random.PRNGKey(0)
    k_x, k_w, k_b = jax.random.split(key, 3)

    N, C, D, H, W = 2, 8, 16, 16, 16
    x = jax.random.normal(k_x, (N, C, D, H, W), dtype=jnp.float32)

    # Synthetic Conv3d parameters (shape-matched to nn.Conv3d(C, C, 2, 2, 0))
    weight = jax.random.normal(k_w, (C, C, 2, 2, 2), dtype=jnp.float32) * 0.1
    bias = jax.random.normal(k_b, (C,), dtype=jnp.float32) * 0.1
    conv_params = prepare_conv_params(weight, bias)

    # with_conv = True path
    y_conv = jax.block_until_ready(downsample(x, conv_params, with_conv=True))
    # with_conv = False path
    y_pool = jax.block_until_ready(downsample(x, with_conv=False))

    # Reference checks (plain JAX)
    ref_conv = jax.lax.conv_general_dilated(
        x, weight, window_strides=(2, 2, 2), padding="VALID",
        dimension_numbers=("NCDHW", "OIDHW", "NCDHW"),
        precision=jax.lax.Precision.HIGHEST,
    ) + bias.reshape(1, C, 1, 1, 1)
    ref_pool = jnp.mean(
        x.reshape(N, C, D // 2, 2, H // 2, 2, W // 2, 2), axis=(3, 5, 7))

    assert y_conv.shape == (N, C, D // 2, H // 2, W // 2)
    assert y_pool.shape == (N, C, D // 2, H // 2, W // 2)
    err_conv = float(jnp.max(jnp.abs(y_conv - ref_conv)))
    err_pool = float(jnp.max(jnp.abs(y_pool - ref_pool)))
    assert jnp.allclose(y_conv, ref_conv, atol=2e-2, rtol=2e-2), err_conv
    assert jnp.allclose(y_pool, ref_pool, atol=2e-3, rtol=2e-3), err_pool

    print("KERNEL_OK")
</pallas_src>

<mosaic_0001>
module attributes {stable_mosaic.version = 11 : i64} {
  func.func @_conv_kernel(%arg0: i32, %arg1: i32, %arg2: i32, %arg3: memref<1x8x1x2x256xf32, #tpu.memory_space<vmem>>, %arg4: memref<8x64xf32, #tpu.memory_space<vmem>>, %arg5: memref<4x256x64xf32, #tpu.memory_space<vmem>>, %arg6: memref<8x1xf32, #tpu.memory_space<vmem>>, %arg7: memref<1x1x8x64xf32, #tpu.memory_space<vmem>>) attributes {dimension_semantics = [#tpu.dimension_semantics<parallel>, #tpu.dimension_semantics<parallel>, #tpu.dimension_semantics<parallel>], iteration_bounds = array<i64: 2, 8, 1>, scalar_prefetch = 0 : i64, scratch_operands = 0 : i64, tpu.core_type = #tpu.core_type<tc>, window_params = [{transform_indices = @transform_0, window_bounds = array<i64: 1, 8, 1, 2, 256>}, {pipeline_mode = #tpu.pipeline_mode<synchronous>, transform_indices = @transform_1, window_bounds = array<i64: 8, 64>}, {pipeline_mode = #tpu.pipeline_mode<synchronous>, transform_indices = @transform_2, window_bounds = array<i64: 4, 256, 64>}, {pipeline_mode = #tpu.pipeline_mode<synchronous>, transform_indices = @transform_3, window_bounds = array<i64: 8, 1>}, {transform_indices = @transform_4, window_bounds = array<i64: 1, 1, 8, 64>}]} {
    %c0 = arith.constant 0 : index
    %c0_0 = arith.constant 0 : index
    %c0_1 = arith.constant 0 : index
    %c0_2 = arith.constant 0 : index
    %c0_3 = arith.constant 0 : index
    %0 = vector.load %arg3[%c0, %c0_0, %c0_1, %c0_2, %c0_3] : memref<1x8x1x2x256xf32, #tpu.memory_space<vmem>>, vector<1x8x1x1x256xf32>
    %1 = vector.shape_cast %0 : vector<1x8x1x1x256xf32> to vector<8x256xf32>
    %c0_4 = arith.constant 0 : index
    %c0_5 = arith.constant 0 : index
    %c0_6 = arith.constant 0 : index
    %c1 = arith.constant 1 : index
    %c0_7 = arith.constant 0 : index
    %2 = vector.load %arg3[%c0_4, %c0_5, %c0_6, %c1, %c0_7] : memref<1x8x1x2x256xf32, #tpu.memory_space<vmem>>, vector<1x8x1x1x256xf32>
    %3 = vector.shape_cast %2 : vector<1x8x1x1x256xf32> to vector<8x256xf32>
    %c0_8 = arith.constant 0 : index
    %c0_9 = arith.constant 0 : index
    %c0_10 = arith.constant 0 : index
    %4 = vector.load %arg5[%c0_8, %c0_9, %c0_10] : memref<4x256x64xf32, #tpu.memory_space<vmem>>, vector<1x256x64xf32>
    %5 = vector.shape_cast %4 : vector<1x256x64xf32> to vector<256x64xf32>
    %cst = arith.constant dense<0.000000e+00> : vector<8x64xf32>
    %6 = tpu.matmul %1, %5, %cst {dimension_numbers = #tpu.dot_dimension_numbers<[1], [0], [0], [1], [0, 0, 1, 1], [], []>, precision = #tpu.contract_precision<fp32>} : vector<8x256xf32>, vector<256x64xf32>, vector<8x64xf32> -> vector<8x64xf32>
    %c1_11 = arith.constant 1 : index
    %c0_12 = arith.constant 0 : index
    %c0_13 = arith.constant 0 : index
    %7 = vector.load %arg5[%c1_11, %c0_12, %c0_13] : memref<4x256x64xf32, #tpu.memory_space<vmem>>, vector<1x256x64xf32>
    %8 = vector.shape_cast %7 : vector<1x256x64xf32> to vector<256x64xf32>
    %cst_14 = arith.constant dense<0.000000e+00> : vector<8x64xf32>
    %9 = tpu.matmul %1, %8, %cst_14 {dimension_numbers = #tpu.dot_dimension_numbers<[1], [0], [0], [1], [0, 0, 1, 1], [], []>, precision = #tpu.contract_precision<fp32>} : vector<8x256xf32>, vector<256x64xf32>, vector<8x64xf32> -> vector<8x64xf32>
    %c2 = arith.constant 2 : index
    %c0_15 = arith.constant 0 : index
    %c0_16 = arith.constant 0 : index
    %10 = vector.load %arg5[%c2, %c0_15, %c0_16] : memref<4x256x64xf32, #tpu.memory_space<vmem>>, vector<1x256x64xf32>
    %11 = vector.shape_cast %10 : vector<1x256x64xf32> to vector<256x64xf32>
    %cst_17 = arith.constant dense<0.000000e+00> : vector<8x64xf32>
    %12 = tpu.matmul %1, %11, %cst_17 {dimension_numbers = #tpu.dot_dimension_numbers<[1], [0], [0], [1], [0, 0, 1, 1], [], []>, precision = #tpu.contract_precision<fp32>} : vector<8x256xf32>, vector<256x64xf32>, vector<8x64xf32> -> vector<8x64xf32>
    %c3 = arith.constant 3 : index
    %c0_18 = arith.constant 0 : index
    %c0_19 = arith.constant 0 : index
    %13 = vector.load %arg5[%c3, %c0_18, %c0_19] : memref<4x256x64xf32, #tpu.memory_space<vmem>>, vector<1x256x64xf32>
    %14 = vector.shape_cast %13 : vector<1x256x64xf32> to vector<256x64xf32>
    %cst_20 = arith.constant dense<0.000000e+00> : vector<8x64xf32>
    %15 = tpu.matmul %1, %14, %cst_20 {dimension_numbers = #tpu.dot_dimension_numbers<[1], [0], [0], [1], [0, 0, 1, 1], [], []>, precision = #tpu.contract_precision<fp32>} : vector<8x256xf32>, vector<256x64xf32>, vector<8x64xf32> -> vector<8x64xf32>
    %c0_21 = arith.constant 0 : index
    %c0_22 = arith.constant 0 : index
    %c0_23 = arith.constant 0 : index
    %16 = vector.load %arg5[%c0_21, %c0_22, %c0_23] : memref<4x256x64xf32, #tpu.memory_space<vmem>>, vector<1x256x64xf32>
    %17 = vector.shape_cast %16 : vector<1x256x64xf32> to vector<256x64xf32>
    %cst_24 = arith.constant dense<0.000000e+00> : vector<8x64xf32>
    %18 = tpu.matmul %3, %17, %cst_24 {dimension_numbers = #tpu.dot_dimension_numbers<[1], [0], [0], [1], [0, 0, 1, 1], [], []>, precision = #tpu.contract_precision<fp32>} : vector<8x256xf32>, vector<256x64xf32>, vector<8x64xf32> -> vector<8x64xf32>
    %c1_25 = arith.constant 1 : index
    %c0_26 = arith.constant 0 : index
    %c0_27 = arith.constant 0 : index
    %19 = vector.load %arg5[%c1_25, %c0_26, %c0_27] : memref<4x256x64xf32, #tpu.memory_space<vmem>>, vector<1x256x64xf32>
    %20 = vector.shape_cast %19 : vector<1x256x64xf32> to vector<256x64xf32>
    %cst_28 = arith.constant dense<0.000000e+00> : vector<8x64xf32>
    %21 = tpu.matmul %3, %20, %cst_28 {dimension_numbers = #tpu.dot_dimension_numbers<[1], [0], [0], [1], [0, 0, 1, 1], [], []>, precision = #tpu.contract_precision<fp32>} : vector<8x256xf32>, vector<256x64xf32>, vector<8x64xf32> -> vector<8x64xf32>
    %c2_29 = arith.constant 2 : index
    %c0_30 = arith.constant 0 : index
    %c0_31 = arith.constant 0 : index
    %22 = vector.load %arg5[%c2_29, %c0_30, %c0_31] : memref<4x256x64xf32, #tpu.memory_space<vmem>>, vector<1x256x64xf32>
    %23 = vector.shape_cast %22 : vector<1x256x64xf32> to vector<256x64xf32>
    %cst_32 = arith.constant dense<0.000000e+00> : vector<8x64xf32>
    %24 = tpu.matmul %3, %23, %cst_32 {dimension_numbers = #tpu.dot_dimension_numbers<[1], [0], [0], [1], [0, 0, 1, 1], [], []>, precision = #tpu.contract_precision<fp32>} : vector<8x256xf32>, vector<256x64xf32>, vector<8x64xf32> -> vector<8x64xf32>
    %c3_33 = arith.constant 3 : index
    %c0_34 = arith.constant 0 : index
    %c0_35 = arith.constant 0 : index
    %25 = vector.load %arg5[%c3_33, %c0_34, %c0_35] : memref<4x256x64xf32, #tpu.memory_space<vmem>>, vector<1x256x64xf32>
    %26 = vector.shape_cast %25 : vector<1x256x64xf32> to vector<256x64xf32>
    %cst_36 = arith.constant dense<0.000000e+00> : vector<8x64xf32>
    %27 = tpu.matmul %3, %26, %cst_36 {dimension_numbers = #tpu.dot_dimension_numbers<[1], [0], [0], [1], [0, 0, 1, 1], [], []>, precision = #tpu.contract_precision<fp32>} : vector<8x256xf32>, vector<256x64xf32>, vector<8x64xf32> -> vector<8x64xf32>
    %28 = tpu.concatenate %6, %9, %12, %15, %18, %21, %24, %27 in 0 : vector<8x64xf32>, vector<8x64xf32>, vector<8x64xf32>, vector<8x64xf32>, vector<8x64xf32>, vector<8x64xf32>, vector<8x64xf32>, vector<8x64xf32> -> vector<64x64xf32>
    %c0_37 = arith.constant 0 : index
    %c0_38 = arith.constant 0 : index
    %29 = vector.load %arg4[%c0_37, %c0_38] : memref<8x64xf32, #tpu.memory_space<vmem>>, vector<8x64xf32>
    %cst_39 = arith.constant dense<0.000000e+00> : vector<8x64xf32>
    %30 = tpu.matmul %29, %28, %cst_39 {dimension_numbers = #tpu.dot_dimension_numbers<[1], [0], [0], [1], [0, 0, 1, 1], [], []>, precision = #tpu.contract_precision<fp32>} : vector<8x64xf32>, vector<64x64xf32>, vector<8x64xf32> -> vector<8x64xf32>
    %c0_40 = arith.constant 0 : index
    %c0_41 = arith.constant 0 : index
    %31 = vector.load %arg6[%c0_40, %c0_41] : memref<8x1xf32, #tpu.memory_space<vmem>>, vector<8x1xf32>
    %32 = vector.broadcast %31 : vector<8x1xf32> to vector<8x64xf32>
    %33 = arith.addf %30, %32 : vector<8x64xf32>
    %34 = vector.shape_cast %33 : vector<8x64xf32> to vector<1x1x8x64xf32>
    %c0_42 = arith.constant 0 : index
    %c0_43 = arith.constant 0 : index
    %c0_44 = arith.constant 0 : index
    %c0_45 = arith.constant 0 : index
    %35 = vector.load %arg7[%c0_42, %c0_43, %c0_44, %c0_45] : memref<1x1x8x64xf32, #tpu.memory_space<vmem>>, vector<1x1x8x64xf32>
    tpu.vector_store %arg7[%c0_42, %c0_43, %c0_44, %c0_45], %34 {strides = array<i32>} : memref<1x1x8x64xf32, #tpu.memory_space<vmem>>, vector<1x1x8x64xf32>,
    return
  }
  func.func @transform_0(%arg0: i32, %arg1: i32, %arg2: i32) -> (i32, i32, i32, i32, i32) {
    %c0_i32 = arith.constant 0 : i32
    %c0_i32_0 = arith.constant 0 : i32
    %c0_i32_1 = arith.constant 0 : i32
    return %arg0, %c0_i32, %arg1, %c0_i32_0, %arg2 : i32, i32, i32, i32, i32
  }
  func.func @transform_1(%arg0: i32, %arg1: i32, %arg2: i32) -> (i32, i32) {
    %c0_i32 = arith.constant 0 : i32
    %c0_i32_0 = arith.constant 0 : i32
    %c0_i32_1 = arith.constant 0 : i32
    return %c0_i32, %c0_i32_0 : i32, i32
  }
  func.func @transform_2(%arg0: i32, %arg1: i32, %arg2: i32) -> (i32, i32, i32) {
    %c0_i32 = arith.constant 0 : i32
    %c0_i32_0 = arith.constant 0 : i32
    %c0_i32_1 = arith.constant 0 : i32
    %c0_i32_2 = arith.constant 0 : i32
    return %c0_i32, %c0_i32_0, %c0_i32_1 : i32, i32, i32
  }
  func.func @transform_3(%arg0: i32, %arg1: i32, %arg2: i32) -> (i32, i32) {
    %c0_i32 = arith.constant 0 : i32
    %c0_i32_0 = arith.constant 0 : i32
    %c0_i32_1 = arith.constant 0 : i32
    return %c0_i32, %c0_i32_0 : i32, i32
  }
  func.func @transform_4(%arg0: i32, %arg1: i32, %arg2: i32) -> (i32, i32, i32, i32) {
    %c0_i32 = arith.constant 0 : i32
    %c0_i32_0 = arith.constant 0 : i32
    return %arg0, %arg1, %c0_i32, %arg2 : i32, i32, i32, i32
  }
}

</mosaic_0001>

<bundles_post_ra>
// kernel: downsample_conv.1
= control target key start
LH: loop header
LB: loop body
LE: loop exit
PB: predicated region body
PF: predicated region fallthrough
CT: control target
= control target key end

     0   :  { %s6718_s15 = smov 0   ;;  %s6720_s16 = smov 0   ;;  %s10732_s0 = inlined_call_operand.vmem [shape: f32[2,8,8,2,256], index: 0, kind: input, shape index: {}]   ;;  %s10733_s1 = inlined_call_operand.vmem [shape: f32[8,64], index: 1, kind: input, shape index: {}]   ;;  %s10734_s2 = inlined_call_operand.vmem [shape: f32[4,256,64], index: 2, kind: input, shape index: {}]   ;;  %s10735_s3 = inlined_call_operand.vmem [shape: f32[8,1], index: 3, kind: input, shape index: {}]   ;;  %s10736_s4 = inlined_call_operand.vmem [shape: f32[2,8,8,64], index: 4, kind: output, shape index: {}]  }
   0x1   :  { %s6722_s17 = smov 0   ;;  %s6724_s18 = smov 0  }
   0x2   :  { %s6726_s19 = smov 0   ;;  %s6728_s20 = smov 0  }
   0x3   :  { %s6730_s21 = smov 0  }
   0x4 LB: > { %s29_s22 = sadd.s32 1, %s6682_s19  ;;  %s33_s23 = sadd.s32 1, %s6686_s20  ;;  %s6690_s21 = sphi %s6730_s21, %s14_s21   ;;  %s6686_s20 = sphi %s6728_s20, %s12436_s20   ;;  %s6682_s19 = sphi %s6726_s19, %s12435_s19   ;;  %s6678_s18 = sphi %s6724_s18, %s12434_s18   ;;  %s6674_s17 = sphi %s6722_s17, %s12433_s17   ;;  %s6670_s16 = sphi %s6720_s16, %s12432_s16   ;;  %s6666_s15 = sphi %s6718_s15, %s12431_s15  }
   0x5   : > { %p31_p0 = scmp.ge.s32.totalorder %s29_s22, 8  ;;  %p51_p1 = scmp.ne.s32.totalorder %s6670_s16, %s6666_s15 }
   0x6   : > { %p52_p2 = scmp.eq.s32.totalorder %s6690_s21, 0  ;;  %s44_s27 = sadd.s32 1, %s6670_s16 }
   0x7   : > { %s12438_s22 = smov (%p31_p0, %s29_s22), 0  ;;  %s12440_s23 = smov (!%p31_p0, %s33_s23), %s6686_s20 }
   0x8   : > { %p53_p3 = por %p52_p2, %p51_p1  ;;  %p35_p4 = scmp.ge.s32.totalorder %s12440_s23, 2 }
   0x9   : > { %s38_s24 = ssub.s32 %s6682_s19, %s12438_s22  ;;  %p6456_p6 = scmp.ge.s32.totalorder %s6690_s21, 16 }
   0xa   : > { %s12442_s23 = smov (%p35_p4, %s12440_s23), 0 }
   0xb   : > { %s37_s25 = ssub.s32 %s6686_s20, %s12442_s23  ;;  %179 = sbr.rel (%p6456_p6) target bundleno = 31 (0x1f), region = 28 }
   0xc   : > { %s39_s26 = sor.u32 %s38_s24, %s37_s25 }
   0xd   : > { %p42_p5 = scmp.eq.s32.totalorder %s39_s26, 0 }
   0xf   : > { %s6769_s28 = scalar_select %p42_p5, %s6670_s16, %s44_s27  }
  0x10   : > { %182 = sbr.rel (!%p53_p3) target bundleno = 31 (0x1f), region = 32  ;;  %s184_s29 = sand.u32 (%p53_p3), 1, %s6670_s16  }
  0x11   : > { %s6458_s30 = sshll.u32 (%p53_p3), %s6682_s19, 1  ;;  %s6457_s5 = sshll.u32 (%p53_p3), %s184_s29, 5 }
  0x12   : > { %s6459_s6 = sshll.u32 (%p53_p3), %s6686_s20, 7  ;;  %s186_s12 = scalar_lea.vmem (%p53_p3), [#allocation2], %s6457_s5 }
  0x13   : > { %s191_s7 = sadd.s32 (%p53_p3), %s6459_s6, %s6458_s30 }
  0x14   : > { %s6460_s8 = sshll.u32 (%p53_p3), %s191_s7, 1 }
  0x15   : > { %s193_s11 = scalar_lea.vmem %s10732_s0, %s6460_s8 }
  0x16   : > { %v210_v0 = vld [vmem:[%s193_s11] sm:$0xf] }
  0x17   : > { %v212_v1 = vld [vmem:[%s193_s11 + $0x20] sm:$0xf]  ;;  %211 = vst [vmem:[%s186_s12] sm:$0xf] %v210_v0 }
  0x18   : > { %v214_v2 = vld [vmem:[%s193_s11 + $0x40] sm:$0xf]  ;;  %213 = vst [vmem:[%s186_s12 + $0x4] sm:$0xf] %v212_v1 }
  0x19   : > { %v216_v3 = vld [vmem:[%s193_s11 + $0x60] sm:$0xf]  ;;  %215 = vst [vmem:[%s186_s12 + $0x8] sm:$0xf] %v214_v2 }
  0x1a   : > { %v218_v4 = vld [vmem:[%s193_s11 + $0x80] sm:$0xf]  ;;  %217 = vst [vmem:[%s186_s12 + $0xc] sm:$0xf] %v216_v3 }
  0x1b   : > { %v220_v5 = vld [vmem:[%s193_s11 + $0xa0] sm:$0xf]  ;;  %219 = vst [vmem:[%s186_s12 + $0x10] sm:$0xf] %v218_v4 }
  0x1c   : > { %v222_v6 = vld [vmem:[%s193_s11 + $0xc0] sm:$0xf]  ;;  %221 = vst [vmem:[%s186_s12 + $0x14] sm:$0xf] %v220_v5 }
  0x1d   : > { %v224_v7 = vld [vmem:[%s193_s11 + $0xe0] sm:$0xf]  ;;  %223 = vst [vmem:[%s186_s12 + $0x18] sm:$0xf] %v222_v6 }
  0x1e   : > { %225 = vst [vmem:[%s186_s12 + $0x1c] sm:$0xf] %v224_v7 }
  0x1f PF: > { %p6461_p7 = scmp.ge.s32.totalorder %s6690_s21, 1  ;;  %p264_p8 = scmp.lt.s32.totalorder %s6690_s21, 17 }
  0x21   : > { %p265_p9 = pnand %p6461_p7, %p264_p8 }
  0x23   : > { %268 = sbr.rel (%p265_p9) target bundleno = 1347 (0x543), region = 73 }
  0x28   : > { %v360_v8 = vld [vmem:[%s10734_s2 + $0x78] sm:$0xff]  ;;  %v359_v9 = vld [vmem:[%s10734_s2 + $0x70] sm:$0xff]  ;;  %v358_v10 = vld [vmem:[%s10734_s2 + $0x68] sm:$0xff]  ;;  %s271_s29 = sand.u32 1, %s6666_s15   ;;  %vm6107_vm0 = vcmask 523264   ;;  %p303_p10 = scmp.lt.s32.totalorder %s6678_s18, 1 }
  0x29   : > { %v6789_v11 = vand.u32 4294901760, %v360_v8  ;;  %v6791_v12 = vand.u32 4294901760, %v359_v9  ;;  %v6793_v13 = vand.u32 4294901760, %v358_v10  ;;  %v357_v14 = vld [vmem:[%s10734_s2 + $0x60] sm:$0xff]  ;;  %v356_v15 = vld [vmem:[%s10734_s2 + $0x58] sm:$0xff]  ;;  %v355_v16 = vld [vmem:[%s10734_s2 + $0x50] sm:$0xff] }
  0x2a   : > { %v6804_v17 = vand.u32 4294901760, %v357_v14  ;;  %v6806_v18 = vand.u32 4294901760, %v356_v15  ;;  %v6808_v19 = vand.u32 4294901760, %v355_v16  ;;  %v354_v20 = vld [vmem:[%s10734_s2 + $0x48] sm:$0xff]  ;;  %v353_v21 = vld [vmem:[%s10734_s2 + $0x40] sm:$0xff]  ;;  %v352_v26 = vld [vmem:[%s10734_s2 + $0x38] sm:$0xff] }
  0x2b   : > { %11382 = vst [vmem:[#allocation3_spill] sm:$0xff] %v6789_v11  ;;  %405 = vmatpush.msra.mxu0 %v6789_v11  ;;  %v6818_v22 = vsub.f32 %v360_v8, %v6789_v11  ;;  %v6821_v23 = vsub.f32 %v359_v9, %v6791_v12  ;;  %601 = vmatpush.msra.mxu3 %v6789_v11  ;;  %v6827_v25 = vand.u32 4294901760, %v354_v20  ;;  %v351_v30 = vld [vmem:[%s10734_s2 + $0x30] sm:$0xff]  ;;  %v6855_v34 = vand.u32 4294901760, %v353_v21  ;;  %v350_v35 = vld [vmem:[%s10734_s2 + $0x28] sm:$0xff]  ;;  %v349_v51 = vld [vmem:[%s10734_s2 + $0x20] sm:$0xff] }
  0x2c   : > { %11383 = vst [vmem:[#allocation4_spill] sm:$0xff] %v6791_v12  ;;  %v6825_v24 = vsub.f32 %v358_v10, %v6793_v13  ;;  %v6833_v27 = vsub.f32 %v357_v14, %v6804_v17  ;;  %v6836_v28 = vsub.f32 %v356_v15, %v6806_v18  ;;  %v6839_v29 = vsub.f32 %v355_v16, %v6808_v19  ;;  %s6907_s5 = sshll.u32 %s271_s29, 5  ;;  %v348_v56 = vld [vmem:[%s10734_s2 + $0x18] sm:$0xff]  ;;  %v347_v58 = vld [vmem:[%s10734_s2 + $0x10] sm:$0xff]  ;;  %v346_v63 = vld [vmem:[%s10734_s2 + $0x8] sm:$0xff]  ;;  %p305_p11 = scmp.lt.s32.totalorder %s6674_s17, 7 }
  0x2d   : > { %11384 = vst [vmem:[#allocation5_spill] sm:$0xff] %v6793_v13  ;;  %407 = vmatpush.msra.mxu0 %v6791_v12  ;;  %548 = vmatpush.msra.mxu2 %v6818_v22  ;;  %v6847_v31 = vand.u32 4294901760, %v6818_v22  ;;  %v6850_v32 = vand.u32 4294901760, %v6821_v23  ;;  %v6864_v37 = vand.u32 4294901760, %v352_v26  ;;  %v6870_v39 = vsub.f32 %v354_v20, %v6827_v25  ;;  %v376_v7 = vld [vmem:[%s10734_s2 + $0xf8] sm:$0xff]  ;;  %s6975_s14 = scalar_lea.vmem [#allocation2], %s6907_s5 }
  0x2e   : > { %11385 = vst [vmem:[#allocation6_spill] sm:$0xff] %v6804_v17  ;;  %v6853_v33 = vand.u32 4294901760, %v6825_v24  ;;  %603 = vmatpush.msra.mxu3 %v6791_v12  ;;  %v6862_v36 = vand.u32 4294901760, %v6833_v27  ;;  %v6867_v38 = vand.u32 4294901760, %v6836_v28  ;;  %v6880_v43 = vand.u32 4294901760, %v351_v30  ;;  %v345_v16 = vld [vmem:[%s10734_s2] sm:$0xff] }
  0x2f   : > { %11386 = vst [vmem:[#allocation7_spill] sm:$0xff] %v6806_v18  ;;  %409 = vmatpush.msra.mxu0 %v6793_v13  ;;  %551 = vmatpush.msra.mxu2 %v6821_v23  ;;  %v448_v40 = vsub.f32 %v6818_v22, %v6847_v31  ;;  %v454_v41 = vsub.f32 %v6821_v23, %v6850_v32  ;;  %v6885_v44 = vand.u32 4294901760, %v6839_v29  ;;  %v6887_v45 = vand.u32 4294901760, %v350_v35  ;;  %v6978_v9 = vld [vmem:[%s6975_s14] ss:$2 sm:$0x3] }
  0x30   : > { %11387 = vst [vmem:[#allocation8_spill] sm:$0xff] %v6808_v19  ;;  %v460_v42 = vsub.f32 %v6825_v24, %v6853_v33  ;;  %605 = vmatpush.msra.mxu3 %v6793_v13  ;;  %v466_v48 = vsub.f32 %v6833_v27, %v6862_v36  ;;  %v6898_v49 = vsub.f32 %v353_v21, %v6855_v34  ;;  %v6916_v54 = vand.u32 4294901760, %v6870_v39  ;;  %v375_v20 = vld [vmem:[%s10734_s2 + $0xf0] sm:$0xff]  ;;  %s12444_s18 = smov (!%p303_p10, %s6678_s18), 1  ;;  %s12446_s17 = smov (!%p305_p11, %s6674_s17), 7 }
  0x31   : > { %11388 = vst [vmem:[#allocation9_spill] sm:$0xff] %v6818_v22  ;;  %411 = vmatpush.msra.mxu0 %v6804_v17  ;;  %v6890_v46 = vand.u32 4294901760, %v448_v40  ;;  %554 = vmatpush.msra.mxu2 %v6825_v24  ;;  %v6893_v47 = vand.u32 4294901760, %v454_v41  ;;  %v6902_v50 = vsub.f32 %v352_v26, %v6864_v37  ;;  %v472_v53 = vsub.f32 %v6836_v28, %v6867_v38  ;;  %s6463_s27 = sshll.u32 %s12444_s18, 3 }
  0x32   : > { %11389 = vst [vmem:[#allocation10_spill] sm:$0xff] %v6821_v23  ;;  %607 = vmatpush.msra.mxu3 %v6804_v17  ;;  %v6911_v52 = vand.u32 4294901760, %v460_v42  ;;  %v6919_v55 = vsub.f32 %v351_v30, %v6880_v43  ;;  %v6927_v57 = vsub.f32 %v350_v35, %v6887_v45  ;;  %v6934_v59 = vand.u32 4294901760, %v466_v48  ;;  %v7121_v23 = vld [vmem:[%s6975_s14 + $0x1c] ss:$2 sm:$0x3]  ;;  %s311_s29 = sadd.s32 %s6463_s27, %s12446_s17 }
  0x33   : > { %11390 = vst [vmem:[#allocation11_spill] sm:$0xff] %v6825_v24  ;;  %413 = vmatpush.msra.mxu0 %v6806_v18  ;;  %450 = vmatpush.msra.mxu1 %v6890_v46  ;;  %v478_v60 = vsub.f32 %v6839_v29, %v6885_v44  ;;  %v6938_v61 = vand.u32 4294901760, %v349_v51  ;;  %v6941_v62 = vand.u32 4294901760, %v6898_v49  ;;  %v6948_v0 = vand.u32 4294901760, %v348_v56  ;;  %s6464_s15 = sshll.u32 %s311_s29, 3 }
  0x34   : > { %11391 = vst [vmem:[#allocation12_spill] sm:$0xff] %v6827_v25  ;;  %557 = vmatpush.msra.mxu2 %v6833_v27  ;;  %609 = vmatpush.msra.mxu3 %v6806_v18  ;;  %v6951_v1 = vand.u32 4294901760, %v6902_v50  ;;  %v6954_v2 = vand.u32 4294901760, %v6919_v55  ;;  %v6958_v3 = vand.u32 4294901760, %v472_v53  ;;  %v484_v4 = vsub.f32 %v6870_v39, %v6916_v54  ;;  %s313_s6 = scalar_lea.vmem %s10736_s4, %s6464_s15 }
  0x35   : > { %11392 = vst [vmem:[#allocation13_spill] sm:$0xff] %v6833_v27  ;;  %415 = vmatpush.msra.mxu0 %v6808_v19  ;;  %456 = vmatpush.msra.mxu1 %v6893_v47  ;;  %v6962_v5 = vand.u32 4294901760, %v347_v58  ;;  %v6965_v6 = vand.u32 4294901760, %v6927_v57  ;;  %v6972_v8 = vand.u32 4294901760, %v346_v63  ;;  %v6982_v10 = vand.u32 4294901760, %v478_v60 }
  0x36   : > { %11393 = vst [vmem:[#allocation14_spill] sm:$0xff] %v6836_v28  ;;  %560 = vmatpush.msra.mxu2 %v6836_v28  ;;  %611 = vmatpush.msra.mxu3 %v6808_v19  ;;  %v490_v14 = vsub.f32 %v6898_v49, %v6941_v62  ;;  %v6987_v15 = vsub.f32 %v349_v51, %v6938_v61  ;;  %v7004_v35 = vand.u32 4294901760, %v376_v7  ;;  %v7008_v40 = vand.u32 4294901760, %v484_v4  ;;  %v7039_v4 = vld [vmem:[%s6975_s14 + $0x4] ss:$2 sm:$0x3] }
  0x37   : > { %11394 = vst [vmem:[#allocation15_spill] sm:$0xff] %v6839_v29  ;;  %417 = vmatpush.msra.mxu0 %v6827_v25  ;;  %462 = vmatpush.msra.mxu1 %v6911_v52  ;;  %v496_v21 = vsub.f32 %v6902_v50, %v6951_v1  ;;  %v502_v26 = vsub.f32 %v6919_v55, %v6954_v2  ;;  %v7018_v48 = vand.u32 4294901760, %v345_v16  ;;  %v7023_v53 = vand.u32 4294901760, %v375_v20  ;;  %v7086_v28 = vld [vmem:[%s6975_s14 + $0x10] ss:$2 sm:$0x3] }
  0x38   : > { %11395 = vst [vmem:[#allocation16_spill] sm:$0xff] %v6847_v31  ;;  %563 = vmatpush.msra.mxu2 %v6839_v29  ;;  %613 = vmatpush.msra.mxu3 %v6827_v25  ;;  %v7002_v30 = vsub.f32 %v348_v56, %v6948_v0  ;;  %v508_v41 = vsub.f32 %v6927_v57, %v6965_v6  ;;  %v374_v56 = vld [vmem:[%s10734_s2 + $0xe8] sm:$0xff]  ;;  %v7033_v60 = vand.u32 4294901760, %v6987_v15  ;;  %v7108_v27 = vld [vmem:[%s6975_s14 + $0x18] ss:$2 sm:$0x3] }
  0x39   : > { %11396 = vst [vmem:[#allocation17_spill] sm:$0xff] %v6850_v32  ;;  %419 = vmatpush.msra.mxu0 %v6855_v34  ;;  %468 = vmatpush.msra.mxu1 %v6934_v59  ;;  %v7013_v42 = vsub.f32 %v347_v58, %v6962_v5  ;;  %v7021_v51 = vsub.f32 %v346_v63, %v6972_v8  ;;  %v7030_v58 = vand.u32 4294901760, %v490_v14  ;;  %v373_v63 = vld [vmem:[%s10734_s2 + $0xe0] sm:$0xff] }
  0x3a   : > { %11397 = vst [vmem:[#allocation18_spill] sm:$0xff] %v6853_v33  ;;  %566 = vmatpush.msra.mxu2 %v6870_v39  ;;  %615 = vmatpush.msra.mxu3 %v6855_v34  ;;  %v7048_v14 = vand.u32 4294901760, %v7002_v30  ;;  %v7074_v29 = vsub.f32 %v345_v16, %v7018_v48  ;;  %v514_v16 = vsub.f32 %v6987_v15, %v7033_v60 }
  0x3b   : > { %11398 = vst [vmem:[#allocation19_spill] sm:$0xff] %v6855_v34  ;;  %421 = vmatpush.msra.mxu0 %v6864_v37  ;;  %474 = vmatpush.msra.mxu1 %v6958_v3 }
  0x3c   : > { %11399 = vst [vmem:[#allocation20_spill] sm:$0xff] %v6862_v36  ;;  %569 = vmatpush.msra.mxu2 %v6898_v49  ;;  %617 = vmatpush.msra.mxu3 %v6864_v37  ;;  %v7127_v22 = vand.u32 4294901760, %v7074_v29 }
  0x3d   : > { %11400 = vst [vmem:[#allocation21_spill] sm:$0xff] %v6864_v37  ;;  %423 = vmatpush.msra.mxu0 %v6880_v43  ;;  %480 = vmatpush.msra.mxu1 %v6982_v10 }
  0x3e   : > { %11401 = vst [vmem:[#allocation22_spill] sm:$0xff] %v6867_v38  ;;  %572 = vmatpush.msra.mxu2 %v6902_v50  ;;  %619 = vmatpush.msra.mxu3 %v6880_v43 }
  0x3f   : > { %11402 = vst [vmem:[#allocation23_spill] sm:$0xff] %v6870_v39  ;;  %v372_v39 = vld [vmem:[%s10734_s2 + $0xd8] sm:$0xff]  ;;  %425 = vmatpush.msra.mxu0 %v6887_v45  ;;  %486 = vmatpush.msra.mxu1 %v7008_v40 }
  0x40   : > { %11403 = vst [vmem:[#allocation24_spill] sm:$0xff] %v6880_v43  ;;  %575 = vmatpush.msra.mxu2 %v6919_v55  ;;  %621 = vmatpush.msra.mxu3 %v6887_v45 }
  0x41   : > { %11404 = vst [vmem:[#allocation25_spill] sm:$0xff] %v6885_v44  ;;  %427 = vmatpush.msra.mxu0 %v6938_v61  ;;  %492 = vmatpush.msra.mxu1 %v7030_v58 }
  0x42   : > { %11405 = vst [vmem:[#allocation26_spill] sm:$0xff] %v6887_v45  ;;  %578 = vmatpush.msra.mxu2 %v6927_v57  ;;  %623 = vmatpush.msra.mxu3 %v6938_v61  ;;  %v369_v45 = vld [vmem:[%s10734_s2 + $0xc0] sm:$0xff] }
  0x43   : > { %11406 = vst [vmem:[#allocation27_spill] sm:$0xff] %v6890_v46  ;;  %429 = vmatpush.msra.mxu0 %v6948_v0  ;;  %v520_v46 = vsub.f32 %v7002_v30, %v7048_v14 }
  0x44   : > { %11407 = vst [vmem:[#allocation28_spill] sm:$0xff] %v6893_v47  ;;  %v7099_v47 = vld [vmem:[%s6975_s14 + $0x14] ss:$2 sm:$0x3]  ;;  %581 = vmatpush.msra.mxu2 %v6987_v15  ;;  %625 = vmatpush.msra.mxu3 %v6948_v0 }
  0x45   : > { %11408 = vst [vmem:[#allocation29_spill] sm:$0xff] %v6898_v49  ;;  %v7042_v49 = vand.u32 4294901760, %v496_v21  ;;  %v7061_v21 = vand.u32 4294901760, %v508_v41  ;;  %v7080_v41 = vsub.f32 %v375_v20, %v7023_v53  ;;  %v370_v20 = vld [vmem:[%s10734_s2 + $0xc8] sm:$0xff]  ;;  %431 = vmatpush.msra.mxu0 %v6962_v5 }
  0x46   : > { %11409 = vst [vmem:[#allocation30_spill] sm:$0xff] %v6902_v50  ;;  %v7066_v50 = vand.u32 4294901760, %v374_v56  ;;  %584 = vmatpush.msra.mxu2 %v7002_v30  ;;  %627 = vmatpush.msra.mxu3 %v6962_v5 }
  0x47   : > { %11410 = vst [vmem:[#allocation31_spill] sm:$0xff] %v6911_v52  ;;  %v371_v52 = vld [vmem:[%s10734_s2 + $0xd0] sm:$0xff]  ;;  %498 = vmatpush.msra.mxu1 %v7042_v49  ;;  %433 = vmatpush.msra.mxu0 %v6972_v8 }
  0x48   : > { %11411 = vst [vmem:[#allocation32_spill] sm:$0xff] %v6916_v54  ;;  %v7116_v24 = vsub.f32 %v374_v56, %v7066_v50  ;;  %v7135_v56 = vand.u32 4294901760, %v514_v16  ;;  %587 = vmatpush.msra.mxu2 %v7013_v42  ;;  %629 = vmatpush.msra.mxu3 %v6972_v8 }
  0x49   : > { %11412 = vst [vmem:[#allocation33_spill] sm:$0xff] %v6919_v55  ;;  %v7093_v55 = vand.u32 4294901760, %v373_v63  ;;  %435 = vmatpush.msra.mxu0 %v7018_v48 }
  0x4a   : > { %11413 = vst [vmem:[#allocation34_spill] sm:$0xff] %v6927_v57  ;;  %v7118_v57 = vand.u32 4294901760, %v372_v39  ;;  %590 = vmatpush.msra.mxu2 %v7021_v51  ;;  %631 = vmatpush.msra.mxu3 %v7018_v48 }
  0x4b   : > { %11414 = vst [vmem:[#allocation35_spill] sm:$0xff] %v6934_v59  ;;  %v7057_v59 = vld [vmem:[%s6975_s14 + $0x8] ss:$2 sm:$0x3]  ;;  %642 = vmatpush.msrb.mxu0 %v6847_v31 }
  0x4c   : > { %11415 = vst [vmem:[#allocation36_spill] sm:$0xff] %v6938_v61  ;;  %593 = vmatpush.msra.mxu2 %v7074_v29 }
  0x4d   : > { %11416 = vst [vmem:[#allocation37_spill] sm:$0xff] %v6941_v62  ;;  %646 = vmatpush.msrb.mxu0 %v6850_v32 }
  0x4e   : > { %11417 = vst [vmem:[#allocation38_spill] sm:$0xff] %v6948_v0  ;;  %v7142_v0 = vand.u32 4294901760, %v371_v52  ;;  %746 = vmatpush.msrb.mxu2 %v7004_v35 }
  0x4f   : > { %11418 = vst [vmem:[#allocation39_spill] sm:$0xff] %v6951_v1  ;;  %650 = vmatpush.msrb.mxu0 %v6853_v33 }
  0x50   : > { %11419 = vst [vmem:[#allocation40_spill] sm:$0xff] %v6954_v2  ;;  %748 = vmatpush.msrb.mxu2 %v7023_v53 }
  0x51   : > { %11420 = vst [vmem:[#allocation41_spill] sm:$0xff] %v6958_v3  ;;  %v7045_v3 = vand.u32 4294901760, %v502_v26  ;;  %v7064_v26 = vand.u32 4294901760, %v7013_v42  ;;  %654 = vmatpush.msrb.mxu0 %v6862_v36 }
  0x52   : > { %11421 = vst [vmem:[#allocation42_spill] sm:$0xff] %v6962_v5  ;;  %v7165_v5 = vsub.f32 %v372_v39, %v7118_v57  ;;  %v538_v39 = vsub.f32 %v7074_v29, %v7127_v22  ;;  %750 = vmatpush.msrb.mxu2 %v7066_v50 }
  0x53   : > { %11422 = vst [vmem:[#allocation43_spill] sm:$0xff] %v6965_v6  ;;  %504 = vmatpush.msra.mxu1 %v7045_v3  ;;  %v526_v61 = vsub.f32 %v7013_v42, %v7064_v26  ;;  %658 = vmatpush.msrb.mxu0 %v6867_v38 }
  0x54   : > { %11423 = vst [vmem:[#allocation44_spill] sm:$0xff] %v6972_v8  ;;  %v7221_v31 = vand.u32 4294901760, %v538_v39  ;;  %v365_v39 = vld [vmem:[%s10734_s2 + $0xa0] sm:$0xff]  ;;  %752 = vmatpush.msrb.mxu2 %v7093_v55 }
  0x55   : > { %11424 = vst [vmem:[#allocation45_spill] sm:$0xff] %v6978_v9  ;;  %510 = vmatpush.msra.mxu1 %v7061_v21  ;;  %662 = vmatpush.msrb.mxu0 %v6885_v44 }
  0x56   : > { %11425 = vst [vmem:[#allocation46_spill] sm:$0xff] %v6982_v10  ;;  %v7051_v10 = vsub.f32 %v376_v7, %v7004_v35  ;;  %v7069_v7 = vld [vmem:[%s6975_s14 + $0xc] ss:$2 sm:$0x3]  ;;  %754 = vmatpush.msrb.mxu2 %v7118_v57 }
  0x57   : > { %11426 = vst [vmem:[#allocation47_spill] sm:$0xff] %v6987_v15  ;;  %v7140_v15 = vsub.f32 %v373_v63, %v7093_v55  ;;  %v7157_v63 = vand.u32 4294901760, %v520_v46  ;;  %v368_v46 = vld [vmem:[%s10734_s2 + $0xb8] sm:$0xff]  ;;  %516 = vmatpush.msra.mxu1 %v7135_v56  ;;  %666 = vmatpush.msrb.mxu0 %v6916_v54 }
  0x58   : > { %11427 = vst [vmem:[#allocation48_spill] sm:$0xff] %v7002_v30  ;;  %v7162_v30 = vand.u32 4294901760, %v7116_v24  ;;  %756 = vmatpush.msrb.mxu2 %v7142_v0 }
  0x59   : > { %11428 = vst [vmem:[#allocation49_spill] sm:$0xff] %v7004_v35  ;;  %522 = vmatpush.msra.mxu1 %v7157_v63  ;;  %670 = vmatpush.msrb.mxu0 %v6941_v62 }
  0x5a   : > { %11429 = vst [vmem:[#allocation50_spill] sm:$0xff] %v7008_v40  ;;  %v7077_v40 = vand.u32 4294901760, %v7021_v51 }
  0x5b   : > { %11430 = vst [vmem:[#allocation51_spill] sm:$0xff] %v7013_v42  ;;  %v7183_v42 = vand.u32 4294901760, %v7140_v15  ;;  %674 = vmatpush.msrb.mxu0 %v6951_v1 }
  0x5c   : > { %385 = vst [vmem:[#allocation1] ss:$9 sm:$0xff] %v6978_v9  ;;  %v532_v43 = vsub.f32 %v7021_v51, %v7077_v40 }
  0x5d   : > { %11431 = vst [vmem:[#allocation52_spill] sm:$0xff] %v7018_v48  ;;  %v807_v32 = vsub.f32 %v7140_v15, %v7183_v42  ;;  %678 = vmatpush.msrb.mxu0 %v6954_v2 }
  0x5e   : > { %11432 = vst [vmem:[#allocation53_spill] sm:$0xff] %v7021_v51  ;;  %v7205_v51 = vand.u32 4294901760, %v7165_v5 }
  0x5f   : > { %11433 = vst [vmem:[#allocation54_spill] sm:$0xff] %v7023_v53  ;;  %682 = vmatpush.msrb.mxu0 %v6965_v6 }
  0x60   : > { %11434 = vst [vmem:[#allocation55_spill] sm:$0xff] %v7030_v58  ;;  %v7105_v58 = vand.u32 4294901760, %v7051_v10  ;;  %v813_v33 = vsub.f32 %v7165_v5, %v7205_v51 }
  0x61   : > { %11435 = vst [vmem:[#allocation56_spill] sm:$0xff] %v7033_v60  ;;  %686 = vmatpush.msrb.mxu0 %v7033_v60 }
  0x62   : > { %11436 = vst [vmem:[#allocation57_spill] sm:$0xff] %v7039_v4  ;;  %v789_v16 = vsub.f32 %v7051_v10, %v7105_v58 }
  0x63   : > { %11437 = vst [vmem:[#allocation58_spill] sm:$0xff] %v7042_v49  ;;  %v7130_v49 = vand.u32 4294901760, %v7080_v41  ;;  %690 = vmatpush.msrb.mxu0 %v7048_v14 }
  0x64   : > { %11438 = vst [vmem:[#allocation59_spill] sm:$0xff] %v7045_v3  ;;  %v7152_v3 = vand.u32 4294901760, %v370_v20  ;;  %v7190_v8 = vand.u32 4294901760, %v789_v16  ;;  %v7207_v16 = vand.u32 4294901760, %v368_v46 }
  0x65   : > { %11439 = vst [vmem:[#allocation60_spill] sm:$0xff] %v7048_v14  ;;  %694 = vmatpush.msrb.mxu0 %v7064_v26 }
  0x66   : > { %11440 = vst [vmem:[#allocation61_spill] sm:$0xff] %v7051_v10  ;;  %v7171_v10 = vand.u32 4294901760, %v369_v45  ;;  %791 = vmatpush.msrb.mxu3 %v7190_v8  ;;  %758 = vmatpush.msrb.mxu2 %v7152_v3 }
  0x67   : > { %11441 = vst [vmem:[#allocation62_spill] sm:$0xff] %v7057_v59  ;;  %698 = vmatpush.msrb.mxu0 %v7077_v40 }
  0x68   : > { %11442 = vst [vmem:[#allocation63_spill] sm:$0xff] %v7061_v21  ;;  %v7178_v21 = vand.u32 4294901760, %v526_v61  ;;  %v367_v61 = vld [vmem:[%s10734_s2 + $0xb0] sm:$0xff]  ;;  %760 = vmatpush.msrb.mxu2 %v7171_v10 }
  0x69   : > { %11443 = vst [vmem:[#allocation64_spill] sm:$0xff] %v7064_v26  ;;  %v11516_v26 = vld [vmem:[#allocation26_spill] sm:$0xff]  ;;  %702 = vmatpush.msrb.mxu0 %v7127_v22 }
  0x6a   : > { %11444 = vst [vmem:[#allocation65_spill] sm:$0xff] %v7066_v50  ;;  %528 = vmatpush.msra.mxu1 %v7178_v21  ;;  %762 = vmatpush.msrb.mxu2 %v7207_v16 }
  0x6b   : > { %11445 = vst [vmem:[#allocation66_spill] sm:$0xff] %v7069_v7 }
  0x6c   : > { %11446 = vst [vmem:[#allocation67_spill] sm:$0xff] %v7074_v29 }
  0x6d   : > { %11447 = vst [vmem:[#allocation68_spill] sm:$0xff] %v7077_v40 }
  0x6e   : > { %11448 = vst [vmem:[#allocation69_spill] sm:$0xff] %v7080_v41 }
  0x6f   : > { %11449 = vst [vmem:[#allocation70_spill] sm:$0xff] %v7086_v28 }
  0x70   : > { %387 = vst [vmem:[#allocation1 + $0x1] ss:$9 sm:$0xff] %v7039_v4 }
  0x71   : > { %11450 = vst [vmem:[#allocation71_spill] sm:$0xff] %v7093_v55 }
  0x72   : > { %11451 = vst [vmem:[#allocation72_spill] sm:$0xff] %v7099_v47 }
  0x73   : > { %389 = vst [vmem:[#allocation1 + $0x2] ss:$9 sm:$0xff] %v7057_v59 }
  0x74   : > { %11452 = vst [vmem:[#allocation73_spill] sm:$0xff] %v7105_v58  ;;  %v795_v58 = vsub.f32 %v7080_v41, %v7130_v49  ;;  %v7193_v41 = vsub.f32 %v370_v20, %v7152_v3 }
  0x75   : > { %11453 = vst [vmem:[#allocation74_spill] sm:$0xff] %v7108_v27 }
  0x76   : > { %391 = vst [vmem:[#allocation1 + $0x3] ss:$9 sm:$0xff] %v7069_v7  ;;  %v7211_v20 = vand.u32 4294901760, %v795_v58  ;;  %v7228_v58 = vand.u32 4294901760, %v367_v61 }
  0x77   : > { %11454 = vst [vmem:[#allocation75_spill] sm:$0xff] %v7116_v24 }
  0x78   : > { %11455 = vst [vmem:[#allocation76_spill] sm:$0xff] %v7118_v57  ;;  %797 = vmatpush.msrb.mxu3 %v7211_v20  ;;  %764 = vmatpush.msrb.mxu2 %v7228_v58 }
  0x79   : > { %11456 = vst [vmem:[#allocation77_spill] sm:$0xff] %v7121_v23 }
  0x7a   : > { %393 = vst [vmem:[#allocation1 + $0x4] ss:$9 sm:$0xff] %v7086_v28 }
  0x7b   : > { %11457 = vst [vmem:[#allocation78_spill] sm:$0xff] %v7127_v22 }
  0x7c   : > { %11458 = vst [vmem:[#allocation79_spill] sm:$0xff] %v7130_v49  ;;  %v7186_v49 = vsub.f32 %v371_v52, %v7142_v0  ;;  %v801_v52 = vsub.f32 %v7116_v24, %v7162_v30 }
  0x7d   : > { %395 = vst [vmem:[#allocation1 + $0x5] ss:$9 sm:$0xff] %v7099_v47 }
  0x7e   : > { %11459 = vst [vmem:[#allocation80_spill] sm:$0xff] %v7135_v56  ;;  %v7199_v56 = vand.u32 4294901760, %v532_v43  ;;  %v366_v43 = vld [vmem:[%s10734_s2 + $0xa8] sm:$0xff]  ;;  %v7226_v29 = vand.u32 4294901760, %v7186_v49 }
  0x7f   : > { %11460 = vst [vmem:[#allocation81_spill] sm:$0xff] %v7140_v15  ;;  %v7252_v48 = vand.u32 4294901760, %v366_v43 }
  0x80   : > { %11461 = vst [vmem:[#allocation82_spill] sm:$0xff] %v7142_v0  ;;  %534 = vmatpush.msra.mxu1 %v7199_v56  ;;  %v819_v36 = vsub.f32 %v7186_v49, %v7226_v29 }
  0x81   : > { %397 = vst [vmem:[#allocation1 + $0x6] ss:$9 sm:$0xff] %v7108_v27  ;;  %766 = vmatpush.msrb.mxu2 %v7252_v48 }
  0x82   : > { %11462 = vst [vmem:[#allocation83_spill] sm:$0xff] %v7152_v3  ;;  %540 = vmatpush.msra.mxu1 %v7221_v31 }
  0x83   : > { %399 = vst [vmem:[#allocation1 + $0x7] ss:$9 sm:$0xff] %v7121_v23 }
  0x84   : > { %11463 = vst [vmem:[#allocation84_spill] sm:$0xff] %v7157_v63  ;;  %v7214_v63 = vsub.f32 %v369_v45, %v7171_v10  ;;  %709 = vmatpush.msrb.mxu1 %v6789_v11 }
  0x85   : > { %11464 = vst [vmem:[#allocation85_spill] sm:$0xff] %v7162_v30 }
  0x86   : > { %11465 = vst [vmem:[#allocation86_spill] sm:$0xff] %v7165_v5  ;;  %711 = vmatpush.msrb.mxu1 %v6791_v12 }
  0x87   : > { %11466 = vst [vmem:[#allocation87_spill] sm:$0xff] %v7171_v10 }
  0x88   : > { %11467 = vst [vmem:[#allocation88_spill] sm:$0xff] %v7178_v21  ;;  %v7237_v21 = vand.u32 4294901760, %v7193_v41  ;;  %713 = vmatpush.msrb.mxu1 %v6793_v13 }
  0x89   : > { %11468 = vst [vmem:[#allocation89_spill] sm:$0xff] %v7183_v42  ;;  %v7245_v42 = vand.u32 4294901760, %v801_v52  ;;  %v364_v52 = vld [vmem:[%s10734_s2 + $0x98] sm:$0xff] }
  0x8a   : > { %11469 = vst [vmem:[#allocation90_spill] sm:$0xff] %v7186_v49  ;;  %v7230_v45 = vld [vmem:[#allocation1] sm:$0xff]  ;;  %v7232_v30 = vld [vmem:[#allocation1 + $0x9] sm:$0xff]  ;;  %v7291_v38 = vand.u32 4294901760, %v364_v52  ;;  %715 = vmatpush.msrb.mxu1 %v6804_v17 }
  0x8b   : > { %11470 = vst [vmem:[#allocation91_spill] sm:$0xff] %v7190_v8  ;;  %v7250_v8 = vsub.f32 %v368_v46, %v7207_v16  ;;  %v7266_v46 = vand.u32 4294901760, %v807_v32  ;;  %803 = vmatpush.msrb.mxu3 %v7245_v42  ;;  %v7283_v32 = vand.u32 4294901760, %v813_v33  ;;  %v363_v33 = vld [vmem:[%s10734_s2 + $0x90] sm:$0xff]  ;;  %v7313_v12 = vand.u32 4294901760, %v7230_v45 }
  0x8c   : > { %11471 = vst [vmem:[#allocation92_spill] sm:$0xff] %v7193_v41  ;;  %v7333_v54 = vsub.f32 %v364_v52, %v7291_v38  ;;  %717 = vmatpush.msrb.mxu1 %v6806_v18 }
  0x8d   : > { %11472 = vst [vmem:[#allocation93_spill] sm:$0xff] %v7199_v56  ;;  %v7258_v56 = vand.u32 4294901760, %v7214_v63  ;;  %809 = vmatpush.msrb.mxu3 %v7266_v46  ;;  %v7348_v52 = vsub.f32 %v7230_v45, %v7313_v12  ;;  %542 = vmatmul.f32.vlgmr.msra.gmra.mxu1 %v7313_v12 }
  0x8e   : > { %11473 = vst [vmem:[#allocation94_spill] sm:$0xff] %v7205_v51  ;;  %v7364_v62 = vand.u32 4294901760, %v7333_v54  ;;  %719 = vmatpush.msrb.mxu1 %v6808_v19 }
  0x8f   : > { %11474 = vst [vmem:[#allocation95_spill] sm:$0xff] %v7207_v16  ;;  %v831_v11 = vsub.f32 %v7214_v63, %v7258_v56  ;;  %815 = vmatpush.msrb.mxu3 %v7283_v32  ;;  %v438_v18 = vand.u32 4294901760, %v7348_v52  ;;  %596 = vmatmul.f32.vlgmr.msra.gmra.mxu2 %v7348_v52 }
  0x90   : > { %11475 = vst [vmem:[#allocation96_spill] sm:$0xff] %v7211_v20  ;;  %v7271_v20 = vsub.f32 %v367_v61, %v7228_v58  ;;  %v7286_v61 = vand.u32 4294901760, %v7250_v8  ;;  %721 = vmatpush.msrb.mxu1 %v6827_v25  ;;  %v7408_v25 = vand.u32 4294901760, %v7232_v30 }
  0x91   : > { %11476 = vst [vmem:[#allocation97_spill] sm:$0xff] %v7214_v63  ;;  %635 = vmatmul.f32.vlgmr.msra.gmra.mxu3 %v438_v18 }
  0x92   : > { %11477 = vst [vmem:[#allocation98_spill] sm:$0xff] %v7221_v31  ;;  %v825_v31 = vsub.f32 %v7193_v41, %v7237_v21  ;;  %723 = vmatpush.msrb.mxu1 %v6855_v34 }
  0x93   : > { %11478 = vst [vmem:[#allocation99_spill] sm:$0xff] %v7226_v29 }
  0x94   : > { %11479 = vst [vmem:[#allocation100_spill] sm:$0xff] %v7228_v58  ;;  %725 = vmatpush.msrb.mxu1 %v6864_v37  ;;  %v11521_v37 = vld [vmem:[#allocation38_spill] sm:$0xff] }
  0x95   : > { %11480 = vst [vmem:[#allocation101_spill] sm:$0xff] %v7237_v21 }
  0x96   : > { %1119 = vst [vmem:[#allocation1] ss:$9 sm:$0xff] %v6978_v9 }
  0x97   : > { %11481 = vst [vmem:[#allocation102_spill] sm:$0xff] %v7245_v42  ;;  %v7307_v42 = vand.u32 4294901760, %v7271_v20 }
  0x98   : > { %11482 = vst [vmem:[#allocation103_spill] sm:$0xff] %v7250_v8 }
  0x99   : > { %11483 = vst [vmem:[#allocation104_spill] sm:$0xff] %v7252_v48 }
  0x9a   : > { %1121 = vst [vmem:[#allocation1 + $0x1] ss:$9 sm:$0xff] %v7039_v4  ;;  %v7273_v4 = vand.u32 4294901760, %v365_v39 }
  0x9b   : > { %11484 = vst [vmem:[#allocation105_spill] sm:$0xff] %v7258_v56 }
  0x9c   : > { %1123 = vst [vmem:[#allocation1 + $0x2] ss:$9 sm:$0xff] %v7057_v59  ;;  %v7310_v44 = vsub.f32 %v365_v39, %v7273_v4  ;;  %v837_v39 = vsub.f32 %v7250_v8, %v7286_v61  ;;  %768 = vmatpush.msrb.mxu2 %v7273_v4 }
  0x9d   : > { %11485 = vst [vmem:[#allocation106_spill] sm:$0xff] %v7266_v46 }
  0x9e   : > { %11486 = vst [vmem:[#allocation107_spill] sm:$0xff] %v7271_v20  ;;  %v7344_v13 = vand.u32 4294901760, %v7310_v44  ;;  %770 = vmatpush.msrb.mxu2 %v7291_v38 }
  0x9f   : > { %11487 = vst [vmem:[#allocation108_spill] sm:$0xff] %v7273_v4 }
  0xa0   : > { %1125 = vst [vmem:[#allocation1 + $0x3] ss:$9 sm:$0xff] %v7069_v7  ;;  %v7289_v7 = vsub.f32 %v366_v43, %v7252_v48  ;;  %v7304_v43 = vand.u32 4294901760, %v819_v36  ;;  %v362_v36 = vld [vmem:[%s10734_s2 + $0x88] sm:$0xff] }
  0xa1   : > { %1127 = vst [vmem:[#allocation1 + $0x4] ss:$9 sm:$0xff] %v7086_v28 }
  0xa2   : > { %11488 = vst [vmem:[#allocation109_spill] sm:$0xff] %v7283_v32  ;;  %v7328_v46 = vand.u32 4294901760, %v7289_v7  ;;  %821 = vmatpush.msrb.mxu3 %v7304_v43  ;;  %v843_v32 = vsub.f32 %v7271_v20, %v7307_v42 }
  0xa3   : > { %11489 = vst [vmem:[#allocation110_spill] sm:$0xff] %v7286_v61 }
  0xa4   : > { %11490 = vst [vmem:[#allocation111_spill] sm:$0xff] %v7289_v7  ;;  %v849_v45 = vsub.f32 %v7289_v7, %v7328_v46 }
  0xa5   : > { %11491 = vst [vmem:[#allocation112_spill] sm:$0xff] %v7291_v38 }
  0xa6   : > { %1129 = vst [vmem:[#allocation1 + $0x5] ss:$9 sm:$0xff] %v7099_v47  ;;  %v7350_v47 = vand.u32 4294901760, %v362_v36  ;;  %v7387_v2 = vand.u32 4294901760, %v849_v45  ;;  %v439_v45 = vsub.f32 %v7348_v52, %v438_v18  ;;  %v11526_v52 = vld [vmem:[#allocation44_spill] sm:$0xff]  ;;  %v11529_v18 = vld [vmem:[#allocation85_spill] sm:$0xff] }
  0xa7   : > { %1131 = vst [vmem:[#allocation1 + $0x6] ss:$9 sm:$0xff] %v7108_v27  ;;  %v7318_v27 = vand.u32 4294901760, %v825_v31  ;;  %v7337_v31 = vand.u32 4294901760, %v831_v11  ;;  %v361_v11 = vld [vmem:[%s10734_s2 + $0x80] sm:$0xff] }
  0xa8   : > { %11492 = vst [vmem:[#allocation113_spill] sm:$0xff] %v7304_v43  ;;  %v7359_v43 = vand.u32 4294901760, %v837_v39  ;;  %v7371_v1 = vand.u32 4294901760, %v361_v11  ;;  %v7375_v39 = vand.u32 4294901760, %v843_v32  ;;  %v861_v32 = vsub.f32 %v7333_v54, %v7364_v62 }
  0xa9   : > { %11493 = vst [vmem:[#allocation114_spill] sm:$0xff] %v7307_v42  ;;  %827 = vmatpush.msrb.mxu3 %v7318_v27  ;;  %v440_v14 = vand.u32 4294901760, %v439_v45  ;;  %v11518_v45 = vld [vmem:[#allocation36_spill] sm:$0xff] }
  0xaa   : > { %11494 = vst [vmem:[#allocation115_spill] sm:$0xff] %v7310_v44 }
  0xab   : > { %1133 = vst [vmem:[#allocation1 + $0x7] ss:$9 sm:$0xff] %v7121_v23  ;;  %v7330_v23 = vand.u32 4294901760, %v363_v33  ;;  %833 = vmatpush.msrb.mxu3 %v7337_v31  ;;  %441 = vmatmul.f32.vlgmr.msra.gmra.mxu0 %v440_v14  ;;  %v11525_v14 = vld [vmem:[#allocation73_spill] sm:$0xff] }
  0xac   : > { %11495 = vst [vmem:[#allocation116_spill] sm:$0xff] %v7318_v27  ;;  %v855_v27 = vsub.f32 %v7310_v44, %v7344_v13 }
  0xad   : > { %11496 = vst [vmem:[#allocation117_spill] sm:$0xff] %v7328_v46  ;;  %v7367_v17 = vsub.f32 %v363_v33, %v7330_v23  ;;  %v7381_v33 = vsub.f32 %v362_v36, %v7350_v47  ;;  %839 = vmatpush.msrb.mxu3 %v7359_v43  ;;  %v7397_v36 = vsub.f32 %v361_v11, %v7371_v1  ;;  %v7414_v11 = vand.u32 4294901760, %v861_v32 }
  0xae   : > { %11497 = vst [vmem:[#allocation118_spill] sm:$0xff] %v7330_v23  ;;  %v7429_v32 = vsub.f32 %v7232_v30, %v7408_v25  ;;  %772 = vmatpush.msrb.mxu2 %v7330_v23 }
  0xaf   : > { %11498 = vst [vmem:[#allocation119_spill] sm:$0xff] %v7333_v54  ;;  %845 = vmatpush.msrb.mxu3 %v7375_v39  ;;  %v7405_v6 = vand.u32 4294901760, %v7381_v33  ;;  %v7421_v60 = vand.u32 4294901760, %v7397_v36 }
  0xb0   : > { %11499 = vst [vmem:[#allocation120_spill] sm:$0xff] %v7337_v31  ;;  %v7392_v31 = vand.u32 4294901760, %v7367_v17  ;;  %774 = vmatpush.msrb.mxu2 %v7350_v47  ;;  %v10849_v40 = vand.u32 4294901760, %v7429_v32 }
  0xb1   : > { %11500 = vst [vmem:[#allocation121_spill] sm:$0xff] %v7344_v13  ;;  %851 = vmatpush.msrb.mxu3 %v7387_v2 }
  0xb2   : > { %11501 = vst [vmem:[#allocation122_spill] sm:$0xff] %v7350_v47  ;;  %776 = vmatpush.msrb.mxu2 %v7371_v1 }
  0xb3   : > { %11502 = vst [vmem:[#allocation123_spill] sm:$0xff] %v7359_v43  ;;  %v7401_v43 = vand.u32 4294901760, %v855_v27  ;;  %v867_v27 = vsub.f32 %v7367_v17, %v7392_v31  ;;  %704 = vmatmul.f32.vlgmr.msrb.gmra.mxu0 %v7313_v12 }
  0xb4   : > { %11503 = vst [vmem:[#allocation124_spill] sm:$0xff] %v7364_v62  ;;  %983 = vmatpush.msra.mxu2 %v11525_v14 }
  0xb5   : > { %11504 = vst [vmem:[#allocation125_spill] sm:$0xff] %v7367_v17  ;;  %857 = vmatpush.msrb.mxu3 %v7401_v43 }
  0xb6   : > { %11505 = vst [vmem:[#allocation126_spill] sm:$0xff] %v7371_v1 }
  0xb7   : > { %11506 = vst [vmem:[#allocation127_spill] sm:$0xff] %v7375_v39  ;;  %v11514_v39 = vld [vmem:[#allocation24_spill] sm:$0xff]  ;;  %863 = vmatpush.msrb.mxu3 %v7414_v11 }
  0xb8   : > { %11507 = vst [vmem:[#allocation128_spill] sm:$0xff] %v7381_v33  ;;  %727 = vmatpush.msrb.mxu1 %v11514_v39  ;;  %v7435_v39 = vand.u32 4294901760, %v867_v27  ;;  %v11522_v27 = vld [vmem:[#allocation69_spill] sm:$0xff] }
  0xb9   : > { %11508 = vst [vmem:[#allocation129_spill] sm:$0xff] %v7387_v2  ;;  %v873_v2 = vsub.f32 %v7381_v33, %v7405_v6 }
  0xba   : > { %11509 = vst [vmem:[#allocation130_spill] sm:$0xff] %v7392_v31  ;;  %729 = vmatpush.msrb.mxu1 %v11516_v26  ;;  %v11520_v26 = vld [vmem:[#allocation61_spill] sm:$0xff]  ;;  %869 = vmatpush.msrb.mxu3 %v7435_v39 }
  0xbb   : > { %11510 = vst [vmem:[#allocation131_spill] sm:$0xff] %v7397_v36  ;;  %v7442_v30 = vand.u32 4294901760, %v873_v2  ;;  %889 = vmatpush.msra.mxu0 %v11520_v26  ;;  %v780_v2 = vsub.f32 %v7429_v32, %v10849_v40  ;;  %v11530_v40 = vld [vmem:[#allocation89_spill] sm:$0xff] }
  0xbc   : > { %11511 = vst [vmem:[#allocation132_spill] sm:$0xff] %v7401_v43  ;;  %731 = vmatpush.msrb.mxu1 %v11518_v45  ;;  %v879_v43 = vsub.f32 %v7397_v36, %v7421_v60 }
  0xbd   : > { %11512 = vst [vmem:[#allocation133_spill] sm:$0xff] %v7405_v6  ;;  %892 = vmatpush.msra.mxu0 %v11522_v27  ;;  %875 = vmatpush.msrb.mxu3 %v7442_v30  ;;  %v11528_v27 = vld [vmem:[#allocation52_spill] sm:$0xff] }
  0xbe   : > { %11513 = vst [vmem:[#allocation134_spill] sm:$0xff] %v7414_v11  ;;  %733 = vmatpush.msrb.mxu1 %v11521_v37  ;;  %v11523_v11 = vld [vmem:[#allocation42_spill] sm:$0xff]  ;;  %v7451_v22 = vand.u32 4294901760, %v879_v43  ;;  %v11527_v43 = vld [vmem:[#allocation79_spill] sm:$0xff] }
  0xbf   : > { %11515 = vst [vmem:[#allocation135_spill] sm:$0xff] %v7421_v60  ;;  %895 = vmatpush.msra.mxu0 %v7116_v24  ;;  %987 = vmatpush.msra.mxu2 %v11527_v43 }
  0xc0   : > { %11517 = vst [vmem:[#allocation136_spill] sm:$0xff] %v7435_v39  ;;  %735 = vmatpush.msrb.mxu1 %v11523_v11  ;;  %881 = vmatpush.msrb.mxu3 %v7451_v22 }
  0xc1   : > { %11519 = vst [vmem:[#allocation137_spill] sm:$0xff] %v7442_v30  ;;  %898 = vmatpush.msra.mxu0 %v7140_v15  ;;  %v781_v30 = vand.u32 4294901760, %v780_v2  ;;  %991 = vmatpush.msra.mxu2 %v11529_v18  ;;  %v11557_v15 = vand.u32 4294901760, %v7429_v32 }
  0xc2   : > { %11524 = vst [vmem:[#allocation138_spill] sm:$0xff] %v7451_v22  ;;  %737 = vmatpush.msrb.mxu1 %v11526_v52  ;;  %1050 = vmatpush.msra.mxu3 %v7004_v35 }
  0xc3   : > { %901 = vmatpush.msra.mxu0 %v7165_v5  ;;  %782 = vmatmul.f32.vlgmr.msrb.gmra.mxu2 %v781_v30  ;;  %v6494_v30 = vld [vmem:[%s10734_s2 + $0x170] sm:$0xff] }
  0xc4   : > { %739 = vmatpush.msrb.mxu1 %v11528_v27  ;;  %1052 = vmatpush.msra.mxu3 %v7023_v53 }
  0xc5   : > { %904 = vmatpush.msra.mxu0 %v7186_v49  ;;  %995 = vmatpush.msra.mxu2 %v11530_v40 }
  0xc6   : > { %942 = vmatpush.msra.mxu1 %v7004_v35  ;;  %1054 = vmatpush.msra.mxu3 %v7066_v50 }
  0xc7   : > { %883 = vmatmul.f32.vlgmr.msrb.gmra.mxu3 %v7408_v25  ;;  %907 = vmatpush.msra.mxu0 %v7193_v41  ;;  %v6486_v41 = vld [vmem:[%s10734_s2 + $0x130] sm:$0xff] }
  0xc8   : > { %944 = vmatpush.msra.mxu1 %v7023_v53  ;;  %999 = vmatpush.msra.mxu2 %v7205_v51  ;;  %v7628_v5 = vand.u32 4294901760, %v6486_v41 }
  0xc9   : > { %1056 = vmatpush.msra.mxu3 %v7093_v55  ;;  %741 = vmatmul.f32.vlgmr.msrb.gmra.mxu1 %v7313_v12  ;;  %v6495_v12 = vld [vmem:[%s10734_s2 + $0x178] sm:$0xff] }
  0xca   : > { %946 = vmatpush.msra.mxu1 %v7066_v50  ;;  %910 = vmatpush.msra.mxu0 %v7214_v63  ;;  %v7508_v2 = vand.u32 4294901760, %v6495_v12  ;;  %11553 = vst [vmem:[#allocation161_spill] sm:$0xff] %v7628_v5 }
  0xcb   : > { %1003 = vmatpush.msra.mxu2 %v7226_v29  ;;  %1058 = vmatpush.msra.mxu3 %v7118_v57  ;;  %v6487_v29 = vld [vmem:[%s10734_s2 + $0x138] sm:$0xff] }
  0xcc   : > { %948 = vmatpush.msra.mxu1 %v7093_v55  ;;  %913 = vmatpush.msra.mxu0 %v7250_v8  ;;  %11531 = vst [vmem:[#allocation139_spill] sm:$0xff] %v7508_v2 }
  0xcd   : > { %1007 = vmatpush.msra.mxu2 %v7237_v21  ;;  %1060 = vmatpush.msra.mxu3 %v7142_v0 }
  0xce   : > { %950 = vmatpush.msra.mxu1 %v7118_v57  ;;  %916 = vmatpush.msra.mxu0 %v7271_v20  ;;  %v6488_v20 = vld [vmem:[%s10734_s2 + $0x140] sm:$0xff] }
  0xcf   : > { %1011 = vmatpush.msra.mxu2 %v7258_v56  ;;  %1062 = vmatpush.msra.mxu3 %v7152_v3  ;;  %v7599_v63 = vand.u32 4294901760, %v6488_v20 }
  0xd0   : > { %952 = vmatpush.msra.mxu1 %v7142_v0  ;;  %919 = vmatpush.msra.mxu0 %v7289_v7 }
  0xd1   : > { %1015 = vmatpush.msra.mxu2 %v7286_v61  ;;  %1064 = vmatpush.msra.mxu3 %v7171_v10  ;;  %v7517_v61 = vand.u32 4294901760, %v6494_v30  ;;  %11546 = vst [vmem:[#allocation154_spill] sm:$0xff] %v7599_v63 }
  0xd2   : > { %954 = vmatpush.msra.mxu1 %v7152_v3  ;;  %922 = vmatpush.msra.mxu0 %v7310_v44  ;;  %v6493_v44 = vld [vmem:[%s10734_s2 + $0x168] sm:$0xff] }
  0xd3   : > { %1019 = vmatpush.msra.mxu2 %v7307_v42  ;;  %1066 = vmatpush.msra.mxu3 %v7207_v16  ;;  %11532 = vst [vmem:[#allocation140_spill] sm:$0xff] %v7517_v61  ;;  %v7526_v42 = vand.u32 4294901760, %v6493_v44  ;;  %v7541_v7 = vsub.f32 %v6494_v30, %v7517_v61 }
  0xd4   : > { %956 = vmatpush.msra.mxu1 %v7171_v10  ;;  %925 = vmatpush.msra.mxu0 %v7333_v54  ;;  %v6492_v54 = vld [vmem:[%s10734_s2 + $0x160] sm:$0xff] }
  0xd5   : > { %1023 = vmatpush.msra.mxu2 %v7328_v46  ;;  %1068 = vmatpush.msra.mxu3 %v7228_v58  ;;  %11533 = vst [vmem:[#allocation141_spill] sm:$0xff] %v7526_v42  ;;  %v7529_v46 = vsub.f32 %v6495_v12, %v7508_v2  ;;  %v6490_v12 = vld [vmem:[%s10734_s2 + $0x150] sm:$0xff]  ;;  %v7556_v30 = vsub.f32 %v6493_v44, %v7526_v42  ;;  %v7568_v56 = vand.u32 4294901760, %v7541_v7 }
  0xd6   : > { %958 = vmatpush.msra.mxu1 %v7207_v16  ;;  %928 = vmatpush.msra.mxu0 %v7367_v17  ;;  %v6491_v17 = vld [vmem:[%s10734_s2 + $0x158] sm:$0xff]  ;;  %11536 = vst [vmem:[#allocation144_spill] sm:$0xff] %v7541_v7 }
  0xd7   : > { %1027 = vmatpush.msra.mxu2 %v7344_v13  ;;  %1070 = vmatpush.msra.mxu3 %v7252_v48  ;;  %11534 = vst [vmem:[#allocation142_spill] sm:$0xff] %v7529_v46  ;;  %v7538_v13 = vand.u32 4294901760, %v6492_v54 }
  0xd8   : > { %960 = vmatpush.msra.mxu1 %v7228_v58  ;;  %931 = vmatpush.msra.mxu0 %v7381_v33  ;;  %v7553_v33 = vand.u32 4294901760, %v7529_v46  ;;  %11539 = vst [vmem:[#allocation147_spill] sm:$0xff] %v7556_v30 }
  0xd9   : > { %1031 = vmatpush.msra.mxu2 %v7364_v62  ;;  %1072 = vmatpush.msra.mxu3 %v7273_v4  ;;  %11535 = vst [vmem:[#allocation143_spill] sm:$0xff] %v7538_v13  ;;  %v7550_v62 = vand.u32 4294901760, %v6491_v17  ;;  %v7571_v44 = vsub.f32 %v6492_v54, %v7538_v13  ;;  %v7585_v54 = vand.u32 4294901760, %v7556_v30 }
  0xda   : > { %962 = vmatpush.msra.mxu1 %v7252_v48  ;;  %934 = vmatpush.msra.mxu0 %v7397_v36  ;;  %11538 = vst [vmem:[#allocation146_spill] sm:$0xff] %v7553_v33  ;;  %v6489_v36 = vld [vmem:[%s10734_s2 + $0x148] sm:$0xff] }
  0xdb   : > { %1035 = vmatpush.msra.mxu2 %v7392_v31  ;;  %1074 = vmatpush.msra.mxu3 %v7291_v38  ;;  %11537 = vst [vmem:[#allocation145_spill] sm:$0xff] %v7550_v62  ;;  %v7565_v31 = vand.u32 4294901760, %v6490_v12  ;;  %v7582_v21 = vand.u32 4294901760, %v6489_v36  ;;  %v7588_v8 = vsub.f32 %v6491_v17, %v7550_v62  ;;  %v7602_v17 = vand.u32 4294901760, %v7571_v44 }
  0xdc   : > { %964 = vmatpush.msra.mxu1 %v7273_v4  ;;  %937 = vmatmul.f32.vlgmr.msra.gmra.mxu0 %v7429_v32  ;;  %11541 = vst [vmem:[#allocation149_spill] sm:$0xff] %v7568_v56 }
  0xdd   : > { %1139 = vmatpush.msrb.mxu0 %v7508_v2  ;;  %1039 = vmatpush.msra.mxu2 %v7405_v6  ;;  %11540 = vst [vmem:[#allocation148_spill] sm:$0xff] %v7565_v31  ;;  %v1182_v6 = vsub.f32 %v7529_v46, %v7553_v33  ;;  %v7605_v51 = vsub.f32 %v6490_v12, %v7565_v31  ;;  %v7621_v49 = vand.u32 4294901760, %v7588_v8 }
  0xde   : > { %966 = vmatpush.msra.mxu1 %v7291_v38  ;;  %11542 = vst [vmem:[#allocation150_spill] sm:$0xff] %v7571_v44  ;;  %1076 = vmatpush.msra.mxu3 %v7330_v23  ;;  %v1194_v12 = vsub.f32 %v7556_v30, %v7585_v54  ;;  %v7624_v18 = vsub.f32 %v6489_v36, %v7582_v21 }
  0xdf   : > { %1141 = vmatpush.msrb.mxu0 %v7517_v61  ;;  %1043 = vmatpush.msra.mxu2 %v7421_v60  ;;  %11543 = vst [vmem:[#allocation151_spill] sm:$0xff] %v7582_v21  ;;  %v1188_v60 = vsub.f32 %v7541_v7, %v7568_v56  ;;  %v7616_v40 = vand.u32 4294901760, %v1182_v6  ;;  %v1200_v36 = vsub.f32 %v7571_v44, %v7602_v17  ;;  %v7640_v43 = vand.u32 4294901760, %v7605_v51 }
  0xe0   : > { %968 = vmatpush.msra.mxu1 %v7330_v23  ;;  %11544 = vst [vmem:[#allocation152_spill] sm:$0xff] %v7585_v54  ;;  %1078 = vmatpush.msra.mxu3 %v7350_v47  ;;  %v7656_v14 = vand.u32 4294901760, %v1194_v12  ;;  %v6483_v12 = vld [vmem:[%s10734_s2 + $0x118] sm:$0xff] }
  0xe1   : > { %11545 = vst [vmem:[#allocation153_spill] sm:$0xff] %v7588_v8  ;;  %1045 = vmatmul.f32.vlgmr.msra.gmra.mxu2 %v7408_v25  ;;  %1143 = vmatpush.msrb.mxu0 %v7526_v42  ;;  %v7635_v6 = vand.u32 4294901760, %v1188_v60  ;;  %v6484_v60 = vld [vmem:[%s10734_s2 + $0x120] sm:$0xff]  ;;  %v7698_v39 = vand.u32 4294901760, %v6483_v12  ;;  %v6511_v23 = vld [vmem:[%s10734_s2 + $0x1f8] sm:$0xff] }
  0xe2   : > { %1282 = vmatpush.msrb.mxu2 %v7529_v46  ;;  %11547 = vst [vmem:[#allocation155_spill] sm:$0xff] %v7602_v17  ;;  %970 = vmatpush.msra.mxu1 %v7350_v47  ;;  %v7612_v46 = vand.u32 4294901760, %v6487_v29  ;;  %v7679_v24 = vand.u32 4294901760, %v6484_v60 }
  0xe3   : > { %11548 = vst [vmem:[#allocation156_spill] sm:$0xff] %v7605_v51  ;;  %1080 = vmatpush.msra.mxu3 %v7371_v1  ;;  %1145 = vmatpush.msrb.mxu0 %v7538_v13 }
  0xe4   : > { %11549 = vst [vmem:[#allocation157_spill] sm:$0xff] %v7612_v46  ;;  %1082 = vmatmul.f32.vlgmr.msra.gmra.mxu3 %v7408_v25  ;;  %1285 = vmatpush.msrb.mxu2 %v7541_v7  ;;  %v6485_v25 = vld [vmem:[%s10734_s2 + $0x128] sm:$0xff]  ;;  %v7643_v7 = vsub.f32 %v6488_v20, %v7599_v63  ;;  %v7649_v22 = vsub.f32 %v6487_v29, %v7612_v46 }
  0xe5   : > { %11550 = vst [vmem:[#allocation158_spill] sm:$0xff] %v7616_v40  ;;  %1335 = vmatpush.msrb.mxu3 %v7508_v2  ;;  %972 = vmatpush.msra.mxu1 %v7371_v1  ;;  %v1206_v20 = vsub.f32 %v7588_v8, %v7621_v49  ;;  %v7660_v32 = vand.u32 4294901760, %v6485_v25  ;;  %v7668_v29 = vsub.f32 %v6486_v41, %v7628_v5 }
  0xe6   : > { %11551 = vst [vmem:[#allocation159_spill] sm:$0xff] %v7621_v49  ;;  %1147 = vmatpush.msrb.mxu0 %v7550_v62  ;;  %976 = vmatmul.f32.vlgmr.msra.gmra.mxu1 %v11557_v15  ;;  %v7663_v15 = vand.u32 4294901760, %v7624_v18  ;;  %v7687_v41 = vand.u32 4294901760, %v7649_v22 }
  0xe7   : > { %11552 = vst [vmem:[#allocation160_spill] sm:$0xff] %v7624_v18  ;;  %1288 = vmatpush.msrb.mxu2 %v7556_v30  ;;  %1184 = vmatpush.msrb.mxu1 %v7616_v40  ;;  %v7675_v40 = vand.u32 4294901760, %v1200_v36  ;;  %v1212_v30 = vsub.f32 %v7605_v51, %v7640_v43  ;;  %v6482_v36 = vld [vmem:[%s10734_s2 + $0x110] sm:$0xff]  ;;  %v7706_v47 = vand.u32 4294901760, %v7668_v29 }
  0xe8   : > { %11554 = vst [vmem:[#allocation162_spill] sm:$0xff] %v7635_v6  ;;  %1337 = vmatpush.msrb.mxu3 %v7517_v61  ;;  %1149 = vmatpush.msrb.mxu0 %v7565_v31  ;;  %v1218_v1 = vsub.f32 %v7624_v18, %v7663_v15  ;;  %v7717_v26 = vand.u32 4294901760, %v6482_v36 }
  0xe9   : > { %11555 = vst [vmem:[#allocation163_spill] sm:$0xff] %v7640_v43  ;;  %1291 = vmatpush.msrb.mxu2 %v7571_v44  ;;  %1190 = vmatpush.msrb.mxu1 %v7635_v6  ;;  %v7682_v44 = vand.u32 4294901760, %v7643_v7  ;;  %v7694_v6 = vand.u32 4294901760, %v1206_v20  ;;  %v6481_v20 = vld [vmem:[%s10734_s2 + $0x108] sm:$0xff]  ;;  %v1236_v48 = vsub.f32 %v7668_v29, %v7706_v47 }
  0xea   : > { %11556 = vst [vmem:[#allocation164_spill] sm:$0xff] %v7643_v7  ;;  %1339 = vmatpush.msrb.mxu3 %v7526_v42  ;;  %1151 = vmatpush.msrb.mxu0 %v7582_v21  ;;  %v7736_v38 = vand.u32 4294901760, %v6481_v20 }
  0xeb   : > { %11558 = vst [vmem:[#allocation165_spill] sm:$0xff] %v7649_v22  ;;  %1294 = vmatpush.msrb.mxu2 %v7588_v8  ;;  %1196 = vmatpush.msrb.mxu1 %v7656_v14  ;;  %v7701_v8 = vsub.f32 %v6485_v25, %v7660_v32  ;;  %v1224_v25 = vsub.f32 %v7643_v7, %v7682_v44 }
  0xec   : > { %11559 = vst [vmem:[#allocation166_spill] sm:$0xff] %v7656_v14  ;;  %1341 = vmatpush.msrb.mxu3 %v7538_v13  ;;  %1153 = vmatpush.msrb.mxu0 %v7599_v63  ;;  %v7713_v14 = vand.u32 4294901760, %v1212_v30  ;;  %v1230_v30 = vsub.f32 %v7649_v22, %v7687_v41  ;;  %v7780_v3 = vsub.f32 %v6481_v20, %v7736_v38 }
  0xed   : > { %11560 = vst [vmem:[#allocation167_spill] sm:$0xff] %v7660_v32  ;;  %1297 = vmatpush.msrb.mxu2 %v7605_v51  ;;  %1202 = vmatpush.msrb.mxu1 %v7675_v40  ;;  %v7720_v51 = vsub.f32 %v6484_v60, %v7679_v24  ;;  %v7734_v60 = vand.u32 4294901760, %v1218_v1  ;;  %v7739_v4 = vand.u32 4294901760, %v7701_v8  ;;  %v6510_v1 = vld [vmem:[%s10734_s2 + $0x1f0] sm:$0xff]  ;;  %v7755_v58 = vand.u32 4294901760, %v1224_v25 }
  0xee   : > { %11561 = vst [vmem:[#allocation168_spill] sm:$0xff] %v7663_v15  ;;  %1343 = vmatpush.msrb.mxu3 %v7550_v62  ;;  %1155 = vmatpush.msrb.mxu0 %v7612_v46  ;;  %v7767_v10 = vand.u32 4294901760, %v1230_v30  ;;  %v6508_v30 = vld [vmem:[%s10734_s2 + $0x1e0] sm:$0xff] }
  0xef   : > { %11562 = vst [vmem:[#allocation169_spill] sm:$0xff] %v7668_v29  ;;  %1300 = vmatpush.msrb.mxu2 %v7624_v18  ;;  %1208 = vmatpush.msrb.mxu1 %v7694_v6  ;;  %v7742_v18 = vsub.f32 %v6483_v12, %v7698_v39  ;;  %v7760_v16 = vand.u32 4294901760, %v7720_v51  ;;  %v1242_v25 = vsub.f32 %v7701_v8, %v7739_v4 }
  0xf0   : > { %11563 = vst [vmem:[#allocation170_spill] sm:$0xff] %v7675_v40  ;;  %v6480_v40 = vld [vmem:[%s10734_s2 + $0x100] sm:$0xff]  ;;  %1345 = vmatpush.msrb.mxu3 %v7565_v31  ;;  %1157 = vmatpush.msrb.mxu0 %v7628_v5 }
  0xf1   : > { %11564 = vst [vmem:[#allocation171_spill] sm:$0xff] %v7679_v24  ;;  %1303 = vmatpush.msrb.mxu2 %v7643_v7  ;;  %1214 = vmatpush.msrb.mxu1 %v7713_v14  ;;  %v7757_v12 = vand.u32 4294901760, %v6480_v40  ;;  %v7763_v7 = vsub.f32 %v6482_v36, %v7717_v26  ;;  %v7777_v36 = vand.u32 4294901760, %v7742_v18  ;;  %v1248_v20 = vsub.f32 %v7720_v51, %v7760_v16 }
  0xf2   : > { %11565 = vst [vmem:[#allocation172_spill] sm:$0xff] %v7682_v44  ;;  %1347 = vmatpush.msrb.mxu3 %v7582_v21  ;;  %1159 = vmatpush.msrb.mxu0 %v7660_v32 }
  0xf3   : > { %11566 = vst [vmem:[#allocation173_spill] sm:$0xff] %v7687_v41  ;;  %1306 = vmatpush.msrb.mxu2 %v7649_v22  ;;  %1220 = vmatpush.msrb.mxu1 %v7734_v60  ;;  %v7782_v22 = vand.u32 4294901760, %v6510_v1  ;;  %v7799_v57 = vand.u32 4294901760, %v7763_v7  ;;  %v7802_v55 = vsub.f32 %v6480_v40, %v7757_v12  ;;  %v1254_v40 = vsub.f32 %v7742_v18, %v7777_v36 }
  0xf4   : > { %11567 = vst [vmem:[#allocation174_spill] sm:$0xff] %v7694_v6  ;;  %v7748_v6 = vand.u32 4294901760, %v6511_v23  ;;  %1349 = vmatpush.msrb.mxu3 %v7599_v63  ;;  %1161 = vmatpush.msrb.mxu0 %v7679_v24  ;;  %v7837_v35 = vand.u32 4294901760, %v1248_v20  ;;  %v6505_v20 = vld [vmem:[%s10734_s2 + $0x1c8] sm:$0xff] }
  0xf5   : > { %11568 = vst [vmem:[#allocation175_spill] sm:$0xff] %v7698_v39  ;;  %1309 = vmatpush.msrb.mxu2 %v7668_v29  ;;  %1226 = vmatpush.msrb.mxu1 %v7755_v58  ;;  %v7820_v29 = vand.u32 4294901760, %v7780_v3  ;;  %v7823_v53 = vsub.f32 %v6510_v1, %v7782_v22  ;;  %v1260_v1 = vsub.f32 %v7763_v7, %v7799_v57  ;;  %v7885_v34 = vand.u32 4294901760, %v6505_v20 }
  0xf6   : > { %11569 = vst [vmem:[#allocation176_spill] sm:$0xff] %v7701_v8  ;;  %v7792_v0 = vsub.f32 %v6511_v23, %v7748_v6  ;;  %1351 = vmatpush.msrb.mxu3 %v7612_v46  ;;  %v6507_v23 = vld [vmem:[%s10734_s2 + $0x1d8] sm:$0xff]  ;;  %1163 = vmatpush.msrb.mxu0 %v7698_v39 }
  0xf7   : > { %11570 = vst [vmem:[#allocation177_spill] sm:$0xff] %v7706_v47  ;;  %1312 = vmatpush.msrb.mxu2 %v7701_v8  ;;  %1232 = vmatpush.msrb.mxu1 %v7767_v10  ;;  %v7862_v11 = vand.u32 4294901760, %v7823_v53  ;;  %v7878_v37 = vand.u32 4294901760, %v1260_v1  ;;  %v6503_v1 = vld [vmem:[%s10734_s2 + $0x1b8] sm:$0xff] }
  0xf8   : > { %11571 = vst [vmem:[#allocation178_spill] sm:$0xff] %v7713_v14  ;;  %v6509_v14 = vld [vmem:[%s10734_s2 + $0x1e8] sm:$0xff]  ;;  %1353 = vmatpush.msrb.mxu3 %v7628_v5  ;;  %1165 = vmatpush.msrb.mxu0 %v7717_v26  ;;  %v7828_v8 = vand.u32 4294901760, %v7792_v0 }
  0xf9   : > { %11572 = vst [vmem:[#allocation179_spill] sm:$0xff] %v7717_v26  ;;  %v7804_v50 = vand.u32 4294901760, %v6509_v14  ;;  %1315 = vmatpush.msrb.mxu2 %v7720_v51  ;;  %v1529_v19 = vsub.f32 %v7823_v53, %v7862_v11 }
  0xfa   : > { %11573 = vst [vmem:[#allocation180_spill] sm:$0xff] %v7720_v51  ;;  %1355 = vmatpush.msrb.mxu3 %v7660_v32  ;;  %v7842_v51 = vand.u32 4294901760, %v7802_v55  ;;  %1167 = vmatpush.msrb.mxu0 %v7736_v38 }
  0xfb   : > { %11574 = vst [vmem:[#allocation181_spill] sm:$0xff] %v7734_v60  ;;  %v7789_v60 = vand.u32 4294901760, %v1236_v48  ;;  %v7811_v48 = vand.u32 4294901760, %v6508_v30  ;;  %v7845_v27 = vsub.f32 %v6509_v14, %v7804_v50  ;;  %1318 = vmatpush.msrb.mxu2 %v7742_v18  ;;  %v1266_v14 = vsub.f32 %v7780_v3, %v7820_v29 }
  0xfc   : > { %11575 = vst [vmem:[#allocation182_spill] sm:$0xff] %v7736_v38  ;;  %1357 = vmatpush.msrb.mxu3 %v7679_v24  ;;  %1169 = vmatpush.msrb.mxu0 %v7757_v12  ;;  %v1272_v45 = vsub.f32 %v7802_v55, %v7842_v51 }
  0xfd   : > { %11576 = vst [vmem:[#allocation183_spill] sm:$0xff] %v7739_v4  ;;  %1238 = vmatpush.msrb.mxu1 %v7789_v60  ;;  %v7850_v52 = vsub.f32 %v6508_v30, %v7811_v48  ;;  %1321 = vmatpush.msrb.mxu2 %v7763_v7  ;;  %v1523_v30 = vsub.f32 %v7792_v0, %v7828_v8 }
  0xfe   : > { %11577 = vst [vmem:[#allocation184_spill] sm:$0xff] %v7742_v18  ;;  %1359 = vmatpush.msrb.mxu3 %v7698_v39  ;;  %1376 = vmatpush.msra.mxu0 %v7553_v33 }
  0xff   : > { %11578 = vst [vmem:[#allocation185_spill] sm:$0xff] %v7748_v6  ;;  %1324 = vmatpush.msrb.mxu2 %v7780_v3 }
 0x100   : > { %11579 = vst [vmem:[#allocation186_spill] sm:$0xff] %v7755_v58  ;;  %v7815_v58 = vand.u32 4294901760, %v1242_v25  ;;  %v6506_v25 = vld [vmem:[%s10734_s2 + $0x1d0] sm:$0xff]  ;;  %1361 = vmatpush.msrb.mxu3 %v7717_v26  ;;  %1380 = vmatpush.msra.mxu0 %v7568_v56  ;;  %v7916_v26 = vld [vmem:[#allocation1] sm:$0xff]  ;;  %v7929_v56 = vand.u32 4294901760, %v6503_v1 }
 0x101   : > { %11580 = vst [vmem:[#allocation187_spill] sm:$0xff] %v7757_v12  ;;  %v7864_v18 = vand.u32 4294901760, %v6506_v25  ;;  %1327 = vmatpush.msrb.mxu2 %v7802_v55 }
 0x102   : > { %11581 = vst [vmem:[#allocation188_spill] sm:$0xff] %v7760_v16  ;;  %1244 = vmatpush.msrb.mxu1 %v7815_v58  ;;  %1363 = vmatpush.msrb.mxu3 %v7736_v38  ;;  %v11618_v38 = vld [vmem:[#allocation57_spill] sm:$0xff] }
 0x103   : > { %11582 = vst [vmem:[#allocation189_spill] sm:$0xff] %v7763_v7  ;;  %v7883_v7 = vand.u32 4294901760, %v7845_v27  ;;  %v7902_v33 = vsub.f32 %v6506_v25, %v7864_v18  ;;  %v7922_v25 = vand.u32 4294901760, %v1272_v45  ;;  %1384 = vmatpush.msra.mxu0 %v7585_v54  ;;  %1480 = vmatpush.msra.mxu2 %v7748_v6  ;;  %v6501_v45 = vld [vmem:[%s10734_s2 + $0x1a8] sm:$0xff] }
 0x104   : > { %11583 = vst [vmem:[#allocation190_spill] sm:$0xff] %v7767_v10  ;;  %v7830_v10 = vand.u32 4294901760, %v6507_v23  ;;  %1250 = vmatpush.msrb.mxu1 %v7837_v35  ;;  %1365 = vmatpush.msrb.mxu3 %v7757_v12 }
 0x105   : > { %11584 = vst [vmem:[#allocation191_spill] sm:$0xff] %v7777_v36  ;;  %1388 = vmatpush.msra.mxu0 %v7602_v17  ;;  %1482 = vmatpush.msra.mxu2 %v7782_v22  ;;  %v7969_v17 = vsub.f32 %v6503_v1, %v7929_v56 }
 0x106   : > { %11585 = vst [vmem:[#allocation192_spill] sm:$0xff] %v7780_v3 }
 0x107   : > { %11586 = vst [vmem:[#allocation193_spill] sm:$0xff] %v7782_v22  ;;  %1392 = vmatpush.msra.mxu0 %v7621_v49  ;;  %1484 = vmatpush.msra.mxu2 %v7804_v50 }
 0x108   : > { %11587 = vst [vmem:[#allocation194_spill] sm:$0xff] %v7789_v60  ;;  %v7857_v60 = vand.u32 4294901760, %v1254_v40  ;;  %v6504_v40 = vld [vmem:[%s10734_s2 + $0x1c0] sm:$0xff] }
 0x109   : > { %11588 = vst [vmem:[#allocation195_spill] sm:$0xff] %v7792_v0  ;;  %v7904_v3 = vand.u32 4294901760, %v6504_v40  ;;  %1396 = vmatpush.msra.mxu0 %v7640_v43  ;;  %1486 = vmatpush.msra.mxu2 %v7811_v48 }
 0x10a   : > { %11589 = vst [vmem:[#allocation196_spill] sm:$0xff] %v7799_v57  ;;  %1256 = vmatpush.msrb.mxu1 %v7857_v60 }
 0x10b   : > { %11590 = vst [vmem:[#allocation197_spill] sm:$0xff] %v7802_v55  ;;  %v7927_v55 = vsub.f32 %v6505_v20, %v7885_v34  ;;  %v7942_v20 = vand.u32 4294901760, %v1529_v19  ;;  %v7948_v54 = vsub.f32 %v6504_v40, %v7904_v3  ;;  %v6500_v19 = vld [vmem:[%s10734_s2 + $0x1a0] sm:$0xff]  ;;  %1400 = vmatpush.msra.mxu0 %v7663_v15  ;;  %1488 = vmatpush.msra.mxu2 %v7830_v10  ;;  %v6497_v15 = vld [vmem:[%s10734_s2 + $0x188] sm:$0xff] }
 0x10c   : > { %11591 = vst [vmem:[#allocation198_spill] sm:$0xff] %v7804_v50  ;;  %1262 = vmatpush.msrb.mxu1 %v7878_v37 }
 0x10d   : > { %11592 = vst [vmem:[#allocation199_spill] sm:$0xff] %v7811_v48  ;;  %1404 = vmatpush.msra.mxu0 %v7682_v44  ;;  %1490 = vmatpush.msra.mxu2 %v7864_v18 }
 0x10e   : > { %11593 = vst [vmem:[#allocation200_spill] sm:$0xff] %v7815_v58  ;;  %v7871_v58 = vsub.f32 %v6507_v23, %v7830_v10  ;;  %v7890_v23 = vand.u32 4294901760, %v7850_v52 }
 0x10f   : > { %11594 = vst [vmem:[#allocation201_spill] sm:$0xff] %v7820_v29  ;;  %1408 = vmatpush.msra.mxu0 %v7687_v41  ;;  %1492 = vmatpush.msra.mxu2 %v7885_v34 }
 0x110   : > { %11595 = vst [vmem:[#allocation202_spill] sm:$0xff] %v7823_v53 }
 0x111   : > { %11596 = vst [vmem:[#allocation203_spill] sm:$0xff] %v7828_v8  ;;  %v7908_v8 = vand.u32 4294901760, %v1523_v30  ;;  %v1535_v30 = vsub.f32 %v7845_v27, %v7883_v7  ;;  %1412 = vmatpush.msra.mxu0 %v7706_v47  ;;  %1494 = vmatpush.msra.mxu2 %v7904_v3 }
 0x112   : > { %11597 = vst [vmem:[#allocation204_spill] sm:$0xff] %v7830_v10 }
 0x113   : > { %11598 = vst [vmem:[#allocation205_spill] sm:$0xff] %v7837_v35  ;;  %v7897_v35 = vand.u32 4294901760, %v1266_v14  ;;  %v6502_v14 = vld [vmem:[%s10734_s2 + $0x1b0] sm:$0xff]  ;;  %1525 = vmatpush.msra.mxu3 %v7908_v8  ;;  %v7963_v40 = vand.u32 4294901760, %v1535_v30  ;;  %v6499_v30 = vld [vmem:[%s10734_s2 + $0x198] sm:$0xff]  ;;  %1416 = vmatpush.msra.mxu0 %v7739_v4 }
 0x114   : > { %11599 = vst [vmem:[#allocation206_spill] sm:$0xff] %v7842_v51  ;;  %v8010_v43 = vand.u32 4294901760, %v6499_v30  ;;  %1496 = vmatpush.msra.mxu2 %v7929_v56 }
 0x115   : > { %11600 = vst [vmem:[#allocation207_spill] sm:$0xff] %v7845_v27  ;;  %1268 = vmatpush.msrb.mxu1 %v7897_v35  ;;  %1531 = vmatpush.msra.mxu3 %v7942_v20 }
 0x116   : > { %11601 = vst [vmem:[#allocation208_spill] sm:$0xff] %v7850_v52  ;;  %1420 = vmatpush.msra.mxu0 %v7760_v16 }
 0x117   : > { %11602 = vst [vmem:[#allocation209_spill] sm:$0xff] %v7857_v60  ;;  %v7911_v60 = vand.u32 4294901760, %v7871_v58  ;;  %1274 = vmatpush.msrb.mxu1 %v7922_v25  ;;  %1537 = vmatpush.msra.mxu3 %v7963_v40 }
 0x118   : > { %11603 = vst [vmem:[#allocation210_spill] sm:$0xff] %v7862_v11  ;;  %v7918_v11 = vld [vmem:[#allocation1 + $0x9] sm:$0xff]  ;;  %1424 = vmatpush.msra.mxu0 %v7777_v36 }
 0x119   : > { %11604 = vst [vmem:[#allocation211_spill] sm:$0xff] %v7864_v18  ;;  %1443 = vmatpush.msra.mxu1 %v7508_v2  ;;  %v11633_v2 = vld [vmem:[#allocation74_spill] sm:$0xff] }
 0x11a   : > { %11605 = vst [vmem:[#allocation212_spill] sm:$0xff] %v7871_v58  ;;  %1428 = vmatpush.msra.mxu0 %v7799_v57 }
 0x11b   : > { %11606 = vst [vmem:[#allocation213_spill] sm:$0xff] %v7878_v37  ;;  %v1541_v37 = vsub.f32 %v7850_v52, %v7890_v23  ;;  %1445 = vmatpush.msra.mxu1 %v7517_v61 }
 0x11c   : > { %11607 = vst [vmem:[#allocation214_spill] sm:$0xff] %v7883_v7  ;;  %v7950_v7 = vand.u32 4294901760, %v6502_v14  ;;  %1432 = vmatpush.msra.mxu0 %v7820_v29  ;;  %v6543_v29 = vld [vmem:[%s10734_s2 + $0x2f8] sm:$0xff] }
 0x11d   : > { %11608 = vst [vmem:[#allocation215_spill] sm:$0xff] %v7885_v34  ;;  %1447 = vmatpush.msra.mxu1 %v7526_v42 }
 0x11e   : > { %11609 = vst [vmem:[#allocation216_spill] sm:$0xff] %v7890_v23  ;;  %v7971_v23 = vand.u32 4294901760, %v6501_v45  ;;  %v7990_v49 = vsub.f32 %v6502_v14, %v7950_v7  ;;  %1498 = vmatpush.msra.mxu2 %v7950_v7  ;;  %1436 = vmatpush.msra.mxu0 %v7842_v51 }
 0x11f   : > { %11610 = vst [vmem:[#allocation217_spill] sm:$0xff] %v7897_v35  ;;  %v1547_v35 = vsub.f32 %v7871_v58, %v7911_v60  ;;  %1449 = vmatpush.msra.mxu1 %v7538_v13 }
 0x120   : > { %11611 = vst [vmem:[#allocation218_spill] sm:$0xff] %v7902_v33  ;;  %1500 = vmatpush.msra.mxu2 %v7971_v23 }
 0x121   : > { %11612 = vst [vmem:[#allocation219_spill] sm:$0xff] %v7904_v3  ;;  %1451 = vmatpush.msra.mxu1 %v7550_v62 }
 0x122   : > { %11613 = vst [vmem:[#allocation220_spill] sm:$0xff] %v7908_v8  ;;  %v7987_v8 = vand.u32 4294901760, %v7948_v54 }
 0x123   : > { %11614 = vst [vmem:[#allocation221_spill] sm:$0xff] %v7911_v60  ;;  %1453 = vmatpush.msra.mxu1 %v7565_v31 }
 0x124   : > { %11615 = vst [vmem:[#allocation222_spill] sm:$0xff] %v7922_v25  ;;  %v11629_v25 = vld [vmem:[#allocation72_spill] sm:$0xff] }
 0x125   : > { %11616 = vst [vmem:[#allocation223_spill] sm:$0xff] %v7927_v55  ;;  %1455 = vmatpush.msra.mxu1 %v7582_v21  ;;  %v8120_v21 = vand.u32 4294901760, %v7918_v11 }
 0x126   : > { %11617 = vst [vmem:[#allocation224_spill] sm:$0xff] %v7929_v56 }
 0x127   : > { %1853 = vst [vmem:[#allocation1] ss:$9 sm:$0xff] %v6978_v9  ;;  %v7945_v9 = vand.u32 4294901760, %v7902_v33  ;;  %1457 = vmatpush.msra.mxu1 %v7599_v63 }
 0x128   : > { %1855 = vst [vmem:[#allocation1 + $0x1] ss:$9 sm:$0xff] %v11618_v38  ;;  %v11623_v38 = vld [vmem:[#allocation66_spill] sm:$0xff] }
 0x129   : > { %11619 = vst [vmem:[#allocation225_spill] sm:$0xff] %v7942_v20  ;;  %v1553_v1 = vsub.f32 %v7902_v33, %v7945_v9  ;;  %v11635_v20 = vld [vmem:[#allocation77_spill] sm:$0xff]  ;;  %1459 = vmatpush.msra.mxu1 %v7612_v46 }
 0x12a   : > { %11620 = vst [vmem:[#allocation226_spill] sm:$0xff] %v7945_v9 }
 0x12b   : > { %11621 = vst [vmem:[#allocation227_spill] sm:$0xff] %v7948_v54  ;;  %v8022_v61 = vand.u32 4294901760, %v1553_v1  ;;  %1461 = vmatpush.msra.mxu1 %v7628_v5 }
 0x12c   : > { %11622 = vst [vmem:[#allocation228_spill] sm:$0xff] %v7950_v7 }
 0x12d   : > { %1857 = vst [vmem:[#allocation1 + $0x2] ss:$9 sm:$0xff] %v7057_v59  ;;  %v7966_v59 = vand.u32 4294901760, %v7927_v55  ;;  %1463 = vmatpush.msra.mxu1 %v7660_v32 }
 0x12e   : > { %1859 = vst [vmem:[#allocation1 + $0x3] ss:$9 sm:$0xff] %v11623_v38  ;;  %v7976_v38 = vand.u32 4294901760, %v1541_v37  ;;  %v7992_v37 = vand.u32 4294901760, %v6500_v19 }
 0x12f   : > { %11624 = vst [vmem:[#allocation229_spill] sm:$0xff] %v7963_v40  ;;  %v1559_v14 = vsub.f32 %v7927_v55, %v7966_v59  ;;  %v8018_v40 = vand.u32 4294901760, %v7916_v26  ;;  %1465 = vmatpush.msra.mxu1 %v7679_v24  ;;  %v6536_v24 = vld [vmem:[%s10734_s2 + $0x2c0] sm:$0xff] }
 0x130   : > { %11625 = vst [vmem:[#allocation230_spill] sm:$0xff] %v7966_v59  ;;  %1543 = vmatpush.msra.mxu3 %v7976_v38  ;;  %v8030_v59 = vsub.f32 %v6500_v19, %v7992_v37  ;;  %1502 = vmatpush.msra.mxu2 %v7992_v37 }
 0x131   : > { %11626 = vst [vmem:[#allocation231_spill] sm:$0xff] %v7969_v17  ;;  %v8041_v1 = vand.u32 4294901760, %v1559_v14  ;;  %v8055_v44 = vsub.f32 %v7916_v26, %v8018_v40  ;;  %v6496_v14 = vld [vmem:[%s10734_s2 + $0x180] sm:$0xff]  ;;  %1467 = vmatpush.msra.mxu1 %v7698_v39 }
 0x132   : > { %11627 = vst [vmem:[#allocation232_spill] sm:$0xff] %v7971_v23  ;;  %v8069_v62 = vand.u32 4294901760, %v8030_v59  ;;  %1504 = vmatpush.msra.mxu2 %v8010_v43  ;;  %1276 = vmatmul.f32.vlgmr.msrb.gmra.mxu1 %v8018_v40 }
 0x133   : > { %1861 = vst [vmem:[#allocation1 + $0x4] ss:$9 sm:$0xff] %v7086_v28  ;;  %v8005_v28 = vand.u32 4294901760, %v7969_v17  ;;  %1330 = vmatmul.f32.vlgmr.msrb.gmra.mxu2 %v8055_v44 }
 0x134   : > { %11628 = vst [vmem:[#allocation233_spill] sm:$0xff] %v7976_v38 }
 0x135   : > { %1863 = vst [vmem:[#allocation1 + $0x5] ss:$9 sm:$0xff] %v11629_v25  ;;  %v7997_v25 = vand.u32 4294901760, %v1547_v35  ;;  %v6498_v35 = vld [vmem:[%s10734_s2 + $0x190] sm:$0xff]  ;;  %v1571_v19 = vsub.f32 %v7969_v17, %v8005_v28 }
 0x136   : > { %11630 = vst [vmem:[#allocation234_spill] sm:$0xff] %v7987_v8  ;;  %v8037_v38 = vand.u32 4294901760, %v6498_v35 }
 0x137   : > { %11631 = vst [vmem:[#allocation235_spill] sm:$0xff] %v7990_v49  ;;  %1549 = vmatpush.msra.mxu3 %v7997_v25 }
 0x138   : > { %11632 = vst [vmem:[#allocation236_spill] sm:$0xff] %v7992_v37  ;;  %v8074_v26 = vsub.f32 %v6498_v35, %v8037_v38  ;;  %v1172_v35 = vand.u32 4294901760, %v8055_v44  ;;  %1506 = vmatpush.msra.mxu2 %v8037_v38 }
 0x139   : > { %1865 = vst [vmem:[#allocation1 + $0x6] ss:$9 sm:$0xff] %v11633_v2  ;;  %v8008_v2 = vsub.f32 %v6501_v45, %v7971_v23  ;;  %v1565_v45 = vsub.f32 %v7948_v54, %v7987_v8  ;;  %v8049_v8 = vsub.f32 %v6499_v30, %v8010_v43  ;;  %1555 = vmatpush.msra.mxu3 %v8022_v61 }
 0x13a   : > { %11634 = vst [vmem:[#allocation237_spill] sm:$0xff] %v7997_v25  ;;  %v8057_v25 = vand.u32 4294901760, %v6497_v15  ;;  %v8102_v4 = vand.u32 4294901760, %v8074_v26  ;;  %v1173_v16 = vsub.f32 %v8055_v44, %v1172_v35  ;;  %1369 = vmatmul.f32.vlgmr.msrb.gmra.mxu3 %v1172_v35  ;;  %v11667_v44 = vld [vmem:[#allocation182_spill] sm:$0xff] }
 0x13b   : > { %1867 = vst [vmem:[#allocation1 + $0x7] ss:$9 sm:$0xff] %v11635_v20  ;;  %v8027_v20 = vand.u32 4294901760, %v7990_v49  ;;  %v8046_v42 = vand.u32 4294901760, %v8008_v2  ;;  %v8064_v30 = vand.u32 4294901760, %v1565_v45  ;;  %1561 = vmatpush.msra.mxu3 %v8041_v1  ;;  %v8083_v13 = vand.u32 4294901760, %v8049_v8 }
 0x13c   : > { %11636 = vst [vmem:[#allocation238_spill] sm:$0xff] %v8005_v28  ;;  %v8091_v47 = vsub.f32 %v6497_v15, %v8057_v25  ;;  %1508 = vmatpush.msra.mxu2 %v8057_v25  ;;  %v11669_v35 = vld [vmem:[#allocation214_spill] sm:$0xff] }
 0x13d   : > { %11637 = vst [vmem:[#allocation239_spill] sm:$0xff] %v8008_v2  ;;  %v1577_v41 = vsub.f32 %v7990_v49, %v8027_v20  ;;  %v1583_v45 = vsub.f32 %v8008_v2, %v8046_v42  ;;  %1567 = vmatpush.msra.mxu3 %v8064_v30 }
 0x13e   : > { %11638 = vst [vmem:[#allocation240_spill] sm:$0xff] %v8010_v43  ;;  %v8117_v63 = vand.u32 4294901760, %v8091_v47 }
 0x13f   : > { %11639 = vst [vmem:[#allocation241_spill] sm:$0xff] %v8022_v61  ;;  %v8078_v61 = vand.u32 4294901760, %v1571_v19  ;;  %v8095_v19 = vand.u32 4294901760, %v1577_v41  ;;  %v8106_v15 = vand.u32 4294901760, %v1583_v45  ;;  %v1595_v41 = vsub.f32 %v8049_v8, %v8083_v13 }
 0x140   : > { %11640 = vst [vmem:[#allocation242_spill] sm:$0xff] %v8027_v20  ;;  %v8085_v20 = vand.u32 4294901760, %v6496_v14  ;;  %v1607_v57 = vsub.f32 %v8091_v47, %v8117_v63 }
 0x141   : > { %11641 = vst [vmem:[#allocation243_spill] sm:$0xff] %v8030_v59  ;;  %1573 = vmatpush.msra.mxu3 %v8078_v61  ;;  %v8132_v36 = vand.u32 4294901760, %v1595_v41 }
 0x142   : > { %11642 = vst [vmem:[#allocation244_spill] sm:$0xff] %v8037_v38  ;;  %1510 = vmatpush.msra.mxu2 %v8085_v20 }
 0x143   : > { %11643 = vst [vmem:[#allocation245_spill] sm:$0xff] %v8041_v1  ;;  %v1589_v1 = vsub.f32 %v8030_v59, %v8069_v62  ;;  %1579 = vmatpush.msra.mxu3 %v8095_v19 }
 0x144   : > { %11644 = vst [vmem:[#allocation246_spill] sm:$0xff] %v8046_v42 }
 0x145   : > { %11645 = vst [vmem:[#allocation247_spill] sm:$0xff] %v8049_v8  ;;  %v8124_v45 = vand.u32 4294901760, %v1589_v1  ;;  %1585 = vmatpush.msra.mxu3 %v8106_v15  ;;  %v1174_v1 = vand.u32 4294901760, %v1173_v16 }
 0x146   : > { %11646 = vst [vmem:[#allocation248_spill] sm:$0xff] %v8057_v25 }
 0x147   : > { %11647 = vst [vmem:[#allocation249_spill] sm:$0xff] %v8064_v30  ;;  %v8111_v30 = vsub.f32 %v6496_v14, %v8085_v20  ;;  %v1601_v14 = vsub.f32 %v8074_v26, %v8102_v4  ;;  %1591 = vmatpush.msra.mxu3 %v8124_v45  ;;  %1175 = vmatmul.f32.vlgmr.msrb.gmra.mxu0 %v1174_v1  ;;  %v11666_v1 = vld [vmem:[#allocation203_spill] sm:$0xff] }
 0x148   : > { %11648 = vst [vmem:[#allocation250_spill] sm:$0xff] %v8069_v62  ;;  %1623 = vmatpush.msrb.mxu0 %v7792_v0  ;;  %1717 = vmatpush.msrb.mxu2 %v11666_v1 }
 0x149   : > { %11649 = vst [vmem:[#allocation251_spill] sm:$0xff] %v8074_v26  ;;  %v8149_v41 = vand.u32 4294901760, %v1601_v14  ;;  %1597 = vmatpush.msra.mxu3 %v8132_v36  ;;  %v11664_v14 = vld [vmem:[#allocation179_spill] sm:$0xff] }
 0x14a   : > { %11650 = vst [vmem:[#allocation252_spill] sm:$0xff] %v8078_v61  ;;  %v8135_v61 = vand.u32 4294901760, %v8111_v30  ;;  %1626 = vmatpush.msrb.mxu0 %v7823_v53  ;;  %1469 = vmatpush.msra.mxu1 %v11664_v14 }
 0x14b   : > { %11651 = vst [vmem:[#allocation253_spill] sm:$0xff] %v8083_v13  ;;  %1603 = vmatpush.msra.mxu3 %v8149_v41 }
 0x14c   : > { %11652 = vst [vmem:[#allocation254_spill] sm:$0xff] %v8085_v20  ;;  %v1613_v16 = vsub.f32 %v8111_v30, %v8135_v61  ;;  %1629 = vmatpush.msrb.mxu0 %v7845_v27  ;;  %1471 = vmatpush.msra.mxu1 %v11667_v44 }
 0x14d   : > { %11653 = vst [vmem:[#allocation255_spill] sm:$0xff] %v8091_v47 }
 0x14e   : > { %11654 = vst [vmem:[#allocation256_spill] sm:$0xff] %v8095_v19  ;;  %v8143_v19 = vsub.f32 %v7918_v11, %v8120_v21  ;;  %v8156_v11 = vand.u32 4294901760, %v1607_v57  ;;  %1632 = vmatpush.msrb.mxu0 %v7850_v52  ;;  %1473 = vmatpush.msra.mxu1 %v7757_v12 }
 0x14f   : > { %11655 = vst [vmem:[#allocation257_spill] sm:$0xff] %v8102_v4  ;;  %1438 = vmatmul.f32.vlgmr.msra.gmra.mxu0 %v8018_v40  ;;  %1475 = vmatmul.f32.vlgmr.msra.gmra.mxu1 %v8018_v40  ;;  %v11672_v40 = vld [vmem:[#allocation234_spill] sm:$0xff] }
 0x150   : > { %11656 = vst [vmem:[#allocation258_spill] sm:$0xff] %v8106_v15  ;;  %1609 = vmatpush.msra.mxu3 %v8156_v11  ;;  %1635 = vmatpush.msrb.mxu0 %v7871_v58 }
 0x151   : > { %11657 = vst [vmem:[#allocation259_spill] sm:$0xff] %v8111_v30  ;;  %1676 = vmatpush.msrb.mxu1 %v7748_v6 }
 0x152   : > { %11658 = vst [vmem:[#allocation260_spill] sm:$0xff] %v8117_v63  ;;  %1638 = vmatpush.msrb.mxu0 %v7902_v33 }
 0x153   : > { %11659 = vst [vmem:[#allocation261_spill] sm:$0xff] %v8124_v45  ;;  %v11008_v45 = vand.u32 4294901760, %v8143_v19  ;;  %1678 = vmatpush.msrb.mxu1 %v7782_v22 }
 0x154   : > { %11660 = vst [vmem:[#allocation262_spill] sm:$0xff] %v8132_v36  ;;  %v8165_v36 = vand.u32 4294901760, %v1613_v16  ;;  %v11668_v16 = vld [vmem:[#allocation210_spill] sm:$0xff]  ;;  %1641 = vmatpush.msrb.mxu0 %v7927_v55 }
 0x155   : > { %11661 = vst [vmem:[#allocation263_spill] sm:$0xff] %v8135_v61  ;;  %v1514_v57 = vsub.f32 %v8143_v19, %v11008_v45  ;;  %1721 = vmatpush.msrb.mxu2 %v11668_v16  ;;  %v11670_v45 = vld [vmem:[#allocation216_spill] sm:$0xff]  ;;  %1680 = vmatpush.msrb.mxu1 %v7804_v50 }
 0x156   : > { %11662 = vst [vmem:[#allocation264_spill] sm:$0xff] %v8149_v41  ;;  %1615 = vmatpush.msra.mxu3 %v8165_v36  ;;  %1644 = vmatpush.msrb.mxu0 %v7948_v54  ;;  %v597_v54 = vpop.f32.mrf.mxu2  ;;  %v6517_v41 = vld [vmem:[%s10734_s2 + $0x228] sm:$0xff] }
 0x157   : > { %11663 = vst [vmem:[#allocation265_spill] sm:$0xff] %v8156_v11  ;;  %v1515_v11 = vand.u32 4294901760, %v1514_v57  ;;  %1725 = vmatpush.msrb.mxu2 %v11669_v35  ;;  %1617 = vmatmul.f32.vlgmr.msra.gmra.mxu3 %v8120_v21  ;;  %v6527_v57 = vld [vmem:[%s10734_s2 + $0x278] sm:$0xff] }
 0x158   : > { %11665 = vst [vmem:[#allocation266_spill] sm:$0xff] %v8165_v36  ;;  %1784 = vmatpush.msrb.mxu3 %v7748_v6  ;;  %1682 = vmatpush.msrb.mxu1 %v7811_v48  ;;  %v6518_v36 = vld [vmem:[%s10734_s2 + $0x230] sm:$0xff] }
 0x159   : > { %1516 = vmatmul.f32.vlgmr.msra.gmra.mxu2 %v1515_v11  ;;  %1647 = vmatpush.msrb.mxu0 %v7969_v17  ;;  %v11671_v11 = vld [vmem:[#allocation230_spill] sm:$0xff]  ;;  %v6525_v17 = vld [vmem:[%s10734_s2 + $0x268] sm:$0xff]  ;;  %v8344_v53 = vand.u32 4294901760, %v6518_v36 }
 0x15a   : > { %1786 = vmatpush.msrb.mxu3 %v7782_v22  ;;  %1729 = vmatpush.msrb.mxu2 %v11670_v45  ;;  %v6520_v45 = vld [vmem:[%s10734_s2 + $0x240] sm:$0xff] }
 0x15b   : > { %1684 = vmatpush.msrb.mxu1 %v7830_v10  ;;  %1650 = vmatpush.msrb.mxu0 %v7990_v49  ;;  %v6526_v49 = vld [vmem:[%s10734_s2 + $0x270] sm:$0xff]  ;;  %v8313_v35 = vand.u32 4294901760, %v6520_v45  ;;  %11697 = vst [vmem:[#allocation290_spill] sm:$0xff] %v8344_v53 }
 0x15c   : > { %1788 = vmatpush.msrb.mxu3 %v7804_v50  ;;  %1733 = vmatpush.msrb.mxu2 %v7911_v60 }
 0x15d   : > { %1686 = vmatpush.msrb.mxu1 %v7864_v18  ;;  %1653 = vmatpush.msrb.mxu0 %v8008_v2  ;;  %v442_v2 = vpop.f32.mrf.mxu0  ;;  %11689 = vst [vmem:[#allocation282_spill] sm:$0xff] %v8313_v35 }
 0x15e   : > { %1790 = vmatpush.msrb.mxu3 %v7811_v48  ;;  %1737 = vmatpush.msrb.mxu2 %v7945_v9  ;;  %v8243_v9 = vand.u32 4294901760, %v6525_v17  ;;  %v783_v52 = vpop.f32.mrf.mxu2 }
 0x15f   : > { %1688 = vmatpush.msrb.mxu1 %v7885_v34  ;;  %1656 = vmatpush.msrb.mxu0 %v8030_v59  ;;  %v543_v59 = vpop.f32.mrf.mxu1 }
 0x160   : > { %1792 = vmatpush.msrb.mxu3 %v7830_v10  ;;  %1741 = vmatpush.msrb.mxu2 %v11671_v11  ;;  %v11674_v11 = vld [vmem:[#allocation242_spill] sm:$0xff]  ;;  %11677 = vst [vmem:[#allocation270_spill] sm:$0xff] %v8243_v9 }
 0x161   : > { %1690 = vmatpush.msrb.mxu1 %v7904_v3  ;;  %1659 = vmatpush.msrb.mxu0 %v8049_v8  ;;  %v6524_v8 = vld [vmem:[%s10734_s2 + $0x260] sm:$0xff] }
 0x162   : > { %1794 = vmatpush.msrb.mxu3 %v7864_v18  ;;  %1745 = vmatpush.msrb.mxu2 %v11672_v40  ;;  %v8220_v40 = vand.u32 4294901760, %v6527_v57 }
 0x163   : > { %1692 = vmatpush.msrb.mxu1 %v7929_v56  ;;  %1662 = vmatpush.msrb.mxu0 %v8074_v26  ;;  %v6523_v26 = vld [vmem:[%s10734_s2 + $0x258] sm:$0xff] }
 0x164   : > { %1796 = vmatpush.msrb.mxu3 %v7885_v34  ;;  %1749 = vmatpush.msrb.mxu2 %v8005_v28  ;;  %11673 = vst [vmem:[#allocation267_spill] sm:$0xff] %v8220_v40  ;;  %v8226_v28 = vand.u32 4294901760, %v6526_v49 }
 0x165   : > { %1694 = vmatpush.msrb.mxu1 %v7950_v7  ;;  %1665 = vmatpush.msrb.mxu0 %v8091_v47  ;;  %v6521_v47 = vld [vmem:[%s10734_s2 + $0x248] sm:$0xff] }
 0x166   : > { %1798 = vmatpush.msrb.mxu3 %v7904_v3  ;;  %1753 = vmatpush.msrb.mxu2 %v11674_v11  ;;  %11675 = vst [vmem:[#allocation268_spill] sm:$0xff] %v8226_v28  ;;  %v8236_v11 = vsub.f32 %v6527_v57, %v8220_v40  ;;  %v8248_v57 = vsub.f32 %v6526_v49, %v8226_v28  ;;  %v6522_v49 = vld [vmem:[%s10734_s2 + $0x250] sm:$0xff]  ;;  %v1046_v5 = vpop.f32.mrf.mxu2 }
 0x167   : > { %1696 = vmatpush.msrb.mxu1 %v7971_v23  ;;  %1668 = vmatpush.msrb.mxu0 %v8111_v30 }
 0x168   : > { %1800 = vmatpush.msrb.mxu3 %v7929_v56  ;;  %1757 = vmatpush.msrb.mxu2 %v8046_v42  ;;  %11676 = vst [vmem:[#allocation269_spill] sm:$0xff] %v8236_v11  ;;  %v544_v42 = vadd.f32 %v543_v59, %v442_v2  ;;  %v8260_v59 = vand.u32 4294901760, %v8236_v11  ;;  %v636_v2 = vpop.f32.mrf.mxu3  ;;  %v8275_v30 = vand.u32 4294901760, %v8248_v57 }
 0x169   : > { %11678 = vst [vmem:[#allocation271_spill] sm:$0xff] %v8248_v57  ;;  %1698 = vmatpush.msrb.mxu1 %v7992_v37  ;;  %1671 = vmatmul.f32.vlgmr.msrb.gmra.mxu0 %v8143_v19 }
 0x16a   : > { %1802 = vmatpush.msrb.mxu3 %v7950_v7  ;;  %1761 = vmatpush.msrb.mxu2 %v8069_v62  ;;  %v8255_v62 = vand.u32 4294901760, %v6524_v8  ;;  %v598_v60 = vadd.f32 %v597_v54, %v544_v42  ;;  %11680 = vst [vmem:[#allocation273_spill] sm:$0xff] %v8260_v59  ;;  %v8270_v42 = vsub.f32 %v6525_v17, %v8243_v9 }
 0x16b   : > { %1700 = vmatpush.msrb.mxu1 %v8010_v43  ;;  %11683 = vst [vmem:[#allocation276_spill] sm:$0xff] %v8275_v30  ;;  %1873 = vmatpush.msra.mxu0 %v8220_v40 }
 0x16c   : > { %1804 = vmatpush.msrb.mxu3 %v7971_v23  ;;  %1765 = vmatpush.msrb.mxu2 %v8083_v13  ;;  %11679 = vst [vmem:[#allocation272_spill] sm:$0xff] %v8255_v62  ;;  %v8267_v13 = vand.u32 4294901760, %v6523_v26  ;;  %v637_v54 = vadd.f32 %v636_v2, %v598_v60  ;;  %v8285_v17 = vsub.f32 %v6524_v8, %v8255_v62  ;;  %v705_v60 = vpop.f32.mrf.mxu0  ;;  %v8299_v8 = vand.u32 4294901760, %v8270_v42 }
 0x16d   : > { %11682 = vst [vmem:[#allocation275_spill] sm:$0xff] %v8270_v42  ;;  %1702 = vmatpush.msrb.mxu1 %v8037_v38  ;;  %v1916_v2 = vsub.f32 %v8236_v11, %v8260_v59  ;;  %1875 = vmatpush.msra.mxu0 %v8226_v28 }
 0x16e   : > { %1806 = vmatpush.msrb.mxu3 %v7992_v37  ;;  %1769 = vmatpush.msrb.mxu2 %v8102_v4  ;;  %11681 = vst [vmem:[#allocation274_spill] sm:$0xff] %v8267_v13  ;;  %v8282_v4 = vand.u32 4294901760, %v6522_v49  ;;  %v706_v55 = vadd.f32 %v705_v60, %v637_v54  ;;  %v8302_v33 = vsub.f32 %v6523_v26, %v8267_v13  ;;  %v6519_v54 = vld [vmem:[%s10734_s2 + $0x238] sm:$0xff]  ;;  %v8316_v26 = vand.u32 4294901760, %v8285_v17 }
 0x16f   : > { %11685 = vst [vmem:[#allocation278_spill] sm:$0xff] %v8285_v17  ;;  %v1922_v60 = vsub.f32 %v8248_v57, %v8275_v30  ;;  %1877 = vmatpush.msra.mxu0 %v8243_v9  ;;  %1704 = vmatpush.msrb.mxu1 %v8057_v25  ;;  %v8326_v1 = vand.u32 4294901760, %v1916_v2 }
 0x170   : > { %1808 = vmatpush.msrb.mxu3 %v8010_v43  ;;  %1773 = vmatpush.msrb.mxu2 %v8117_v63  ;;  %11684 = vst [vmem:[#allocation277_spill] sm:$0xff] %v8282_v4  ;;  %v8296_v63 = vand.u32 4294901760, %v6521_v47  ;;  %v8319_v58 = vsub.f32 %v6522_v49, %v8282_v4 }
 0x171   : > { %11687 = vst [vmem:[#allocation280_spill] sm:$0xff] %v8299_v8  ;;  %1879 = vmatpush.msra.mxu0 %v8255_v62  ;;  %v8342_v2 = vand.u32 4294901760, %v1922_v60  ;;  %1706 = vmatpush.msrb.mxu1 %v8085_v20 }
 0x172   : > { %1810 = vmatpush.msrb.mxu3 %v8037_v38  ;;  %1777 = vmatpush.msrb.mxu2 %v8135_v61  ;;  %11686 = vst [vmem:[#allocation279_spill] sm:$0xff] %v8296_v63  ;;  %v742_v61 = vpop.f32.mrf.mxu1  ;;  %v8338_v49 = vsub.f32 %v6521_v47, %v8296_v63  ;;  %v1934_v47 = vsub.f32 %v8285_v17, %v8316_v26 }
 0x173   : > { %11688 = vst [vmem:[#allocation281_spill] sm:$0xff] %v8302_v33  ;;  %1779 = vmatmul.f32.vlgmr.msrb.gmra.mxu2 %v8120_v21  ;;  %v743_v16 = vadd.f32 %v742_v61, %v706_v55  ;;  %v1928_v55 = vsub.f32 %v8270_v42, %v8299_v8  ;;  %v8335_v61 = vand.u32 4294901760, %v8302_v33  ;;  %1881 = vmatpush.msra.mxu0 %v8267_v13 }
 0x174   : > { %1812 = vmatpush.msrb.mxu3 %v8057_v25  ;;  %2016 = vmatpush.msra.mxu2 %v8236_v11  ;;  %11690 = vst [vmem:[#allocation283_spill] sm:$0xff] %v8316_v26  ;;  %v8328_v11 = vand.u32 4294901760, %v6519_v54  ;;  %v6516_v25 = vld [vmem:[%s10734_s2 + $0x220] sm:$0xff] }
 0x175   : > { %11691 = vst [vmem:[#allocation284_spill] sm:$0xff] %v8319_v58  ;;  %v784_v27 = vadd.f32 %v783_v52, %v743_v16  ;;  %v8354_v52 = vand.u32 4294901760, %v8319_v58  ;;  %v8357_v16 = vsub.f32 %v6520_v45, %v8313_v35  ;;  %1918 = vmatpush.msra.mxu1 %v8326_v1  ;;  %v8372_v45 = vand.u32 4294901760, %v1928_v55  ;;  %1883 = vmatpush.msra.mxu0 %v8282_v4  ;;  %v6515_v55 = vld [vmem:[%s10734_s2 + $0x218] sm:$0xff] }
 0x176   : > { %1814 = vmatpush.msrb.mxu3 %v8085_v20  ;;  %11692 = vst [vmem:[#allocation285_spill] sm:$0xff] %v8326_v1  ;;  %2019 = vmatpush.msra.mxu2 %v8248_v57  ;;  %v11700_v57 = vand.u32 4294901760, %v8143_v19  ;;  %v8365_v20 = vsub.f32 %v6519_v54, %v8328_v11  ;;  %v8376_v19 = vand.u32 4294901760, %v6517_v41  ;;  %v8384_v54 = vsub.f32 %v6518_v36, %v8344_v53 }
 0x177   : > { %11693 = vst [vmem:[#allocation286_spill] sm:$0xff] %v8328_v11  ;;  %1816 = vmatmul.f32.vlgmr.msrb.gmra.mxu3 %v8120_v21  ;;  %v884_v21 = vpop.f32.mrf.mxu3  ;;  %1924 = vmatpush.msra.mxu1 %v8342_v2  ;;  %v1946_v1 = vsub.f32 %v8319_v58, %v8354_v52  ;;  %v8414_v38 = vand.u32 4294901760, %v6515_v55 }
 0x178   : > { %11694 = vst [vmem:[#allocation287_spill] sm:$0xff] %v8335_v61  ;;  %2069 = vmatpush.msra.mxu3 %v8220_v40  ;;  %v8359_v60 = vadd.f32 %v884_v21, %v784_v27  ;;  %1710 = vmatmul.f32.vlgmr.msrb.gmra.mxu1 %v11700_v57  ;;  %v1940_v27 = vsub.f32 %v8302_v33, %v8335_v61  ;;  %v8379_v57 = vand.u32 4294901760, %v8338_v49  ;;  %v8391_v21 = vand.u32 4294901760, %v1934_v47  ;;  %v6514_v47 = vld [vmem:[%s10734_s2 + $0x210] sm:$0xff] }
 0x179   : > { %11695 = vst [vmem:[#allocation288_spill] sm:$0xff] %v8338_v49  ;;  %2022 = vmatpush.msra.mxu2 %v8270_v42  ;;  %v8395_v42 = vand.u32 4294901760, %v6516_v25  ;;  %1885 = vmatpush.msra.mxu0 %v8296_v63  ;;  %v8403_v36 = vand.u32 4294901760, %v8365_v20  ;;  %v8422_v51 = vand.u32 4294901760, %v8384_v54  ;;  %v8433_v43 = vand.u32 4294901760, %v6514_v47 }
 0x17a   : > { %11696 = vst [vmem:[#allocation289_spill] sm:$0xff] %v8342_v2  ;;  %2071 = vmatpush.msra.mxu3 %v8226_v28  ;;  %1930 = vmatpush.msra.mxu1 %v8372_v45  ;;  %v8410_v2 = vand.u32 4294901760, %v1940_v27  ;;  %v1952_v0 = vsub.f32 %v8338_v49, %v8379_v57  ;;  %v6513_v27 = vld [vmem:[%s10734_s2 + $0x208] sm:$0xff] }
 0x17b   : > { %11698 = vst [vmem:[#allocation291_spill] sm:$0xff] %v8354_v52  ;;  %2025 = vmatpush.msra.mxu2 %v8285_v17  ;;  %v8398_v17 = vand.u32 4294901760, %v8357_v16  ;;  %1887 = vmatpush.msra.mxu0 %v8313_v35  ;;  %v8452_v15 = vand.u32 4294901760, %v6513_v27  ;;  %v1970_v23 = vsub.f32 %v8384_v54, %v8422_v51 }
 0x17c   : > { %11699 = vst [vmem:[#allocation292_spill] sm:$0xff] %v8357_v16  ;;  %2073 = vmatpush.msra.mxu3 %v8243_v9  ;;  %1936 = vmatpush.msra.mxu1 %v8391_v21 }
 0x17d   : > { %11701 = vst [vmem:[#allocation293_spill] sm:$0xff] %v8365_v20  ;;  %2028 = vmatpush.msra.mxu2 %v8302_v33  ;;  %v8417_v33 = vsub.f32 %v6517_v41, %v8376_v19  ;;  %v1958_v41 = vsub.f32 %v8357_v16, %v8398_v17  ;;  %1889 = vmatpush.msra.mxu0 %v8328_v11 }
 0x17e   : > { %11702 = vst [vmem:[#allocation294_spill] sm:$0xff] %v8372_v45  ;;  %2075 = vmatpush.msra.mxu3 %v8255_v62  ;;  %v8429_v45 = vand.u32 4294901760, %v1946_v1  ;;  %v1964_v1 = vsub.f32 %v8365_v20, %v8403_v36  ;;  %1942 = vmatpush.msra.mxu1 %v8410_v2  ;;  %v8496_v34 = vsub.f32 %v6513_v27, %v8452_v15 }
 0x17f   : > { %11703 = vst [vmem:[#allocation295_spill] sm:$0xff] %v8376_v19  ;;  %2031 = vmatpush.msra.mxu2 %v8319_v58  ;;  %v8436_v58 = vsub.f32 %v6516_v25, %v8395_v42  ;;  %v8450_v25 = vand.u32 4294901760, %v1952_v0  ;;  %v8455_v37 = vand.u32 4294901760, %v8417_v33  ;;  %1891 = vmatpush.msra.mxu0 %v8344_v53  ;;  %v6542_v0 = vld [vmem:[%s10734_s2 + $0x2f0] sm:$0xff]  ;;  %v8471_v7 = vand.u32 4294901760, %v1958_v41 }
 0x180   : > { %11704 = vst [vmem:[#allocation296_spill] sm:$0xff] %v8379_v57  ;;  %2077 = vmatpush.msra.mxu3 %v8267_v13  ;;  %1948 = vmatpush.msra.mxu1 %v8429_v45  ;;  %v8483_v3 = vand.u32 4294901760, %v1964_v1  ;;  %v6540_v1 = vld [vmem:[%s10734_s2 + $0x2e0] sm:$0xff] }
 0x181   : > { %11705 = vst [vmem:[#allocation297_spill] sm:$0xff] %v8384_v54  ;;  %2034 = vmatpush.msra.mxu2 %v8338_v49  ;;  %v8458_v49 = vsub.f32 %v6515_v55, %v8414_v38  ;;  %v8476_v56 = vand.u32 4294901760, %v8436_v58  ;;  %1893 = vmatpush.msra.mxu0 %v8376_v19  ;;  %v1976_v41 = vsub.f32 %v8417_v33, %v8455_v37 }
 0x182   : > { %11706 = vst [vmem:[#allocation298_spill] sm:$0xff] %v8391_v21  ;;  %v6512_v21 = vld [vmem:[%s10734_s2 + $0x200] sm:$0xff]  ;;  %2079 = vmatpush.msra.mxu3 %v8282_v4  ;;  %1954 = vmatpush.msra.mxu1 %v8450_v25 }
 0x183   : > { %11707 = vst [vmem:[#allocation299_spill] sm:$0xff] %v8395_v42  ;;  %2037 = vmatpush.msra.mxu2 %v8357_v16  ;;  %v8473_v55 = vand.u32 4294901760, %v6512_v21  ;;  %v8479_v16 = vsub.f32 %v6514_v47, %v8433_v43  ;;  %v8493_v47 = vand.u32 4294901760, %v8458_v49  ;;  %1895 = vmatpush.msra.mxu0 %v8395_v42  ;;  %v1982_v27 = vsub.f32 %v8436_v58, %v8476_v56 }
 0x184   : > { %11708 = vst [vmem:[#allocation300_spill] sm:$0xff] %v8398_v17  ;;  %2081 = vmatpush.msra.mxu3 %v8296_v63  ;;  %1960 = vmatpush.msra.mxu1 %v8471_v7 }
 0x185   : > { %11709 = vst [vmem:[#allocation301_spill] sm:$0xff] %v8403_v36  ;;  %2040 = vmatpush.msra.mxu2 %v8365_v20  ;;  %v8498_v20 = vand.u32 4294901760, %v6542_v0  ;;  %v8515_v10 = vand.u32 4294901760, %v8479_v16  ;;  %v8518_v48 = vsub.f32 %v6512_v21, %v8473_v55  ;;  %1897 = vmatpush.msra.mxu0 %v8414_v38  ;;  %v1988_v21 = vsub.f32 %v8458_v49, %v8493_v47 }
 0x186   : > { %11710 = vst [vmem:[#allocation302_spill] sm:$0xff] %v8410_v2  ;;  %v8464_v2 = vand.u32 4294901760, %v6543_v29  ;;  %2083 = vmatpush.msra.mxu3 %v8313_v35  ;;  %1966 = vmatpush.msra.mxu1 %v8483_v3  ;;  %v8553_v6 = vand.u32 4294901760, %v1982_v27  ;;  %v6537_v27 = vld [vmem:[%s10734_s2 + $0x2c8] sm:$0xff] }
 0x187   : > { %11711 = vst [vmem:[#allocation303_spill] sm:$0xff] %v8414_v38  ;;  %2043 = vmatpush.msra.mxu2 %v8384_v54  ;;  %v8536_v54 = vand.u32 4294901760, %v8496_v34  ;;  %v8539_v22 = vsub.f32 %v6542_v0, %v8498_v20  ;;  %1899 = vmatpush.msra.mxu0 %v8433_v43  ;;  %v938_v0 = vpop.f32.mrf.mxu0  ;;  %v1994_v12 = vsub.f32 %v8479_v16, %v8515_v10  ;;  %v8573_v14 = vand.u32 4294901760, %v1988_v21 }
 0x188   : > { %11712 = vst [vmem:[#allocation304_spill] sm:$0xff] %v8417_v33  ;;  %v8508_v18 = vsub.f32 %v6543_v29, %v8464_v2  ;;  %2085 = vmatpush.msra.mxu3 %v8328_v11  ;;  %v6539_v29 = vld [vmem:[%s10734_s2 + $0x2d8] sm:$0xff] }
 0x189   : > { %11713 = vst [vmem:[#allocation305_spill] sm:$0xff] %v8422_v51  ;;  %2046 = vmatpush.msra.mxu2 %v8417_v33  ;;  %1901 = vmatpush.msra.mxu0 %v8452_v15  ;;  %v8578_v39 = vand.u32 4294901760, %v8539_v22  ;;  %v8595_v32 = vand.u32 4294901760, %v1994_v12  ;;  %v6535_v12 = vld [vmem:[%s10734_s2 + $0x2b8] sm:$0xff] }
 0x18a   : > { %11714 = vst [vmem:[#allocation306_spill] sm:$0xff] %v8429_v45  ;;  %v6541_v45 = vld [vmem:[%s10734_s2 + $0x2e8] sm:$0xff]  ;;  %2087 = vmatpush.msra.mxu3 %v8344_v53  ;;  %v8544_v33 = vand.u32 4294901760, %v8508_v18 }
 0x18b   : > { %11715 = vst [vmem:[#allocation307_spill] sm:$0xff] %v8433_v43  ;;  %v8520_v50 = vand.u32 4294901760, %v6541_v45  ;;  %2049 = vmatpush.msra.mxu2 %v8436_v58  ;;  %1903 = vmatpush.msra.mxu0 %v8473_v55 }
 0x18c   : > { %11716 = vst [vmem:[#allocation308_spill] sm:$0xff] %v8436_v58  ;;  %2089 = vmatpush.msra.mxu3 %v8376_v19  ;;  %v8558_v58 = vand.u32 4294901760, %v8518_v48 }
 0x18d   : > { %11717 = vst [vmem:[#allocation309_spill] sm:$0xff] %v8450_v25  ;;  %v8505_v25 = vand.u32 4294901760, %v1970_v23  ;;  %v8527_v23 = vand.u32 4294901760, %v6540_v1  ;;  %v8561_v44 = vsub.f32 %v6541_v45, %v8520_v50  ;;  %2052 = vmatpush.msra.mxu2 %v8458_v49  ;;  %v2000_v45 = vsub.f32 %v8496_v34, %v8536_v54  ;;  %2110 = vmatpush.msrb.mxu0 %v8260_v59 }
 0x18e   : > { %11718 = vst [vmem:[#allocation310_spill] sm:$0xff] %v8452_v15  ;;  %2091 = vmatpush.msra.mxu3 %v8395_v42 }
 0x18f   : > { %11719 = vst [vmem:[#allocation311_spill] sm:$0xff] %v8455_v37  ;;  %1972 = vmatpush.msra.mxu1 %v8505_v25  ;;  %2055 = vmatpush.msra.mxu2 %v8479_v16  ;;  %v8614_v31 = vand.u32 4294901760, %v2000_v45  ;;  %v6534_v45 = vld [vmem:[%s10734_s2 + $0x2b0] sm:$0xff] }
 0x190   : > { %11720 = vst [vmem:[#allocation312_spill] sm:$0xff] %v8458_v49  ;;  %2093 = vmatpush.msra.mxu3 %v8414_v38  ;;  %2114 = vmatpush.msrb.mxu0 %v8275_v30  ;;  %v11761_v30 = vld [vmem:[#allocation45_spill] sm:$0xff] }
 0x191   : > { %11721 = vst [vmem:[#allocation313_spill] sm:$0xff] %v8464_v2  ;;  %2058 = vmatpush.msra.mxu2 %v8496_v34 }
 0x192   : > { %11722 = vst [vmem:[#allocation314_spill] sm:$0xff] %v8471_v7  ;;  %v8531_v7 = vand.u32 4294901760, %v1976_v41  ;;  %v6538_v41 = vld [vmem:[%s10734_s2 + $0x2d0] sm:$0xff]  ;;  %2095 = vmatpush.msra.mxu3 %v8433_v43  ;;  %2118 = vmatpush.msrb.mxu0 %v8299_v8 }
 0x193   : > { %11723 = vst [vmem:[#allocation315_spill] sm:$0xff] %v8473_v55  ;;  %v8580_v49 = vand.u32 4294901760, %v6538_v41  ;;  %2061 = vmatpush.msra.mxu2 %v8518_v48 }
 0x194   : > { %11724 = vst [vmem:[#allocation316_spill] sm:$0xff] %v8476_v56  ;;  %1978 = vmatpush.msra.mxu1 %v8531_v7  ;;  %2097 = vmatpush.msra.mxu3 %v8452_v15 }
 0x195   : > { %11725 = vst [vmem:[#allocation317_spill] sm:$0xff] %v8479_v16  ;;  %v2006_v16 = vsub.f32 %v8518_v48, %v8558_v58  ;;  %v8619_v59 = vsub.f32 %v6538_v41, %v8580_v49  ;;  %v8635_v41 = vld [vmem:[#allocation1 + $0x9] sm:$0xff]  ;;  %2214 = vmatpush.msrb.mxu2 %v8464_v2  ;;  %2122 = vmatpush.msrb.mxu0 %v8316_v26 }
 0x196   : > { %11726 = vst [vmem:[#allocation318_spill] sm:$0xff] %v8483_v3  ;;  %v8546_v3 = vand.u32 4294901760, %v6539_v29  ;;  %1984 = vmatpush.msra.mxu1 %v8553_v6  ;;  %2099 = vmatpush.msra.mxu3 %v8473_v55 }
 0x197   : > { %11727 = vst [vmem:[#allocation319_spill] sm:$0xff] %v8493_v47  ;;  %2216 = vmatpush.msrb.mxu2 %v8498_v20  ;;  %2126 = vmatpush.msrb.mxu0 %v8335_v61 }
 0x198   : > { %11728 = vst [vmem:[#allocation320_spill] sm:$0xff] %v8496_v34  ;;  %v8588_v21 = vsub.f32 %v6539_v29, %v8546_v3  ;;  %v8602_v29 = vand.u32 4294901760, %v6537_v27  ;;  %1990 = vmatpush.msra.mxu1 %v8573_v14 }
 0x199   : > { %11729 = vst [vmem:[#allocation321_spill] sm:$0xff] %v8498_v20  ;;  %2218 = vmatpush.msrb.mxu2 %v8520_v50  ;;  %2130 = vmatpush.msrb.mxu0 %v8354_v52 }
 0x19a   : > { %11730 = vst [vmem:[#allocation322_spill] sm:$0xff] %v8505_v25  ;;  %v8566_v25 = vsub.f32 %v6540_v1, %v8527_v23  ;;  %v939_v1 = vadd.f32 %v938_v0, %v8359_v60  ;;  %v977_v60 = vpop.f32.mrf.mxu1  ;;  %v8600_v0 = vand.u32 4294901760, %v8561_v44  ;;  %v8628_v43 = vand.u32 4294901760, %v8588_v21  ;;  %1996 = vmatpush.msra.mxu1 %v8595_v32 }
 0x19b   : > { %11731 = vst [vmem:[#allocation323_spill] sm:$0xff] %v8508_v18  ;;  %2220 = vmatpush.msrb.mxu2 %v8527_v23  ;;  %2134 = vmatpush.msrb.mxu0 %v8379_v57  ;;  %v6529_v57 = vld [vmem:[%s10734_s2 + $0x288] sm:$0xff] }
 0x19c   : > { %11732 = vst [vmem:[#allocation324_spill] sm:$0xff] %v8515_v10  ;;  %v978_v46 = vadd.f32 %v977_v60, %v939_v1  ;;  %v8621_v1 = vand.u32 4294901760, %v6536_v24  ;;  %2002 = vmatpush.msra.mxu1 %v8614_v31 }
 0x19d   : > { %11733 = vst [vmem:[#allocation325_spill] sm:$0xff] %v8518_v48  ;;  %v8639_v48 = vand.u32 4294901760, %v2006_v16  ;;  %v6533_v16 = vld [vmem:[%s10734_s2 + $0x2a8] sm:$0xff]  ;;  %2222 = vmatpush.msrb.mxu2 %v8546_v3  ;;  %2138 = vmatpush.msrb.mxu0 %v8398_v17 }
 0x19e   : > { %11734 = vst [vmem:[#allocation326_spill] sm:$0xff] %v8520_v50  ;;  %v1047_v34 = vadd.f32 %v1046_v5, %v978_v46  ;;  %v2269_v5 = vsub.f32 %v8561_v44, %v8600_v0  ;;  %v8646_v46 = vand.u32 4294901760, %v6535_v12  ;;  %v8667_v8 = vsub.f32 %v6536_v24, %v8621_v1 }
 0x19f   : > { %11735 = vst [vmem:[#allocation327_spill] sm:$0xff] %v8527_v23  ;;  %2008 = vmatpush.msra.mxu1 %v8639_v48  ;;  %2224 = vmatpush.msrb.mxu2 %v8580_v49 }
 0x1a0   : > { %11736 = vst [vmem:[#allocation328_spill] sm:$0xff] %v8531_v7  ;;  %v2257_v7 = vsub.f32 %v8508_v18, %v8544_v33  ;;  %v8682_v24 = vand.u32 4294901760, %v2269_v5  ;;  %v8688_v26 = vsub.f32 %v6535_v12, %v8646_v46  ;;  %v6531_v5 = vld [vmem:[%s10734_s2 + $0x298] sm:$0xff]  ;;  %2142 = vmatpush.msrb.mxu0 %v8403_v36 }
 0x1a1   : > { %11737 = vst [vmem:[#allocation329_spill] sm:$0xff] %v8536_v54  ;;  %2177 = vmatpush.msrb.mxu1 %v8220_v40  ;;  %v8729_v52 = vand.u32 4294901760, %v6531_v5  ;;  %2226 = vmatpush.msrb.mxu2 %v8602_v29 }
 0x1a2   : > { %11738 = vst [vmem:[#allocation330_spill] sm:$0xff] %v8539_v22  ;;  %v8625_v60 = vand.u32 4294901760, %v2257_v7  ;;  %v8644_v7 = vsub.f32 %v6537_v27, %v8602_v29  ;;  %v8664_v27 = vand.u32 4294901760, %v8619_v59  ;;  %v8724_v40 = vand.u32 4294901760, %v8688_v26  ;;  %2146 = vmatpush.msrb.mxu0 %v8422_v51 }
 0x1a3   : > { %11739 = vst [vmem:[#allocation331_spill] sm:$0xff] %v8544_v33  ;;  %v2263_v33 = vsub.f32 %v8539_v22, %v8578_v39  ;;  %2179 = vmatpush.msrb.mxu1 %v8226_v28  ;;  %2228 = vmatpush.msrb.mxu2 %v8621_v1 }
 0x1a4   : > { %11740 = vst [vmem:[#allocation332_spill] sm:$0xff] %v8546_v3  ;;  %2259 = vmatpush.msrb.mxu3 %v8625_v60  ;;  %v2287_v12 = vsub.f32 %v8619_v59, %v8664_v27  ;;  %2150 = vmatpush.msrb.mxu0 %v8455_v37 }
 0x1a5   : > { %11741 = vst [vmem:[#allocation333_spill] sm:$0xff] %v8553_v6  ;;  %v8607_v6 = vand.u32 4294901760, %v8566_v25  ;;  %2181 = vmatpush.msrb.mxu1 %v8243_v9  ;;  %2230 = vmatpush.msrb.mxu2 %v8646_v46 }
 0x1a6   : > { %11742 = vst [vmem:[#allocation334_spill] sm:$0xff] %v8558_v58  ;;  %2154 = vmatpush.msrb.mxu0 %v8476_v56 }
 0x1a7   : > { %11743 = vst [vmem:[#allocation335_spill] sm:$0xff] %v8561_v44  ;;  %2183 = vmatpush.msrb.mxu1 %v8255_v62 }
 0x1a8   : > { %11744 = vst [vmem:[#allocation336_spill] sm:$0xff] %v8566_v25  ;;  %2158 = vmatpush.msrb.mxu0 %v8493_v47 }
 0x1a9   : > { %11745 = vst [vmem:[#allocation337_spill] sm:$0xff] %v8573_v14  ;;  %v1083_v14 = vpop.f32.mrf.mxu3  ;;  %2185 = vmatpush.msrb.mxu1 %v8267_v13 }
 0x1aa   : > { %11746 = vst [vmem:[#allocation338_spill] sm:$0xff] %v8578_v39  ;;  %v8633_v39 = vld [vmem:[#allocation1] sm:$0xff]  ;;  %v8653_v15 = vadd.f32 %v1083_v14, %v1047_v34  ;;  %v8669_v34 = vand.u32 4294901760, %v6534_v45  ;;  %2162 = vmatpush.msrb.mxu0 %v8515_v10 }
 0x1ab   : > { %11747 = vst [vmem:[#allocation339_spill] sm:$0xff] %v8580_v49  ;;  %v11768_v14 = vld [vmem:[#allocation62_spill] sm:$0xff]  ;;  %2187 = vmatpush.msrb.mxu1 %v8282_v4 }
 0x1ac   : > { %11748 = vst [vmem:[#allocation340_spill] sm:$0xff] %v8588_v21  ;;  %v8709_v61 = vsub.f32 %v6534_v45, %v8669_v34  ;;  %2232 = vmatpush.msrb.mxu2 %v8669_v34  ;;  %2166 = vmatpush.msrb.mxu0 %v8536_v54  ;;  %v6575_v54 = vld [vmem:[%s10734_s2 + $0x3f8] sm:$0xff] }
 0x1ad   : > { %11749 = vst [vmem:[#allocation341_spill] sm:$0xff] %v8595_v32  ;;  %v2275_v32 = vsub.f32 %v8566_v25, %v8607_v6  ;;  %2189 = vmatpush.msrb.mxu1 %v8296_v63  ;;  %v8839_v63 = vand.u32 4294901760, %v8635_v41 }
 0x1ae   : > { %11750 = vst [vmem:[#allocation342_spill] sm:$0xff] %v8600_v0  ;;  %v11763_v0 = vld [vmem:[#allocation57_spill] sm:$0xff]  ;;  %v8746_v28 = vand.u32 4294901760, %v8709_v61  ;;  %2170 = vmatpush.msrb.mxu0 %v8558_v58 }
 0x1af   : > { %11751 = vst [vmem:[#allocation343_spill] sm:$0xff] %v8602_v29  ;;  %2191 = vmatpush.msrb.mxu1 %v8313_v35 }
 0x1b0   : > { %11752 = vst [vmem:[#allocation344_spill] sm:$0xff] %v8607_v6  ;;  %v2311_v36 = vsub.f32 %v8709_v61, %v8746_v28 }
 0x1b1   : > { %11753 = vst [vmem:[#allocation345_spill] sm:$0xff] %v8614_v31  ;;  %v8690_v31 = vand.u32 4294901760, %v6533_v16  ;;  %2193 = vmatpush.msrb.mxu1 %v8328_v11 }
 0x1b2   : > { %11754 = vst [vmem:[#allocation346_spill] sm:$0xff] %v8619_v59 }
 0x1b3   : > { %11755 = vst [vmem:[#allocation347_spill] sm:$0xff] %v8621_v1  ;;  %2234 = vmatpush.msrb.mxu2 %v8690_v31  ;;  %2195 = vmatpush.msrb.mxu1 %v8344_v53 }
 0x1b4   : > { %11756 = vst [vmem:[#allocation348_spill] sm:$0xff] %v8625_v60  ;;  %v11780_v60 = vld [vmem:[#allocation74_spill] sm:$0xff] }
 0x1b5   : > { %11757 = vst [vmem:[#allocation349_spill] sm:$0xff] %v8628_v43  ;;  %2197 = vmatpush.msrb.mxu1 %v8376_v19 }
 0x1b6   : > { %11758 = vst [vmem:[#allocation350_spill] sm:$0xff] %v8639_v48  ;;  %v11776_v48 = vld [vmem:[#allocation72_spill] sm:$0xff] }
 0x1b7   : > { %11759 = vst [vmem:[#allocation351_spill] sm:$0xff] %v8644_v7  ;;  %2199 = vmatpush.msrb.mxu1 %v8395_v42  ;;  %v6568_v42 = vld [vmem:[%s10734_s2 + $0x3c0] sm:$0xff] }
 0x1b8   : > { %11760 = vst [vmem:[#allocation352_spill] sm:$0xff] %v8646_v46 }
 0x1b9   : > { %2587 = vst [vmem:[#allocation1] ss:$9 sm:$0xff] %v11761_v30  ;;  %v8661_v30 = vand.u32 4294901760, %v2263_v33  ;;  %v6532_v33 = vld [vmem:[%s10734_s2 + $0x2a0] sm:$0xff]  ;;  %2201 = vmatpush.msrb.mxu1 %v8414_v38 }
 0x1ba   : > { %11762 = vst [vmem:[#allocation45_spill] sm:$0xff] %v8653_v15  ;;  %v11769_v15 = vld [vmem:[#allocation66_spill] sm:$0xff] }
 0x1bb   : > { %2589 = vst [vmem:[#allocation1 + $0x1] ss:$9 sm:$0xff] %v11763_v0  ;;  %v2281_v0 = vsub.f32 %v8588_v21, %v8628_v43  ;;  %v11774_v43 = vld [vmem:[#allocation70_spill] sm:$0xff]  ;;  %2265 = vmatpush.msrb.mxu3 %v8661_v30 }
 0x1bc   : > { %11764 = vst [vmem:[#allocation57_spill] sm:$0xff] %v8661_v30  ;;  %v11782_v30 = vld [vmem:[#allocation77_spill] sm:$0xff] }
 0x1bd   : > { %11765 = vst [vmem:[#allocation353_spill] sm:$0xff] %v8664_v27  ;;  %2271 = vmatpush.msrb.mxu3 %v8682_v24 }
 0x1be   : > { %11766 = vst [vmem:[#allocation354_spill] sm:$0xff] %v8667_v8 }
 0x1bf   : > { %11767 = vst [vmem:[#allocation355_spill] sm:$0xff] %v8669_v34 }
 0x1c0   : > { %2591 = vst [vmem:[#allocation1 + $0x2] ss:$9 sm:$0xff] %v11768_v14  ;;  %v8685_v14 = vand.u32 4294901760, %v8644_v7 }
 0x1c1   : > { %2593 = vst [vmem:[#allocation1 + $0x3] ss:$9 sm:$0xff] %v11769_v15  ;;  %v8695_v15 = vand.u32 4294901760, %v2275_v32  ;;  %v8711_v32 = vand.u32 4294901760, %v6532_v33 }
 0x1c2   : > { %11770 = vst [vmem:[#allocation62_spill] sm:$0xff] %v8682_v24  ;;  %v2293_v45 = vsub.f32 %v8644_v7, %v8685_v14  ;;  %v8741_v24 = vand.u32 4294901760, %v2287_v12 }
 0x1c3   : > { %11771 = vst [vmem:[#allocation66_spill] sm:$0xff] %v8685_v14  ;;  %2277 = vmatpush.msrb.mxu3 %v8695_v15  ;;  %v8749_v14 = vsub.f32 %v6532_v33, %v8711_v32  ;;  %v2305_v33 = vsub.f32 %v8688_v26, %v8724_v40  ;;  %2236 = vmatpush.msrb.mxu2 %v8711_v32 }
 0x1c4   : > { %11772 = vst [vmem:[#allocation356_spill] sm:$0xff] %v8688_v26  ;;  %v8760_v12 = vand.u32 4294901760, %v2293_v45  ;;  %v6528_v45 = vld [vmem:[%s10734_s2 + $0x280] sm:$0xff] }
 0x1c5   : > { %11773 = vst [vmem:[#allocation357_spill] sm:$0xff] %v8690_v31  ;;  %v8788_v13 = vand.u32 4294901760, %v8749_v14  ;;  %2238 = vmatpush.msrb.mxu2 %v8729_v52 }
 0x1c6   : > { %2595 = vst [vmem:[#allocation1 + $0x4] ss:$9 sm:$0xff] %v11774_v43  ;;  %v8706_v43 = vand.u32 4294901760, %v8667_v8 }
 0x1c7   : > { %11775 = vst [vmem:[#allocation70_spill] sm:$0xff] %v8695_v15 }
 0x1c8   : > { %2597 = vst [vmem:[#allocation1 + $0x5] ss:$9 sm:$0xff] %v11776_v48  ;;  %v8716_v48 = vand.u32 4294901760, %v2281_v0  ;;  %v6530_v0 = vld [vmem:[%s10734_s2 + $0x290] sm:$0xff] }
 0x1c9   : > { %11777 = vst [vmem:[#allocation72_spill] sm:$0xff] %v8706_v43  ;;  %v8756_v15 = vand.u32 4294901760, %v6530_v0 }
 0x1ca   : > { %11778 = vst [vmem:[#allocation358_spill] sm:$0xff] %v8709_v61  ;;  %2283 = vmatpush.msrb.mxu3 %v8716_v48 }
 0x1cb   : > { %11779 = vst [vmem:[#allocation359_spill] sm:$0xff] %v8711_v32  ;;  %2240 = vmatpush.msrb.mxu2 %v8756_v15 }
 0x1cc   : > { %2599 = vst [vmem:[#allocation1 + $0x6] ss:$9 sm:$0xff] %v11780_v60  ;;  %v8727_v60 = vsub.f32 %v6533_v16, %v8690_v31  ;;  %v2299_v16 = vsub.f32 %v8667_v8, %v8706_v43  ;;  %v8768_v43 = vsub.f32 %v6531_v5, %v8729_v52  ;;  %2289 = vmatpush.msrb.mxu3 %v8741_v24 }
 0x1cd   : > { %11781 = vst [vmem:[#allocation74_spill] sm:$0xff] %v8716_v48  ;;  %v8776_v48 = vand.u32 4294901760, %v6529_v57 }
 0x1ce   : > { %2601 = vst [vmem:[#allocation1 + $0x7] ss:$9 sm:$0xff] %v11782_v30  ;;  %v8737_v30 = vand.u32 4294901760, %v8633_v39  ;;  %v8765_v9 = vand.u32 4294901760, %v8727_v60  ;;  %v8783_v5 = vand.u32 4294901760, %v2299_v16  ;;  %2295 = vmatpush.msrb.mxu3 %v8760_v12  ;;  %v8802_v62 = vand.u32 4294901760, %v8768_v43 }
 0x1cf   : > { %11783 = vst [vmem:[#allocation77_spill] sm:$0xff] %v8724_v40  ;;  %v8810_v51 = vsub.f32 %v6529_v57, %v8776_v48  ;;  %2242 = vmatpush.msrb.mxu2 %v8776_v48 }
 0x1d0   : > { %11784 = vst [vmem:[#allocation360_spill] sm:$0xff] %v8727_v60  ;;  %v8774_v17 = vsub.f32 %v8633_v39, %v8737_v30  ;;  %v8793_v39 = vsub.f32 %v6530_v0, %v8756_v15  ;;  %v2317_v16 = vsub.f32 %v8727_v60, %v8765_v9  ;;  %2301 = vmatpush.msrb.mxu3 %v8783_v5 }
 0x1d1   : > { %11785 = vst [vmem:[#allocation361_spill] sm:$0xff] %v8729_v52  ;;  %v8836_v35 = vand.u32 4294901760, %v8810_v51  ;;  %2010 = vmatmul.f32.vlgmr.msra.gmra.mxu1 %v8737_v30 }
 0x1d2   : > { %11786 = vst [vmem:[#allocation362_spill] sm:$0xff] %v8741_v24  ;;  %v8797_v24 = vand.u32 4294901760, %v2305_v33  ;;  %v1906_v0 = vand.u32 4294901760, %v8774_v17  ;;  %v8814_v33 = vand.u32 4294901760, %v2311_v36  ;;  %v8821_v37 = vand.u32 4294901760, %v8793_v39  ;;  %2064 = vmatmul.f32.vlgmr.msra.gmra.mxu2 %v8774_v17 }
 0x1d3   : > { %11787 = vst [vmem:[#allocation363_spill] sm:$0xff] %v8746_v28  ;;  %v8804_v28 = vand.u32 4294901760, %v6528_v45  ;;  %v8825_v57 = vand.u32 4294901760, %v2317_v16  ;;  %v2329_v36 = vsub.f32 %v8768_v43, %v8802_v62  ;;  %v2341_v10 = vsub.f32 %v8810_v51, %v8836_v35 }
 0x1d4   : > { %11788 = vst [vmem:[#allocation364_spill] sm:$0xff] %v8749_v14  ;;  %2307 = vmatpush.msrb.mxu3 %v8797_v24  ;;  %v1907_v56 = vsub.f32 %v8774_v17, %v1906_v0  ;;  %v11814_v17 = vld [vmem:[#allocation310_spill] sm:$0xff] }
 0x1d5   : > { %11789 = vst [vmem:[#allocation365_spill] sm:$0xff] %v8756_v15  ;;  %v8851_v47 = vand.u32 4294901760, %v2329_v36  ;;  %2244 = vmatpush.msrb.mxu2 %v8804_v28  ;;  %2103 = vmatmul.f32.vlgmr.msra.gmra.mxu3 %v1906_v0  ;;  %v11816_v0 = vld [vmem:[#allocation342_spill] sm:$0xff] }
 0x1d6   : > { %11790 = vst [vmem:[#allocation366_spill] sm:$0xff] %v8760_v12  ;;  %v2323_v12 = vsub.f32 %v8749_v14, %v8788_v13  ;;  %2313 = vmatpush.msrb.mxu3 %v8814_v33 }
 0x1d7   : > { %11791 = vst [vmem:[#allocation367_spill] sm:$0xff] %v8765_v9 }
 0x1d8   : > { %11792 = vst [vmem:[#allocation368_spill] sm:$0xff] %v8768_v43  ;;  %v8843_v16 = vand.u32 4294901760, %v2323_v12  ;;  %2319 = vmatpush.msrb.mxu3 %v8825_v57  ;;  %v1908_v12 = vand.u32 4294901760, %v1907_v56 }
 0x1d9   : > { %11793 = vst [vmem:[#allocation369_spill] sm:$0xff] %v8776_v48 }
 0x1da   : > { %11794 = vst [vmem:[#allocation370_spill] sm:$0xff] %v8783_v5  ;;  %v8830_v5 = vsub.f32 %v6528_v45, %v8804_v28  ;;  %v2335_v45 = vsub.f32 %v8793_v39, %v8821_v37  ;;  %2325 = vmatpush.msrb.mxu3 %v8843_v16  ;;  %1909 = vmatmul.f32.vlgmr.msra.gmra.mxu0 %v1908_v12  ;;  %v11813_v12 = vld [vmem:[#allocation331_spill] sm:$0xff] }
 0x1db   : > { %11795 = vst [vmem:[#allocation371_spill] sm:$0xff] %v8788_v13  ;;  %2357 = vmatpush.msra.mxu0 %v8508_v18  ;;  %2451 = vmatpush.msra.mxu2 %v11813_v12 }
 0x1dc   : > { %11796 = vst [vmem:[#allocation372_spill] sm:$0xff] %v8793_v39  ;;  %v8868_v36 = vand.u32 4294901760, %v2335_v45  ;;  %2331 = vmatpush.msrb.mxu3 %v8851_v47  ;;  %v11811_v45 = vld [vmem:[#allocation307_spill] sm:$0xff] }
 0x1dd   : > { %11797 = vst [vmem:[#allocation373_spill] sm:$0xff] %v8797_v24  ;;  %v8854_v24 = vand.u32 4294901760, %v8830_v5  ;;  %2360 = vmatpush.msra.mxu0 %v8539_v22  ;;  %2203 = vmatpush.msrb.mxu1 %v11811_v45 }
 0x1de   : > { %11798 = vst [vmem:[#allocation374_spill] sm:$0xff] %v8802_v62  ;;  %2337 = vmatpush.msrb.mxu3 %v8868_v36 }
 0x1df   : > { %11799 = vst [vmem:[#allocation375_spill] sm:$0xff] %v8804_v28  ;;  %v2347_v56 = vsub.f32 %v8830_v5, %v8854_v24  ;;  %2363 = vmatpush.msra.mxu0 %v8561_v44  ;;  %2205 = vmatpush.msrb.mxu1 %v11814_v17 }
 0x1e0   : > { %11800 = vst [vmem:[#allocation376_spill] sm:$0xff] %v8810_v51 }
 0x1e1   : > { %11801 = vst [vmem:[#allocation377_spill] sm:$0xff] %v8814_v33  ;;  %v8862_v33 = vsub.f32 %v8635_v41, %v8839_v63  ;;  %v8875_v41 = vand.u32 4294901760, %v2341_v10  ;;  %2366 = vmatpush.msra.mxu0 %v8566_v25  ;;  %2207 = vmatpush.msrb.mxu1 %v8473_v55 }
 0x1e2   : > { %11802 = vst [vmem:[#allocation378_spill] sm:$0xff] %v8821_v37  ;;  %2172 = vmatmul.f32.vlgmr.msrb.gmra.mxu0 %v8737_v30  ;;  %2209 = vmatmul.f32.vlgmr.msrb.gmra.mxu1 %v8737_v30  ;;  %v11819_v30 = vld [vmem:[#allocation72_spill] sm:$0xff] }
 0x1e3   : > { %11803 = vst [vmem:[#allocation379_spill] sm:$0xff] %v8825_v57  ;;  %2343 = vmatpush.msrb.mxu3 %v8875_v41  ;;  %2369 = vmatpush.msra.mxu0 %v8588_v21 }
 0x1e4   : > { %11804 = vst [vmem:[#allocation380_spill] sm:$0xff] %v8830_v5  ;;  %2410 = vmatpush.msra.mxu1 %v8464_v2 }
 0x1e5   : > { %11805 = vst [vmem:[#allocation381_spill] sm:$0xff] %v8836_v35  ;;  %2372 = vmatpush.msra.mxu0 %v8619_v59 }
 0x1e6   : > { %11806 = vst [vmem:[#allocation382_spill] sm:$0xff] %v8843_v16  ;;  %v11177_v16 = vand.u32 4294901760, %v8862_v33  ;;  %2412 = vmatpush.msra.mxu1 %v8498_v20 }
 0x1e7   : > { %11807 = vst [vmem:[#allocation383_spill] sm:$0xff] %v8851_v47  ;;  %v8884_v47 = vand.u32 4294901760, %v2347_v56  ;;  %v11815_v56 = vld [vmem:[#allocation338_spill] sm:$0xff]  ;;  %2375 = vmatpush.msra.mxu0 %v8644_v7 }
 0x1e8   : > { %11808 = vst [vmem:[#allocation384_spill] sm:$0xff] %v8854_v24  ;;  %v2248_v10 = vsub.f32 %v8862_v33, %v11177_v16  ;;  %2455 = vmatpush.msra.mxu2 %v11815_v56  ;;  %2414 = vmatpush.msra.mxu1 %v8520_v50  ;;  %v6559_v16 = vld [vmem:[%s10734_s2 + $0x378] sm:$0xff] }
 0x1e9   : > { %11809 = vst [vmem:[#allocation385_spill] sm:$0xff] %v8868_v36  ;;  %2349 = vmatpush.msrb.mxu3 %v8884_v47  ;;  %2378 = vmatpush.msra.mxu0 %v8667_v8  ;;  %v1331_v8 = vpop.f32.mrf.mxu2  ;;  %v6549_v36 = vld [vmem:[%s10734_s2 + $0x328] sm:$0xff] }
 0x1ea   : > { %11810 = vst [vmem:[#allocation386_spill] sm:$0xff] %v8875_v41  ;;  %v2249_v41 = vand.u32 4294901760, %v2248_v10  ;;  %2459 = vmatpush.msra.mxu2 %v11816_v0  ;;  %2351 = vmatmul.f32.vlgmr.msrb.gmra.mxu3 %v8839_v63  ;;  %v11817_v10 = vld [vmem:[#allocation349_spill] sm:$0xff] }
 0x1eb   : > { %11812 = vst [vmem:[#allocation387_spill] sm:$0xff] %v8884_v47  ;;  %2518 = vmatpush.msra.mxu3 %v8464_v2  ;;  %2416 = vmatpush.msra.mxu1 %v8527_v23  ;;  %v6550_v47 = vld [vmem:[%s10734_s2 + $0x330] sm:$0xff] }
 0x1ec   : > { %2250 = vmatmul.f32.vlgmr.msrb.gmra.mxu2 %v2249_v41  ;;  %2381 = vmatpush.msra.mxu0 %v8688_v26  ;;  %v11818_v41 = vld [vmem:[#allocation66_spill] sm:$0xff]  ;;  %v6557_v26 = vld [vmem:[%s10734_s2 + $0x368] sm:$0xff]  ;;  %v9063_v22 = vand.u32 4294901760, %v6550_v47 }
 0x1ed   : > { %2520 = vmatpush.msra.mxu3 %v8498_v20  ;;  %2463 = vmatpush.msra.mxu2 %v8607_v6  ;;  %v6552_v6 = vld [vmem:[%s10734_s2 + $0x340] sm:$0xff] }
 0x1ee   : > { %2418 = vmatpush.msra.mxu1 %v8546_v3  ;;  %2384 = vmatpush.msra.mxu0 %v8709_v61  ;;  %v6558_v61 = vld [vmem:[%s10734_s2 + $0x370] sm:$0xff]  ;;  %v9032_v0 = vand.u32 4294901760, %v6552_v6 }
 0x1ef   : > { %2522 = vmatpush.msra.mxu3 %v8520_v50  ;;  %2467 = vmatpush.msra.mxu2 %v11817_v10 }
 0x1f0   : > { %2420 = vmatpush.msra.mxu1 %v8580_v49  ;;  %2387 = vmatpush.msra.mxu0 %v8727_v60  ;;  %v1176_v60 = vpop.f32.mrf.mxu0  ;;  %11836 = vst [vmem:[#allocation403_spill] sm:$0xff] %v9032_v0 }
 0x1f1   : > { %2524 = vmatpush.msra.mxu3 %v8527_v23  ;;  %2471 = vmatpush.msra.mxu2 %v8664_v27  ;;  %v8962_v27 = vand.u32 4294901760, %v6557_v26  ;;  %v1517_v25 = vpop.f32.mrf.mxu2 }
 0x1f2   : > { %2422 = vmatpush.msra.mxu1 %v8602_v29  ;;  %2390 = vmatpush.msra.mxu0 %v8749_v14  ;;  %v1277_v14 = vpop.f32.mrf.mxu1 }
 0x1f3   : > { %2526 = vmatpush.msra.mxu3 %v8546_v3  ;;  %2475 = vmatpush.msra.mxu2 %v11818_v41  ;;  %v11821_v41 = vld [vmem:[#allocation363_spill] sm:$0xff]  ;;  %11824 = vst [vmem:[#allocation391_spill] sm:$0xff] %v8962_v27 }
 0x1f4   : > { %2424 = vmatpush.msra.mxu1 %v8621_v1  ;;  %2393 = vmatpush.msra.mxu0 %v8768_v43  ;;  %v6556_v43 = vld [vmem:[%s10734_s2 + $0x360] sm:$0xff] }
 0x1f5   : > { %2528 = vmatpush.msra.mxu3 %v8580_v49  ;;  %2479 = vmatpush.msra.mxu2 %v11819_v30  ;;  %v8939_v30 = vand.u32 4294901760, %v6559_v16 }
 0x1f6   : > { %2426 = vmatpush.msra.mxu1 %v8646_v46  ;;  %2396 = vmatpush.msra.mxu0 %v8793_v39  ;;  %v6555_v39 = vld [vmem:[%s10734_s2 + $0x358] sm:$0xff] }
 0x1f7   : > { %2530 = vmatpush.msra.mxu3 %v8602_v29  ;;  %2483 = vmatpush.msra.mxu2 %v8724_v40  ;;  %11820 = vst [vmem:[#allocation388_spill] sm:$0xff] %v8939_v30  ;;  %v8945_v40 = vand.u32 4294901760, %v6558_v61 }
 0x1f8   : > { %2428 = vmatpush.msra.mxu1 %v8669_v34  ;;  %2399 = vmatpush.msra.mxu0 %v8810_v51  ;;  %v6553_v51 = vld [vmem:[%s10734_s2 + $0x348] sm:$0xff] }
 0x1f9   : > { %2532 = vmatpush.msra.mxu3 %v8621_v1  ;;  %2487 = vmatpush.msra.mxu2 %v11821_v41  ;;  %11822 = vst [vmem:[#allocation389_spill] sm:$0xff] %v8945_v40  ;;  %v8955_v41 = vsub.f32 %v6559_v16, %v8939_v30  ;;  %v8967_v16 = vsub.f32 %v6558_v61, %v8945_v40  ;;  %v6554_v61 = vld [vmem:[%s10734_s2 + $0x350] sm:$0xff]  ;;  %v1780_v53 = vpop.f32.mrf.mxu2 }
 0x1fa   : > { %2430 = vmatpush.msra.mxu1 %v8690_v31  ;;  %2402 = vmatpush.msra.mxu0 %v8830_v5 }
 0x1fb   : > { %2534 = vmatpush.msra.mxu3 %v8646_v46  ;;  %2491 = vmatpush.msra.mxu2 %v8765_v9  ;;  %11823 = vst [vmem:[#allocation390_spill] sm:$0xff] %v8955_v41  ;;  %v1278_v9 = vadd.f32 %v1277_v14, %v1176_v60  ;;  %v8979_v14 = vand.u32 4294901760, %v8955_v41  ;;  %v1370_v60 = vpop.f32.mrf.mxu3  ;;  %v8994_v5 = vand.u32 4294901760, %v8967_v16 }
 0x1fc   : > { %11825 = vst [vmem:[#allocation392_spill] sm:$0xff] %v8967_v16  ;;  %2432 = vmatpush.msra.mxu1 %v8711_v32  ;;  %2405 = vmatmul.f32.vlgmr.msra.gmra.mxu0 %v8862_v33 }
 0x1fd   : > { %2536 = vmatpush.msra.mxu3 %v8669_v34  ;;  %2495 = vmatpush.msra.mxu2 %v8788_v13  ;;  %v8974_v13 = vand.u32 4294901760, %v6556_v43  ;;  %v1332_v10 = vadd.f32 %v1331_v8, %v1278_v9  ;;  %11827 = vst [vmem:[#allocation394_spill] sm:$0xff] %v8979_v14  ;;  %v8989_v9 = vsub.f32 %v6557_v26, %v8962_v27 }
 0x1fe   : > { %2434 = vmatpush.msra.mxu1 %v8729_v52  ;;  %11830 = vst [vmem:[#allocation397_spill] sm:$0xff] %v8994_v5  ;;  %2607 = vmatpush.msrb.mxu0 %v8939_v30 }
 0x1ff   : > { %2538 = vmatpush.msra.mxu3 %v8690_v31  ;;  %2499 = vmatpush.msra.mxu2 %v8802_v62  ;;  %11826 = vst [vmem:[#allocation393_spill] sm:$0xff] %v8974_v13  ;;  %v8986_v62 = vand.u32 4294901760, %v6555_v39  ;;  %v1371_v8 = vadd.f32 %v1370_v60, %v1332_v10  ;;  %v9004_v26 = vsub.f32 %v6556_v43, %v8974_v13  ;;  %v1439_v10 = vpop.f32.mrf.mxu0  ;;  %v9018_v43 = vand.u32 4294901760, %v8989_v9 }
 0x200   : > { %11829 = vst [vmem:[#allocation396_spill] sm:$0xff] %v8989_v9  ;;  %2436 = vmatpush.msra.mxu1 %v8756_v15  ;;  %v2650_v60 = vsub.f32 %v8955_v41, %v8979_v14  ;;  %2609 = vmatpush.msrb.mxu0 %v8945_v40 }
 0x201   : > { %2540 = vmatpush.msra.mxu3 %v8711_v32  ;;  %2503 = vmatpush.msra.mxu2 %v8821_v37  ;;  %11828 = vst [vmem:[#allocation395_spill] sm:$0xff] %v8986_v62  ;;  %v9001_v37 = vand.u32 4294901760, %v6554_v61  ;;  %v1440_v7 = vadd.f32 %v1439_v10, %v1371_v8  ;;  %v9021_v59 = vsub.f32 %v6555_v39, %v8986_v62  ;;  %v6551_v8 = vld [vmem:[%s10734_s2 + $0x338] sm:$0xff]  ;;  %v9035_v39 = vand.u32 4294901760, %v9004_v26 }
 0x202   : > { %11832 = vst [vmem:[#allocation399_spill] sm:$0xff] %v9004_v26  ;;  %v2656_v10 = vsub.f32 %v8967_v16, %v8994_v5  ;;  %2611 = vmatpush.msrb.mxu0 %v8962_v27  ;;  %2438 = vmatpush.msra.mxu1 %v8776_v48  ;;  %v9045_v12 = vand.u32 4294901760, %v2650_v60 }
 0x203   : > { %2542 = vmatpush.msra.mxu3 %v8729_v52  ;;  %2507 = vmatpush.msra.mxu2 %v8836_v35  ;;  %11831 = vst [vmem:[#allocation398_spill] sm:$0xff] %v9001_v37  ;;  %v9015_v35 = vand.u32 4294901760, %v6553_v51  ;;  %v9038_v21 = vsub.f32 %v6554_v61, %v9001_v37 }
 0x204   : > { %11834 = vst [vmem:[#allocation401_spill] sm:$0xff] %v9018_v43  ;;  %2613 = vmatpush.msrb.mxu0 %v8974_v13  ;;  %v9061_v60 = vand.u32 4294901760, %v2656_v10  ;;  %2440 = vmatpush.msra.mxu1 %v8804_v28 }
 0x205   : > { %2544 = vmatpush.msra.mxu3 %v8756_v15  ;;  %2511 = vmatpush.msra.mxu2 %v8854_v24  ;;  %11833 = vst [vmem:[#allocation400_spill] sm:$0xff] %v9015_v35  ;;  %v1476_v24 = vpop.f32.mrf.mxu1  ;;  %v9057_v61 = vsub.f32 %v6553_v51, %v9015_v35  ;;  %v2668_v51 = vsub.f32 %v9004_v26, %v9035_v39 }
 0x206   : > { %11835 = vst [vmem:[#allocation402_spill] sm:$0xff] %v9021_v59  ;;  %2513 = vmatmul.f32.vlgmr.msra.gmra.mxu2 %v8839_v63  ;;  %v1477_v56 = vadd.f32 %v1476_v24, %v1440_v7  ;;  %v2662_v7 = vsub.f32 %v8989_v9, %v9018_v43  ;;  %v9054_v24 = vand.u32 4294901760, %v9021_v59  ;;  %2615 = vmatpush.msrb.mxu0 %v8986_v62 }
 0x207   : > { %2546 = vmatpush.msra.mxu3 %v8776_v48  ;;  %2750 = vmatpush.msrb.mxu2 %v8955_v41  ;;  %11837 = vst [vmem:[#allocation404_spill] sm:$0xff] %v9035_v39  ;;  %v9047_v41 = vand.u32 4294901760, %v6551_v8  ;;  %v6548_v48 = vld [vmem:[%s10734_s2 + $0x320] sm:$0xff] }
 0x208   : > { %11838 = vst [vmem:[#allocation405_spill] sm:$0xff] %v9038_v21  ;;  %v1518_v44 = vadd.f32 %v1517_v25, %v1477_v56  ;;  %v9073_v25 = vand.u32 4294901760, %v9038_v21  ;;  %v9076_v56 = vsub.f32 %v6552_v6, %v9032_v0  ;;  %2652 = vmatpush.msrb.mxu1 %v9045_v12  ;;  %v9091_v6 = vand.u32 4294901760, %v2662_v7  ;;  %2617 = vmatpush.msrb.mxu0 %v9001_v37  ;;  %v6547_v7 = vld [vmem:[%s10734_s2 + $0x318] sm:$0xff] }
 0x209   : > { %2548 = vmatpush.msra.mxu3 %v8804_v28  ;;  %11839 = vst [vmem:[#allocation406_spill] sm:$0xff] %v9045_v12  ;;  %2753 = vmatpush.msrb.mxu2 %v8967_v16  ;;  %v11845_v16 = vand.u32 4294901760, %v8862_v33  ;;  %v9084_v28 = vsub.f32 %v6551_v8, %v9047_v41  ;;  %v9095_v33 = vand.u32 4294901760, %v6549_v36  ;;  %v9103_v8 = vsub.f32 %v6550_v47, %v9063_v22 }
 0x20a   : > { %2550 = vmatmul.f32.vlgmr.msra.gmra.mxu3 %v8839_v63  ;;  %11840 = vst [vmem:[#allocation407_spill] sm:$0xff] %v9054_v24  ;;  %v1618_v63 = vpop.f32.mrf.mxu3  ;;  %2658 = vmatpush.msrb.mxu1 %v9061_v60  ;;  %v2680_v12 = vsub.f32 %v9038_v21, %v9073_v25  ;;  %v9133_v15 = vand.u32 4294901760, %v6547_v7 }
 0x20b   : > { %11841 = vst [vmem:[#allocation408_spill] sm:$0xff] %v9057_v61  ;;  %2803 = vmatpush.msrb.mxu3 %v8939_v30  ;;  %v9078_v10 = vadd.f32 %v1618_v63, %v1518_v44  ;;  %2444 = vmatmul.f32.vlgmr.msra.gmra.mxu1 %v11845_v16  ;;  %v2674_v44 = vsub.f32 %v9021_v59, %v9054_v24  ;;  %v9098_v16 = vand.u32 4294901760, %v9057_v61  ;;  %v9110_v63 = vand.u32 4294901760, %v2668_v51  ;;  %v6546_v51 = vld [vmem:[%s10734_s2 + $0x310] sm:$0xff] }
 0x20c   : > { %11842 = vst [vmem:[#allocation409_spill] sm:$0xff] %v9061_v60  ;;  %2756 = vmatpush.msrb.mxu2 %v8989_v9  ;;  %v9114_v9 = vand.u32 4294901760, %v6548_v48  ;;  %2619 = vmatpush.msrb.mxu0 %v9015_v35  ;;  %v9122_v47 = vand.u32 4294901760, %v9084_v28  ;;  %v9141_v58 = vand.u32 4294901760, %v9103_v8  ;;  %v9152_v52 = vand.u32 4294901760, %v6546_v51 }
 0x20d   : > { %11843 = vst [vmem:[#allocation410_spill] sm:$0xff] %v9073_v25  ;;  %2805 = vmatpush.msrb.mxu3 %v8945_v40  ;;  %2664 = vmatpush.msrb.mxu1 %v9091_v6  ;;  %v9129_v60 = vand.u32 4294901760, %v2674_v44  ;;  %v2686_v18 = vsub.f32 %v9057_v61, %v9098_v16  ;;  %v6545_v44 = vld [vmem:[%s10734_s2 + $0x308] sm:$0xff] }
 0x20e   : > { %11844 = vst [vmem:[#allocation411_spill] sm:$0xff] %v9076_v56  ;;  %2759 = vmatpush.msrb.mxu2 %v9004_v26  ;;  %v9117_v26 = vand.u32 4294901760, %v9076_v56  ;;  %2621 = vmatpush.msrb.mxu0 %v9032_v0  ;;  %v9171_v57 = vand.u32 4294901760, %v6545_v44  ;;  %v2704_v31 = vsub.f32 %v9103_v8, %v9141_v58 }
 0x20f   : > { %11846 = vst [vmem:[#allocation412_spill] sm:$0xff] %v9084_v28  ;;  %2807 = vmatpush.msrb.mxu3 %v8962_v27  ;;  %2670 = vmatpush.msrb.mxu1 %v9110_v63 }
 0x210   : > { %11847 = vst [vmem:[#allocation413_spill] sm:$0xff] %v9091_v6  ;;  %2762 = vmatpush.msrb.mxu2 %v9021_v59  ;;  %v9136_v59 = vsub.f32 %v6549_v36, %v9095_v33  ;;  %v9148_v6 = vand.u32 4294901760, %v2680_v12  ;;  %v2692_v36 = vsub.f32 %v9076_v56, %v9117_v26  ;;  %2623 = vmatpush.msrb.mxu0 %v9047_v41 }
 0x211   : > { %11848 = vst [vmem:[#allocation414_spill] sm:$0xff] %v9098_v16  ;;  %2809 = vmatpush.msrb.mxu3 %v8974_v13  ;;  %v2698_v12 = vsub.f32 %v9084_v28, %v9122_v47  ;;  %2676 = vmatpush.msrb.mxu1 %v9129_v60  ;;  %v9215_v29 = vsub.f32 %v6545_v44, %v9171_v57 }
 0x212   : > { %11849 = vst [vmem:[#allocation415_spill] sm:$0xff] %v9103_v8  ;;  %2765 = vmatpush.msrb.mxu2 %v9038_v21  ;;  %v9155_v21 = vsub.f32 %v6548_v48, %v9114_v9  ;;  %v9169_v48 = vand.u32 4294901760, %v2686_v18  ;;  %v9174_v32 = vand.u32 4294901760, %v9136_v59  ;;  %2625 = vmatpush.msrb.mxu0 %v9063_v22  ;;  %v6574_v18 = vld [vmem:[%s10734_s2 + $0x3f0] sm:$0xff]  ;;  %v9190_v34 = vand.u32 4294901760, %v2692_v36 }
 0x213   : > { %11850 = vst [vmem:[#allocation416_spill] sm:$0xff] %v9110_v63  ;;  %2811 = vmatpush.msrb.mxu3 %v8986_v62  ;;  %v6544_v63 = vld [vmem:[%s10734_s2 + $0x300] sm:$0xff]  ;;  %2682 = vmatpush.msrb.mxu1 %v9148_v6  ;;  %v9202_v1 = vand.u32 4294901760, %v2698_v12 }
 0x214   : > { %11851 = vst [vmem:[#allocation417_spill] sm:$0xff] %v9117_v26  ;;  %2768 = vmatpush.msrb.mxu2 %v9057_v61  ;;  %v9177_v61 = vsub.f32 %v6547_v7, %v9133_v15  ;;  %v9192_v7 = vand.u32 4294901760, %v6544_v63  ;;  %v9195_v46 = vand.u32 4294901760, %v9155_v21  ;;  %2627 = vmatpush.msrb.mxu0 %v9095_v33  ;;  %v2710_v36 = vsub.f32 %v9136_v59, %v9174_v32  ;;  %v6572_v12 = vld [vmem:[%s10734_s2 + $0x3e0] sm:$0xff] }
 0x215   : > { %11852 = vst [vmem:[#allocation418_spill] sm:$0xff] %v9122_v47  ;;  %2813 = vmatpush.msrb.mxu3 %v9001_v37  ;;  %2688 = vmatpush.msrb.mxu1 %v9169_v48 }
 0x216   : > { %11853 = vst [vmem:[#allocation419_spill] sm:$0xff] %v9129_v60  ;;  %2771 = vmatpush.msrb.mxu2 %v9076_v56  ;;  %v9183_v60 = vand.u32 4294901760, %v6575_v54  ;;  %v9198_v56 = vsub.f32 %v6546_v51, %v9152_v52  ;;  %v9212_v51 = vand.u32 4294901760, %v9177_v61  ;;  %2629 = vmatpush.msrb.mxu0 %v9114_v9  ;;  %v2716_v44 = vsub.f32 %v9155_v21, %v9195_v46 }
 0x217   : > { %11854 = vst [vmem:[#allocation420_spill] sm:$0xff] %v9136_v59  ;;  %2815 = vmatpush.msrb.mxu3 %v9015_v35  ;;  %2694 = vmatpush.msrb.mxu1 %v9190_v34  ;;  %v9237_v23 = vsub.f32 %v6544_v63, %v9192_v7 }
 0x218   : > { %11855 = vst [vmem:[#allocation421_spill] sm:$0xff] %v9141_v58  ;;  %2774 = vmatpush.msrb.mxu2 %v9084_v28  ;;  %v9217_v28 = vand.u32 4294901760, %v6574_v18  ;;  %v9227_v49 = vsub.f32 %v6575_v54, %v9183_v60  ;;  %v9234_v3 = vand.u32 4294901760, %v9198_v56  ;;  %2631 = vmatpush.msrb.mxu0 %v9133_v15  ;;  %v9246_v54 = vand.u32 4294901760, %v6572_v12 }
 0x219   : > { %11856 = vst [vmem:[#allocation422_spill] sm:$0xff] %v9148_v6  ;;  %v6573_v6 = vld [vmem:[%s10734_s2 + $0x3e8] sm:$0xff]  ;;  %2817 = vmatpush.msrb.mxu3 %v9032_v0  ;;  %2700 = vmatpush.msrb.mxu1 %v9202_v1  ;;  %v2722_v63 = vsub.f32 %v9177_v61, %v9212_v51  ;;  %v9272_v2 = vand.u32 4294901760, %v2716_v44 }
 0x21a   : > { %11857 = vst [vmem:[#allocation423_spill] sm:$0xff] %v9152_v52  ;;  %2777 = vmatpush.msrb.mxu2 %v9103_v8  ;;  %v9239_v50 = vand.u32 4294901760, %v6573_v6  ;;  %v9255_v8 = vand.u32 4294901760, %v9215_v29  ;;  %v9258_v20 = vsub.f32 %v6574_v18, %v9217_v28  ;;  %2633 = vmatpush.msrb.mxu0 %v9152_v52  ;;  %v1672_v18 = vpop.f32.mrf.mxu0  ;;  %v2728_v55 = vsub.f32 %v9198_v56, %v9234_v3  ;;  %v6569_v44 = vld [vmem:[%s10734_s2 + $0x3c8] sm:$0xff] }
 0x21b   : > { %11858 = vst [vmem:[#allocation424_spill] sm:$0xff] %v9155_v21  ;;  %2819 = vmatpush.msrb.mxu3 %v9047_v41  ;;  %v9292_v45 = vand.u32 4294901760, %v2722_v63 }
 0x21c   : > { %11859 = vst [vmem:[#allocation425_spill] sm:$0xff] %v9169_v48  ;;  %v9224_v48 = vand.u32 4294901760, %v2704_v31  ;;  %v6571_v31 = vld [vmem:[%s10734_s2 + $0x3d8] sm:$0xff]  ;;  %2780 = vmatpush.msrb.mxu2 %v9136_v59  ;;  %v9263_v59 = vand.u32 4294901760, %v9227_v49  ;;  %v9280_v17 = vsub.f32 %v6573_v6, %v9239_v50  ;;  %2635 = vmatpush.msrb.mxu0 %v9171_v57  ;;  %v2734_v6 = vsub.f32 %v9215_v29, %v9255_v8 }
 0x21d   : > { %11860 = vst [vmem:[#allocation426_spill] sm:$0xff] %v9174_v32  ;;  %2821 = vmatpush.msrb.mxu3 %v9063_v22  ;;  %v9297_v38 = vand.u32 4294901760, %v9258_v20  ;;  %v9314_v19 = vand.u32 4294901760, %v2728_v55  ;;  %v6567_v55 = vld [vmem:[%s10734_s2 + $0x3b8] sm:$0xff] }
 0x21e   : > { %11861 = vst [vmem:[#allocation427_spill] sm:$0xff] %v9177_v61  ;;  %2783 = vmatpush.msrb.mxu2 %v9155_v21  ;;  %2706 = vmatpush.msrb.mxu1 %v9224_v48  ;;  %v9277_v21 = vand.u32 4294901760, %v9237_v23  ;;  %v9333_v4 = vand.u32 4294901760, %v2734_v6  ;;  %v6566_v6 = vld [vmem:[%s10734_s2 + $0x3b0] sm:$0xff] }
 0x21f   : > { %11862 = vst [vmem:[#allocation428_spill] sm:$0xff] %v9190_v34  ;;  %v9250_v34 = vand.u32 4294901760, %v2710_v36  ;;  %v6570_v36 = vld [vmem:[%s10734_s2 + $0x3d0] sm:$0xff]  ;;  %2823 = vmatpush.msrb.mxu3 %v9095_v33  ;;  %2637 = vmatpush.msrb.mxu0 %v9192_v7 }
 0x220   : > { %11863 = vst [vmem:[#allocation429_spill] sm:$0xff] %v9195_v46  ;;  %2786 = vmatpush.msrb.mxu2 %v9177_v61  ;;  %v9299_v61 = vand.u32 4294901760, %v6570_v36 }
 0x221   : > { %11864 = vst [vmem:[#allocation430_spill] sm:$0xff] %v9198_v56  ;;  %2712 = vmatpush.msrb.mxu1 %v9250_v34  ;;  %2825 = vmatpush.msrb.mxu3 %v9114_v9 }
 0x222   : > { %11865 = vst [vmem:[#allocation431_spill] sm:$0xff] %v9202_v1  ;;  %v9265_v1 = vand.u32 4294901760, %v6571_v31  ;;  %2789 = vmatpush.msrb.mxu2 %v9198_v56  ;;  %v2740_v56 = vsub.f32 %v9237_v23, %v9277_v21  ;;  %2844 = vmatpush.msra.mxu0 %v8979_v14  ;;  %v9338_v14 = vsub.f32 %v6570_v36, %v9299_v61 }
 0x223   : > { %11866 = vst [vmem:[#allocation432_spill] sm:$0xff] %v9212_v51  ;;  %2718 = vmatpush.msrb.mxu1 %v9272_v2  ;;  %2827 = vmatpush.msrb.mxu3 %v9133_v15 }
 0x224   : > { %11867 = vst [vmem:[#allocation433_spill] sm:$0xff] %v9215_v29  ;;  %v9307_v63 = vsub.f32 %v6571_v31, %v9265_v1  ;;  %v9321_v31 = vand.u32 4294901760, %v6569_v44  ;;  %2792 = vmatpush.msrb.mxu2 %v9215_v29  ;;  %2848 = vmatpush.msra.mxu0 %v8994_v5  ;;  %v9354_v36 = vand.u32 4294901760, %v2740_v56  ;;  %v6565_v56 = vld [vmem:[%s10734_s2 + $0x3a8] sm:$0xff]  ;;  %v9377_v5 = vand.u32 4294901760, %v9338_v14 }
 0x225   : > { %11868 = vst [vmem:[#allocation434_spill] sm:$0xff] %v9224_v48  ;;  %v9285_v48 = vsub.f32 %v6572_v12, %v9246_v54  ;;  %v1673_v12 = vadd.f32 %v1672_v18, %v9078_v10  ;;  %v1711_v10 = vpop.f32.mrf.mxu1  ;;  %v9319_v18 = vand.u32 4294901760, %v9280_v17  ;;  %2724 = vmatpush.msrb.mxu1 %v9292_v45  ;;  %2829 = vmatpush.msrb.mxu3 %v9152_v52 }
 0x226   : > { %11869 = vst [vmem:[#allocation435_spill] sm:$0xff] %v9227_v49  ;;  %2795 = vmatpush.msrb.mxu2 %v9237_v23  ;;  %v9347_v52 = vand.u32 4294901760, %v9307_v63  ;;  %2852 = vmatpush.msra.mxu0 %v9018_v43 }
 0x227   : > { %11870 = vst [vmem:[#allocation436_spill] sm:$0xff] %v9234_v3  ;;  %v1712_v11 = vadd.f32 %v1711_v10, %v1673_v12  ;;  %v9340_v12 = vand.u32 4294901760, %v6568_v42  ;;  %2730 = vmatpush.msrb.mxu1 %v9314_v19  ;;  %2831 = vmatpush.msrb.mxu3 %v9171_v57 }
 0x228   : > { %11871 = vst [vmem:[#allocation437_spill] sm:$0xff] %v9237_v23  ;;  %v3003_v23 = vsub.f32 %v9280_v17, %v9319_v18  ;;  %2948 = vmatpush.msra.mxu2 %v9183_v60  ;;  %2856 = vmatpush.msra.mxu0 %v9035_v39  ;;  %v9401_v39 = vand.u32 4294901760, %v6565_v56 }
 0x229   : > { %11872 = vst [vmem:[#allocation438_spill] sm:$0xff] %v9250_v34  ;;  %v2991_v34 = vsub.f32 %v9227_v49, %v9263_v59  ;;  %v1781_v29 = vadd.f32 %v1780_v53, %v1712_v11  ;;  %v9361_v53 = vand.u32 4294901760, %v6567_v55  ;;  %2736 = vmatpush.msrb.mxu1 %v9333_v4  ;;  %2833 = vmatpush.msrb.mxu3 %v9192_v7 }
 0x22a   : > { %11873 = vst [vmem:[#allocation439_spill] sm:$0xff] %v9258_v20  ;;  %v9380_v43 = vsub.f32 %v6568_v42, %v9340_v12  ;;  %2950 = vmatpush.msra.mxu2 %v9217_v28  ;;  %2860 = vmatpush.msra.mxu0 %v9054_v24 }
 0x22b   : > { %11874 = vst [vmem:[#allocation440_spill] sm:$0xff] %v9263_v59  ;;  %v2997_v59 = vsub.f32 %v9258_v20, %v9297_v38  ;;  %v9344_v10 = vand.u32 4294901760, %v2991_v34  ;;  %v9359_v34 = vsub.f32 %v6569_v44, %v9321_v31  ;;  %2742 = vmatpush.msrb.mxu1 %v9354_v36 }
 0x22c   : > { %11875 = vst [vmem:[#allocation441_spill] sm:$0xff] %v9272_v2  ;;  %v9326_v2 = vand.u32 4294901760, %v9285_v48  ;;  %2952 = vmatpush.msra.mxu2 %v9239_v50  ;;  %2864 = vmatpush.msra.mxu0 %v9073_v25 }
 0x22d   : > { %11876 = vst [vmem:[#allocation442_spill] sm:$0xff] %v9280_v17  ;;  %v9374_v44 = vand.u32 4294901760, %v2997_v59  ;;  %v6564_v59 = vld [vmem:[%s10734_s2 + $0x3a0] sm:$0xff]  ;;  %2993 = vmatpush.msra.mxu3 %v9344_v10  ;;  %v9396_v42 = vand.u32 4294901760, %v9359_v34  ;;  %2911 = vmatpush.msra.mxu1 %v8939_v30 }
 0x22e   : > { %11877 = vst [vmem:[#allocation443_spill] sm:$0xff] %v9285_v48  ;;  %v3009_v11 = vsub.f32 %v9285_v48, %v9326_v2  ;;  %2954 = vmatpush.msra.mxu2 %v9246_v54  ;;  %2868 = vmatpush.msra.mxu0 %v9098_v16  ;;  %v6561_v16 = vld [vmem:[%s10734_s2 + $0x388] sm:$0xff] }
 0x22f   : > { %11878 = vst [vmem:[#allocation444_spill] sm:$0xff] %v9292_v45  ;;  %v1817_v45 = vpop.f32.mrf.mxu3  ;;  %2999 = vmatpush.msra.mxu3 %v9374_v44  ;;  %2913 = vmatpush.msra.mxu1 %v8945_v40 }
 0x230   : > { %11879 = vst [vmem:[#allocation445_spill] sm:$0xff] %v9297_v38  ;;  %2956 = vmatpush.msra.mxu2 %v9265_v1  ;;  %2872 = vmatpush.msra.mxu0 %v9117_v26 }
 0x231   : > { %11880 = vst [vmem:[#allocation446_spill] sm:$0xff] %v9307_v63  ;;  %2915 = vmatpush.msra.mxu1 %v8962_v27 }
 0x232   : > { %11881 = vst [vmem:[#allocation447_spill] sm:$0xff] %v9314_v19  ;;  %v9367_v19 = vadd.f32 %v1817_v45, %v1781_v29  ;;  %v3015_v29 = vsub.f32 %v9307_v63, %v9347_v52  ;;  %v9393_v45 = vand.u32 4294901760, %v3003_v23  ;;  %v3021_v23 = vsub.f32 %v9338_v14, %v9377_v5  ;;  %2958 = vmatpush.msra.mxu2 %v9299_v61 }
 0x233   : > { %11882 = vst [vmem:[#allocation448_spill] sm:$0xff] %v9319_v18  ;;  %v9382_v18 = vand.u32 4294901760, %v6566_v6  ;;  %2917 = vmatpush.msra.mxu1 %v8974_v13  ;;  %2876 = vmatpush.msra.mxu0 %v9122_v47  ;;  %v9481_v13 = vand.u32 4294901760, %v6561_v16 }
 0x234   : > { %11883 = vst [vmem:[#allocation449_spill] sm:$0xff] %v9326_v2  ;;  %v9424_v30 = vand.u32 4294901760, %v3015_v29  ;;  %3005 = vmatpush.msra.mxu3 %v9393_v45  ;;  %v6562_v29 = vld [vmem:[%s10734_s2 + $0x390] sm:$0xff]  ;;  %v9447_v25 = vand.u32 4294901760, %v3021_v23  ;;  %2960 = vmatpush.msra.mxu2 %v9321_v31 }
 0x235   : > { %11884 = vst [vmem:[#allocation450_spill] sm:$0xff] %v9333_v4  ;;  %v9405_v4 = vand.u32 4294901760, %v3009_v11  ;;  %v9418_v24 = vsub.f32 %v6566_v6, %v9382_v18  ;;  %v2602_v11 = vld [vmem:[#allocation1] sm:$0xff]  ;;  %v9434_v6 = vsub.f32 %v6565_v56, %v9401_v39  ;;  %2919 = vmatpush.msra.mxu1 %v8986_v62  ;;  %2880 = vmatpush.msra.mxu0 %v9141_v58 }
 0x236   : > { %11885 = vst [vmem:[#allocation451_spill] sm:$0xff] %v9338_v14  ;;  %2962 = vmatpush.msra.mxu2 %v9340_v12  ;;  %v9515_v58 = vsub.f32 %v6561_v16, %v9481_v13 }
 0x237   : > { %11886 = vst [vmem:[#allocation452_spill] sm:$0xff] %v9344_v10  ;;  %v9420_v10 = vand.u32 4294901760, %v6564_v59  ;;  %3011 = vmatpush.msra.mxu3 %v9405_v4  ;;  %v9452_v40 = vand.u32 4294901760, %v9418_v24  ;;  %v9471_v27 = vand.u32 4294901760, %v9434_v6  ;;  %2921 = vmatpush.msra.mxu1 %v9001_v37  ;;  %v2603_v37 = vld [vmem:[#allocation1 + $0x9] sm:$0xff] }
 0x238   : > { %11887 = vst [vmem:[#allocation453_spill] sm:$0xff] %v9347_v52  ;;  %2884 = vmatpush.msra.mxu0 %v9174_v32  ;;  %2964 = vmatpush.msra.mxu2 %v9361_v53 }
 0x239   : > { %11888 = vst [vmem:[#allocation454_spill] sm:$0xff] %v9354_v36  ;;  %v6563_v36 = vld [vmem:[%s10734_s2 + $0x398] sm:$0xff]  ;;  %3017 = vmatpush.msra.mxu3 %v9424_v30  ;;  %2923 = vmatpush.msra.mxu1 %v9015_v35  ;;  %v9543_v35 = vand.u32 4294901760, %v2603_v37 }
 0x23a   : > { %11889 = vst [vmem:[#allocation455_spill] sm:$0xff] %v9359_v34  ;;  %v9436_v52 = vand.u32 4294901760, %v6563_v36  ;;  %2888 = vmatpush.msra.mxu0 %v9195_v46  ;;  %2966 = vmatpush.msra.mxu2 %v9382_v18 }
 0x23b   : > { %11890 = vst [vmem:[#allocation456_spill] sm:$0xff] %v9367_v19  ;;  %v9399_v19 = vsub.f32 %v6567_v55, %v9361_v53  ;;  %v9415_v55 = vand.u32 4294901760, %v9380_v43  ;;  %3023 = vmatpush.msra.mxu3 %v9447_v25  ;;  %2925 = vmatpush.msra.mxu1 %v9032_v0  ;;  %v9541_v0 = vand.u32 4294901760, %v9515_v58 }
 0x23c   : > { %11891 = vst [vmem:[#allocation457_spill] sm:$0xff] %v9374_v44  ;;  %v3027_v44 = vsub.f32 %v9359_v34, %v9396_v42  ;;  %2892 = vmatpush.msra.mxu0 %v9212_v51  ;;  %2968 = vmatpush.msra.mxu2 %v9401_v39 }
 0x23d   : > { %11892 = vst [vmem:[#allocation458_spill] sm:$0xff] %v9377_v5  ;;  %v9431_v5 = vand.u32 4294901760, %v9399_v19  ;;  %v3033_v56 = vsub.f32 %v9380_v43, %v9415_v55  ;;  %2927 = vmatpush.msra.mxu1 %v9047_v41 }
 0x23e   : > { %11893 = vst [vmem:[#allocation459_spill] sm:$0xff] %v9380_v43  ;;  %v9466_v23 = vand.u32 4294901760, %v3027_v44  ;;  %v6560_v44 = vld [vmem:[%s10734_s2 + $0x380] sm:$0xff]  ;;  %2896 = vmatpush.msra.mxu0 %v9234_v3  ;;  %2970 = vmatpush.msra.mxu2 %v9420_v10  ;;  %v3075_v3 = vsub.f32 %v9515_v58, %v9541_v0 }
 0x23f   : > { %11894 = vst [vmem:[#allocation460_spill] sm:$0xff] %v9393_v45  ;;  %v9443_v45 = vand.u32 4294901760, %v2602_v11  ;;  %2929 = vmatpush.msra.mxu1 %v9063_v22 }
 0x240   : > { %11895 = vst [vmem:[#allocation461_spill] sm:$0xff] %v9396_v42  ;;  %v9455_v42 = vsub.f32 %v6564_v59, %v9420_v10  ;;  %v3039_v59 = vsub.f32 %v9399_v19, %v9431_v5  ;;  %3029 = vmatpush.msra.mxu3 %v9466_v23  ;;  %2900 = vmatpush.msra.mxu0 %v9255_v8 }
 0x241   : > { %11896 = vst [vmem:[#allocation462_spill] sm:$0xff] %v9399_v19  ;;  %v9479_v26 = vsub.f32 %v2602_v11, %v9443_v45  ;;  %2931 = vmatpush.msra.mxu1 %v9095_v33  ;;  %2972 = vmatpush.msra.mxu2 %v9436_v52 }
 0x242   : > { %11897 = vst [vmem:[#allocation463_spill] sm:$0xff] %v9405_v4  ;;  %v9462_v4 = vand.u32 4294901760, %v6562_v29  ;;  %v9493_v47 = vand.u32 4294901760, %v9455_v42  ;;  %2904 = vmatpush.msra.mxu0 %v9277_v21  ;;  %2744 = vmatmul.f32.vlgmr.msrb.gmra.mxu1 %v9443_v45 }
 0x243   : > { %11898 = vst [vmem:[#allocation464_spill] sm:$0xff] %v9415_v55  ;;  %v9474_v55 = vsub.f32 %v6563_v36, %v9436_v52  ;;  %v3045_v36 = vsub.f32 %v9418_v24, %v9452_v40  ;;  %2933 = vmatpush.msra.mxu1 %v9114_v9  ;;  %2798 = vmatmul.f32.vlgmr.msrb.gmra.mxu2 %v9479_v26 }
 0x244   : > { %11899 = vst [vmem:[#allocation465_spill] sm:$0xff] %v9418_v24  ;;  %v9498_v11 = vsub.f32 %v6562_v29, %v9462_v4  ;;  %v2640_v29 = vand.u32 4294901760, %v9479_v26  ;;  %2974 = vmatpush.msra.mxu2 %v9462_v4 }
 0x245   : > { %11900 = vst [vmem:[#allocation466_spill] sm:$0xff] %v9424_v30  ;;  %v9488_v30 = vand.u32 4294901760, %v3033_v56  ;;  %v3051_v56 = vsub.f32 %v9434_v6, %v9471_v27  ;;  %v9507_v62 = vand.u32 4294901760, %v9474_v55  ;;  %2935 = vmatpush.msra.mxu1 %v9133_v15 }
 0x246   : > { %11901 = vst [vmem:[#allocation467_spill] sm:$0xff] %v9431_v5  ;;  %v9526_v32 = vand.u32 4294901760, %v9498_v11  ;;  %v2641_v46 = vsub.f32 %v9479_v26, %v2640_v29  ;;  %2976 = vmatpush.msra.mxu2 %v9481_v13  ;;  %2837 = vmatmul.f32.vlgmr.msrb.gmra.mxu3 %v2640_v29  ;;  %v11930_v29 = vld [vmem:[#allocation448_spill] sm:$0xff] }
 0x247   : > { %11902 = vst [vmem:[#allocation468_spill] sm:$0xff] %v9434_v6  ;;  %3035 = vmatpush.msra.mxu3 %v9488_v30  ;;  %v9530_v16 = vand.u32 4294901760, %v3051_v56 }
 0x248   : > { %11903 = vst [vmem:[#allocation469_spill] sm:$0xff] %v9447_v25  ;;  %v9502_v25 = vand.u32 4294901760, %v3039_v59  ;;  %v9519_v59 = vand.u32 4294901760, %v3045_v36  ;;  %v3063_v36 = vsub.f32 %v9474_v55, %v9507_v62 }
 0x249   : > { %11904 = vst [vmem:[#allocation470_spill] sm:$0xff] %v9452_v40  ;;  %v9509_v40 = vand.u32 4294901760, %v6560_v44 }
 0x24a   : > { %11905 = vst [vmem:[#allocation471_spill] sm:$0xff] %v9455_v42  ;;  %3041 = vmatpush.msra.mxu3 %v9502_v25  ;;  %v9555_v51 = vand.u32 4294901760, %v3063_v36 }
 0x24b   : > { %11906 = vst [vmem:[#allocation472_spill] sm:$0xff] %v9462_v4  ;;  %2978 = vmatpush.msra.mxu2 %v9509_v40 }
 0x24c   : > { %11907 = vst [vmem:[#allocation473_spill] sm:$0xff] %v9466_v23  ;;  %v3057_v23 = vsub.f32 %v9455_v42, %v9493_v47  ;;  %3047 = vmatpush.msra.mxu3 %v9519_v59 }
 0x24d   : > { %11908 = vst [vmem:[#allocation474_spill] sm:$0xff] %v9471_v27 }
 0x24e   : > { %11909 = vst [vmem:[#allocation475_spill] sm:$0xff] %v9474_v55  ;;  %v9547_v56 = vand.u32 4294901760, %v3057_v23  ;;  %3053 = vmatpush.msra.mxu3 %v9530_v16  ;;  %v2642_v23 = vand.u32 4294901760, %v2641_v46 }
 0x24f   : > { %11910 = vst [vmem:[#allocation476_spill] sm:$0xff] %v9481_v13 }
 0x250   : > { %11911 = vst [vmem:[#allocation477_spill] sm:$0xff] %v9488_v30  ;;  %v9535_v30 = vsub.f32 %v6560_v44, %v9509_v40  ;;  %v3069_v44 = vsub.f32 %v9498_v11, %v9526_v32  ;;  %3059 = vmatpush.msra.mxu3 %v9547_v56  ;;  %2643 = vmatmul.f32.vlgmr.msrb.gmra.mxu0 %v2642_v23  ;;  %v11929_v23 = vld [vmem:[#allocation440_spill] sm:$0xff] }
 0x251   : > { %11912 = vst [vmem:[#allocation478_spill] sm:$0xff] %v9493_v47  ;;  %3091 = vmatpush.msrb.mxu0 %v9227_v49  ;;  %3185 = vmatpush.msrb.mxu2 %v11929_v23  ;;  %v12019_v49 = vld [vmem:[#allocation127_spill] sm:$0xff] }
 0x252   : > { %11913 = vst [vmem:[#allocation479_spill] sm:$0xff] %v9498_v11  ;;  %v9571_v36 = vand.u32 4294901760, %v3069_v44  ;;  %3065 = vmatpush.msra.mxu3 %v9555_v51  ;;  %v11927_v44 = vld [vmem:[#allocation423_spill] sm:$0xff] }
 0x253   : > { %11914 = vst [vmem:[#allocation480_spill] sm:$0xff] %v9502_v25  ;;  %v9558_v25 = vand.u32 4294901760, %v9535_v30  ;;  %3094 = vmatpush.msrb.mxu0 %v9258_v20  ;;  %2937 = vmatpush.msra.mxu1 %v11927_v44  ;;  %v11982_v20 = vld [vmem:[#allocation17_spill] sm:$0xff] }
 0x254   : > { %11915 = vst [vmem:[#allocation481_spill] sm:$0xff] %v9507_v62  ;;  %3071 = vmatpush.msra.mxu3 %v9571_v36  ;;  %3189 = vmatpush.msrb.mxu2 %v9297_v38  ;;  %v11973_v38 = vld [vmem:[#allocation44_spill] sm:$0xff] }
 0x255   : > { %11916 = vst [vmem:[#allocation482_spill] sm:$0xff] %v9509_v40  ;;  %v3081_v46 = vsub.f32 %v9535_v30, %v9558_v25  ;;  %3097 = vmatpush.msrb.mxu0 %v9280_v17  ;;  %2939 = vmatpush.msra.mxu1 %v9171_v57 }
 0x256   : > { %11917 = vst [vmem:[#allocation483_spill] sm:$0xff] %v9515_v58  ;;  %3193 = vmatpush.msrb.mxu2 %v11930_v29  ;;  %v11970_v29 = vld [vmem:[#allocation42_spill] sm:$0xff] }
 0x257   : > { %11918 = vst [vmem:[#allocation484_spill] sm:$0xff] %v9519_v59  ;;  %v9565_v59 = vsub.f32 %v2603_v37, %v9543_v35  ;;  %v9578_v37 = vand.u32 4294901760, %v3075_v3  ;;  %3100 = vmatpush.msrb.mxu0 %v9285_v48  ;;  %2941 = vmatpush.msra.mxu1 %v9192_v7  ;;  %v11974_v48 = vld [vmem:[#allocation48_spill] sm:$0xff] }
 0x258   : > { %11919 = vst [vmem:[#allocation485_spill] sm:$0xff] %v9526_v32  ;;  %3197 = vmatpush.msrb.mxu2 %v9326_v2  ;;  %2906 = vmatmul.f32.vlgmr.msra.gmra.mxu0 %v9443_v45  ;;  %v11966_v2 = vld [vmem:[#allocation55_spill] sm:$0xff] }
 0x259   : > { %11920 = vst [vmem:[#allocation486_spill] sm:$0xff] %v9535_v30  ;;  %3077 = vmatpush.msra.mxu3 %v9578_v37  ;;  %3103 = vmatpush.msrb.mxu0 %v9307_v63  ;;  %v11972_v63 = vld [vmem:[#allocation59_spill] sm:$0xff] }
 0x25a   : > { %11921 = vst [vmem:[#allocation487_spill] sm:$0xff] %v9541_v0  ;;  %3144 = vmatpush.msrb.mxu1 %v9183_v60 }
 0x25b   : > { %11922 = vst [vmem:[#allocation488_spill] sm:$0xff] %v9547_v56  ;;  %v11345_v56 = vand.u32 4294901760, %v9565_v59  ;;  %3106 = vmatpush.msrb.mxu0 %v9338_v14  ;;  %2943 = vmatmul.f32.vlgmr.msra.gmra.mxu1 %v9443_v45  ;;  %v11934_v45 = vld [vmem:[#allocation464_spill] sm:$0xff]  ;;  %v11969_v14 = vld [vmem:[#allocation58_spill] sm:$0xff] }
 0x25c   : > { %11923 = vst [vmem:[#allocation489_spill] sm:$0xff] %v9555_v51  ;;  %v9587_v51 = vand.u32 4294901760, %v3081_v46  ;;  %3146 = vmatpush.msrb.mxu1 %v9217_v28  ;;  %v11931_v46 = vld [vmem:[#allocation453_spill] sm:$0xff] }
 0x25d   : > { %11924 = vst [vmem:[#allocation490_spill] sm:$0xff] %v9558_v25  ;;  %v2982_v3 = vsub.f32 %v9565_v59, %v11345_v56  ;;  %3109 = vmatpush.msrb.mxu0 %v9359_v34  ;;  %3201 = vmatpush.msrb.mxu2 %v11931_v46  ;;  %v11935_v56 = vld [vmem:[#allocation470_spill] sm:$0xff]  ;;  %v11965_v34 = vld [vmem:[#allocation33_spill] sm:$0xff] }
 0x25e   : > { %11925 = vst [vmem:[#allocation491_spill] sm:$0xff] %v9571_v36  ;;  %3083 = vmatpush.msra.mxu3 %v9587_v51  ;;  %3148 = vmatpush.msrb.mxu1 %v9239_v50  ;;  %v9731_v46 = vld [vmem:[%s6975_s14 + $0x1d] ss:$2 sm:$0x3] }
 0x25f   : > { %11926 = vst [vmem:[#allocation492_spill] sm:$0xff] %v9578_v37  ;;  %v2983_v26 = vand.u32 4294901760, %v2982_v3  ;;  %3085 = vmatmul.f32.vlgmr.msra.gmra.mxu3 %v9543_v35  ;;  %3112 = vmatpush.msrb.mxu0 %v9380_v43  ;;  %v11932_v3 = vld [vmem:[#allocation458_spill] sm:$0xff]  ;;  %v11979_v37 = vld [vmem:[#allocation16_spill] sm:$0xff] }
 0x260   : > { %11928 = vst [vmem:[#allocation423_spill] sm:$0xff] %v9587_v51  ;;  %3252 = vmatpush.msrb.mxu3 %v9183_v60  ;;  %3150 = vmatpush.msrb.mxu1 %v9246_v54  ;;  %v9725_v43 = vld [vmem:[%s6975_s14 + $0x19] ss:$2 sm:$0x3]  ;;  %v11977_v51 = vld [vmem:[#allocation51_spill] sm:$0xff] }
 0x261   : > { %2984 = vmatmul.f32.vlgmr.msra.gmra.mxu2 %v2983_v26  ;;  %3115 = vmatpush.msrb.mxu0 %v9399_v19  ;;  %v11933_v26 = vld [vmem:[#allocation461_spill] sm:$0xff]  ;;  %v11961_v19 = vld [vmem:[#allocation26_spill] sm:$0xff]  ;;  %3308 = vst [vmem:[#allocation1 + $0x6] ss:$9 sm:$0xff] %v9725_v43 }
 0x262   : > { %3254 = vmatpush.msrb.mxu3 %v9217_v28  ;;  %3205 = vmatpush.msrb.mxu2 %v11932_v3  ;;  %v11962_v3 = vld [vmem:[#allocation30_spill] sm:$0xff]  ;;  %3310 = vst [vmem:[#allocation1 + $0x7] ss:$9 sm:$0xff] %v9731_v46 }
 0x263   : > { %3152 = vmatpush.msrb.mxu1 %v9265_v1  ;;  %3118 = vmatpush.msrb.mxu0 %v9418_v24  ;;  %v1910_v24 = vpop.f32.mrf.mxu0 }
 0x264   : > { %3256 = vmatpush.msrb.mxu3 %v9239_v50  ;;  %3209 = vmatpush.msrb.mxu2 %v11933_v26  ;;  %v9713_v26 = vld [vmem:[%s6975_s14 + $0x11] ss:$2 sm:$0x3] }
 0x265   : > { %3154 = vmatpush.msrb.mxu1 %v9299_v61  ;;  %3121 = vmatpush.msrb.mxu0 %v9434_v6  ;;  %v11957_v6 = vld [vmem:[#allocation41_spill] sm:$0xff]  ;;  %3304 = vst [vmem:[#allocation1 + $0x4] ss:$9 sm:$0xff] %v9713_v26 }
 0x266   : > { %3258 = vmatpush.msrb.mxu3 %v9246_v54  ;;  %3213 = vmatpush.msrb.mxu2 %v11934_v45  ;;  %v11959_v45 = vld [vmem:[#allocation29_spill] sm:$0xff] }
 0x267   : > { %3156 = vmatpush.msrb.mxu1 %v9321_v31  ;;  %3124 = vmatpush.msrb.mxu0 %v9455_v42  ;;  %v2011_v42 = vpop.f32.mrf.mxu1 }
 0x268   : > { %3260 = vmatpush.msrb.mxu3 %v9265_v1  ;;  %3217 = vmatpush.msrb.mxu2 %v9431_v5  ;;  %v2065_v5 = vpop.f32.mrf.mxu2 }
 0x269   : > { %3158 = vmatpush.msrb.mxu1 %v9340_v12  ;;  %3127 = vmatpush.msrb.mxu0 %v9474_v55  ;;  %v11955_v55 = vld [vmem:[#allocation21_spill] sm:$0xff] }
 0x26a   : > { %3262 = vmatpush.msrb.mxu3 %v9299_v61  ;;  %3221 = vmatpush.msrb.mxu2 %v11935_v56  ;;  %v2012_v56 = vadd.f32 %v2011_v42, %v1910_v24  ;;  %v11936_v42 = vld [vmem:[#allocation3_spill] sm:$0xff] }
 0x26b   : > { %3160 = vmatpush.msrb.mxu1 %v9361_v53  ;;  %3130 = vmatpush.msrb.mxu0 %v9498_v11  ;;  %v2104_v11 = vpop.f32.mrf.mxu3 }
 0x26c   : > { %3264 = vmatpush.msrb.mxu3 %v9321_v31  ;;  %3225 = vmatpush.msrb.mxu2 %v9471_v27  ;;  %v2066_v27 = vadd.f32 %v2065_v5, %v2012_v56  ;;  %v11937_v56 = vld [vmem:[#allocation4_spill] sm:$0xff] }
 0x26d   : > { %3162 = vmatpush.msrb.mxu1 %v9382_v18  ;;  %3133 = vmatpush.msrb.mxu0 %v9515_v58 }
 0x26e   : > { %3266 = vmatpush.msrb.mxu3 %v9340_v12  ;;  %3229 = vmatpush.msrb.mxu2 %v9493_v47  ;;  %v2105_v24 = vadd.f32 %v2104_v11, %v2066_v27  ;;  %v11938_v11 = vld [vmem:[#allocation5_spill] sm:$0xff]  ;;  %v11942_v47 = vld [vmem:[#allocation7_spill] sm:$0xff] }
 0x26f   : > { %3164 = vmatpush.msrb.mxu1 %v9401_v39  ;;  %3136 = vmatpush.msrb.mxu0 %v9535_v30  ;;  %v2210_v27 = vpop.f32.mrf.mxu1 }
 0x270   : > { %3268 = vmatpush.msrb.mxu3 %v9361_v53  ;;  %3233 = vmatpush.msrb.mxu2 %v9507_v62  ;;  %v2173_v62 = vpop.f32.mrf.mxu0  ;;  %v2251_v30 = vpop.f32.mrf.mxu2 }
 0x271   : > { %3166 = vmatpush.msrb.mxu1 %v9420_v10  ;;  %3139 = vmatmul.f32.vlgmr.msrb.gmra.mxu0 %v9565_v59  ;;  %v2174_v5 = vadd.f32 %v2173_v62, %v2105_v24  ;;  %v11940_v62 = vld [vmem:[#allocation6_spill] sm:$0xff] }
 0x272   : > { %3270 = vmatpush.msrb.mxu3 %v9382_v18  ;;  %3237 = vmatpush.msrb.mxu2 %v9526_v32  ;;  %v11939_v32 = vld [vmem:[#allocation9_spill] sm:$0xff] }
 0x273   : > { %3168 = vmatpush.msrb.mxu1 %v9436_v52  ;;  %3316 = vmatpush.msra.mxu0 %v11936_v42  ;;  %v2352_v58 = vpop.f32.mrf.mxu3 }
 0x274   : > { %3272 = vmatpush.msrb.mxu3 %v9401_v39  ;;  %3241 = vmatpush.msrb.mxu2 %v9541_v0  ;;  %v2211_v0 = vadd.f32 %v2210_v27, %v2174_v5  ;;  %v11943_v5 = vand.u32 4294901760, %v9565_v59  ;;  %v11944_v27 = vld [vmem:[#allocation11_spill] sm:$0xff]  ;;  %v11950_v59 = vld [vmem:[#allocation14_spill] sm:$0xff] }
 0x275   : > { %3170 = vmatpush.msrb.mxu1 %v9462_v4  ;;  %3318 = vmatpush.msra.mxu0 %v11937_v56 }
 0x276   : > { %3274 = vmatpush.msrb.mxu3 %v9420_v10  ;;  %3245 = vmatpush.msrb.mxu2 %v9558_v25  ;;  %v2252_v24 = vadd.f32 %v2251_v30, %v2211_v0  ;;  %v11941_v25 = vld [vmem:[#allocation10_spill] sm:$0xff]  ;;  %v11946_v0 = vld [vmem:[#allocation8_spill] sm:$0xff]  ;;  %v11947_v30 = vld [vmem:[#allocation13_spill] sm:$0xff] }
 0x277   : > { %3247 = vmatmul.f32.vlgmr.msrb.gmra.mxu2 %v9543_v35  ;;  %3320 = vmatpush.msra.mxu0 %v11938_v11 }
 0x278   : > { %3276 = vmatpush.msrb.mxu3 %v9436_v52  ;;  %3459 = vmatpush.msra.mxu2 %v11939_v32  ;;  %v9674_v32 = vadd.f32 %v2352_v58, %v2252_v24  ;;  %v11949_v58 = vld [vmem:[#allocation12_spill] sm:$0xff]  ;;  %v11951_v24 = vld [vmem:[#allocation31_spill] sm:$0xff] }
 0x279   : > { %3172 = vmatpush.msrb.mxu1 %v9481_v13  ;;  %3322 = vmatpush.msra.mxu0 %v11940_v62 }
 0x27a   : > { %3278 = vmatpush.msrb.mxu3 %v9462_v4  ;;  %3462 = vmatpush.msra.mxu2 %v11941_v25  ;;  %v11948_v25 = vld [vmem:[#allocation28_spill] sm:$0xff] }
 0x27b   : > { %3174 = vmatpush.msrb.mxu1 %v9509_v40  ;;  %3324 = vmatpush.msra.mxu0 %v11942_v47  ;;  %v12024_v4 = vld [vmem:[#allocation112_spill] sm:$0xff] }
 0x27c   : > { %3280 = vmatpush.msrb.mxu3 %v9481_v13  ;;  %3178 = vmatmul.f32.vlgmr.msrb.gmra.mxu1 %v11943_v5  ;;  %v11952_v5 = vld [vmem:[#allocation19_spill] sm:$0xff]  ;;  %v11984_v13 = vld [vmem:[#allocation88_spill] sm:$0xff] }
 0x27d   : > { %3465 = vmatpush.msra.mxu2 %v11944_v27  ;;  %3326 = vmatpush.msra.mxu0 %v11946_v0  ;;  %v11953_v27 = vld [vmem:[#allocation15_spill] sm:$0xff] }
 0x27e   : > { %3282 = vmatpush.msrb.mxu3 %v9509_v40  ;;  %v11980_v40 = vld [vmem:[#allocation53_spill] sm:$0xff] }
 0x27f   : > { %3284 = vmatmul.f32.vlgmr.msrb.gmra.mxu3 %v9543_v35  ;;  %v11945_v35 = vld [vmem:[#allocation27_spill] sm:$0xff]  ;;  %3468 = vmatpush.msra.mxu2 %v11947_v30 }
 0x280   : > { %3512 = vmatpush.msra.mxu3 %v11936_v42  ;;  %3361 = vmatpush.msra.mxu1 %v11945_v35  ;;  %v9692_v35 = vld [vmem:[%s6975_s14 + $0x1] ss:$2 sm:$0x3] }
 0x281   : > { %3328 = vmatpush.msra.mxu0 %v11949_v58  ;;  %3471 = vmatpush.msra.mxu2 %v11950_v59  ;;  %v11954_v30 = vld [vmem:[#allocation35_spill] sm:$0xff]  ;;  %3296 = vst [vmem:[#allocation1] ss:$9 sm:$0xff] %v9692_v35 }
 0x282   : > { %3514 = vmatpush.msra.mxu3 %v11937_v56  ;;  %3367 = vmatpush.msra.mxu1 %v11948_v25  ;;  %v9697_v25 = vld [vmem:[%s6975_s14 + $0x5] ss:$2 sm:$0x3] }
 0x283   : > { %3330 = vmatpush.msra.mxu0 %v11952_v5  ;;  %3474 = vmatpush.msra.mxu2 %v11953_v27  ;;  %v11956_v59 = vld [vmem:[#allocation23_spill] sm:$0xff]  ;;  %v9707_v27 = vld [vmem:[%s6975_s14 + $0xd] ss:$2 sm:$0x3]  ;;  %3298 = vst [vmem:[#allocation1 + $0x1] ss:$9 sm:$0xff] %v9697_v25 }
 0x284   : > { %3516 = vmatpush.msra.mxu3 %v11938_v11  ;;  %3373 = vmatpush.msra.mxu1 %v11951_v24  ;;  %v9702_v24 = vld [vmem:[%s6975_s14 + $0x9] ss:$2 sm:$0x3]  ;;  %3302 = vst [vmem:[#allocation1 + $0x3] ss:$9 sm:$0xff] %v9707_v27 }
 0x285   : > { %3332 = vmatpush.msra.mxu0 %v11955_v55  ;;  %3477 = vmatpush.msra.mxu2 %v11956_v59  ;;  %v11960_v59 = vld [vmem:[#allocation46_spill] sm:$0xff]  ;;  %3300 = vst [vmem:[#allocation1 + $0x2] ss:$9 sm:$0xff] %v9702_v24 }
 0x286   : > { %3518 = vmatpush.msra.mxu3 %v11940_v62  ;;  %3379 = vmatpush.msra.mxu1 %v11954_v30  ;;  %v11958_v30 = vld [vmem:[#allocation24_spill] sm:$0xff] }
 0x287   : > { %3334 = vmatpush.msra.mxu0 %v11958_v30  ;;  %3480 = vmatpush.msra.mxu2 %v11959_v45  ;;  %v11963_v45 = vld [vmem:[#allocation50_spill] sm:$0xff] }
 0x288   : > { %3520 = vmatpush.msra.mxu3 %v11942_v47  ;;  %3385 = vmatpush.msra.mxu1 %v11957_v6  ;;  %v9719_v6 = vld [vmem:[%s6975_s14 + $0x15] ss:$2 sm:$0x3] }
 0x289   : > { %3336 = vmatpush.msra.mxu0 %v11961_v19  ;;  %3483 = vmatpush.msra.mxu2 %v11962_v3  ;;  %3306 = vst [vmem:[#allocation1 + $0x5] ss:$9 sm:$0xff] %v9719_v6  ;;  %v11967_v3 = vld [vmem:[#allocation38_spill] sm:$0xff]  ;;  %v2514_v17 = vpop.f32.mrf.mxu2 }
 0x28a   : > { %3522 = vmatpush.msra.mxu3 %v11946_v0  ;;  %3391 = vmatpush.msra.mxu1 %v11960_v59  ;;  %v11964_v59 = vld [vmem:[#allocation36_spill] sm:$0xff] }
 0x28b   : > { %3338 = vmatpush.msra.mxu0 %v11964_v59  ;;  %3486 = vmatpush.msra.mxu2 %v11965_v34  ;;  %v11971_v34 = vld [vmem:[#allocation47_spill] sm:$0xff] }
 0x28c   : > { %3524 = vmatpush.msra.mxu3 %v11949_v58  ;;  %3397 = vmatpush.msra.mxu1 %v11963_v45  ;;  %v11968_v45 = vld [vmem:[#allocation34_spill] sm:$0xff] }
 0x28d   : > { %3340 = vmatpush.msra.mxu0 %v11967_v3  ;;  %3489 = vmatpush.msra.mxu2 %v11968_v45  ;;  %v11975_v45 = vld [vmem:[#allocation63_spill] sm:$0xff] }
 0x28e   : > { %3526 = vmatpush.msra.mxu3 %v11952_v5  ;;  %3403 = vmatpush.msra.mxu1 %v11966_v2  ;;  %v2406_v2 = vpop.f32.mrf.mxu0 }
 0x28f   : > { %3342 = vmatpush.msra.mxu0 %v11970_v29  ;;  %3492 = vmatpush.msra.mxu2 %v11971_v34  ;;  %v2407_v23 = vadd.f32 %v2406_v2, %v9674_v32  ;;  %v11978_v34 = vld [vmem:[#allocation80_spill] sm:$0xff]  ;;  %v2551_v2 = vpop.f32.mrf.mxu3 }
 0x290   : > { %3528 = vmatpush.msra.mxu3 %v11955_v55  ;;  %3409 = vmatpush.msra.mxu1 %v11969_v14  ;;  %v11976_v14 = vld [vmem:[#allocation52_spill] sm:$0xff] }
 0x291   : > { %3344 = vmatpush.msra.mxu0 %v11973_v38  ;;  %3495 = vmatpush.msra.mxu2 %v11974_v48  ;;  %v9764_v36 = vld [vmem:[#allocation1 + $0x9] sm:$0xff] }
 0x292   : > { %3530 = vmatpush.msra.mxu3 %v11958_v30  ;;  %3415 = vmatpush.msra.mxu1 %v11972_v63  ;;  %v2445_v63 = vpop.f32.mrf.mxu1 }
 0x293   : > { %3346 = vmatpush.msra.mxu0 %v11976_v14  ;;  %3498 = vmatpush.msra.mxu2 %v11977_v51  ;;  %v2446_v48 = vadd.f32 %v2445_v63, %v2407_v23  ;;  %v11983_v51 = vld [vmem:[#allocation67_spill] sm:$0xff] }
 0x294   : > { %3532 = vmatpush.msra.mxu3 %v11961_v19  ;;  %3421 = vmatpush.msra.mxu1 %v11975_v45  ;;  %v11981_v45 = vld [vmem:[#allocation84_spill] sm:$0xff]  ;;  %v11991_v63 = vld [vmem:[#allocation91_spill] sm:$0xff] }
 0x295   : > { %3553 = vmatpush.msrb.mxu0 %v11979_v37  ;;  %3501 = vmatpush.msra.mxu2 %v11980_v40  ;;  %v2515_v32 = vadd.f32 %v2514_v17, %v2446_v48  ;;  %v11985_v40 = vld [vmem:[#allocation18_spill] sm:$0xff]  ;;  %v11986_v37 = vld [vmem:[#allocation49_spill] sm:$0xff]  ;;  %v11989_v17 = vld [vmem:[#allocation20_spill] sm:$0xff] }
 0x296   : > { %3534 = vmatpush.msra.mxu3 %v11964_v59  ;;  %3427 = vmatpush.msra.mxu1 %v11978_v34  ;;  %v3311_v34 = vld [vmem:[#allocation1] sm:$0xff] }
 0x297   : > { %3557 = vmatpush.msrb.mxu0 %v11982_v20  ;;  %3504 = vmatpush.msra.mxu2 %v11983_v51  ;;  %3997 = vst [vmem:[#allocation1] ss:$9 sm:$0xff] %v9692_v35  ;;  %v9771_v23 = vadd.f32 %v2551_v2, %v2515_v32  ;;  %v11988_v20 = vld [vmem:[#allocation93_spill] sm:$0xff]  ;;  %v11992_v48 = vld [vmem:[#allocation98_spill] sm:$0xff]  ;;  %v11995_v32 = vld [vmem:[#allocation96_spill] sm:$0xff] }
 0x298   : > { %3536 = vmatpush.msra.mxu3 %v11967_v3  ;;  %3433 = vmatpush.msra.mxu1 %v11981_v45  ;;  %3999 = vst [vmem:[#allocation1 + $0x1] ss:$9 sm:$0xff] %v9697_v25  ;;  %v11993_v45 = vld [vmem:[#allocation22_spill] sm:$0xff]  ;;  %v11994_v51 = vld [vmem:[#allocation65_spill] sm:$0xff] }
 0x299   : > { %3561 = vmatpush.msrb.mxu0 %v11985_v40  ;;  %3657 = vmatpush.msrb.mxu2 %v11986_v37  ;;  %11987 = vst [vmem:[#allocation3_spill] sm:$0xff] %v9771_v23  ;;  %v11996_v2 = vld [vmem:[#allocation25_spill] sm:$0xff]  ;;  %v11997_v40 = vld [vmem:[#allocation71_spill] sm:$0xff]  ;;  %v12008_v23 = vld [vmem:[#allocation40_spill] sm:$0xff] }
 0x29a   : > { %3538 = vmatpush.msra.mxu3 %v11970_v29  ;;  %3439 = vmatpush.msra.mxu1 %v11984_v13  ;;  %4001 = vst [vmem:[#allocation1 + $0x2] ss:$9 sm:$0xff] %v9702_v24  ;;  %v11990_v13 = vld [vmem:[#allocation54_spill] sm:$0xff] }
 0x29b   : > { %3565 = vmatpush.msrb.mxu0 %v11989_v17  ;;  %3659 = vmatpush.msrb.mxu2 %v11990_v13  ;;  %4003 = vst [vmem:[#allocation1 + $0x3] ss:$9 sm:$0xff] %v9707_v27  ;;  %v11999_v17 = vld [vmem:[#allocation32_spill] sm:$0xff] }
 0x29c   : > { %3540 = vmatpush.msra.mxu3 %v11973_v38  ;;  %3445 = vmatpush.msra.mxu1 %v11988_v20  ;;  %4005 = vst [vmem:[#allocation1 + $0x4] ss:$9 sm:$0xff] %v9713_v26  ;;  %v11998_v20 = vld [vmem:[#allocation102_spill] sm:$0xff] }
 0x29d   : > { %3569 = vmatpush.msrb.mxu0 %v11993_v45  ;;  %4007 = vst [vmem:[#allocation1 + $0x5] ss:$9 sm:$0xff] %v9719_v6  ;;  %3661 = vmatpush.msrb.mxu2 %v11994_v51  ;;  %v12002_v45 = vld [vmem:[#allocation37_spill] sm:$0xff] }
 0x29e   : > { %3542 = vmatpush.msra.mxu3 %v11976_v14  ;;  %3451 = vmatpush.msra.mxu1 %v11992_v48  ;;  %4009 = vst [vmem:[#allocation1 + $0x6] ss:$9 sm:$0xff] %v9725_v43  ;;  %v12001_v48 = vld [vmem:[#allocation106_spill] sm:$0xff] }
 0x29f   : > { %3573 = vmatpush.msrb.mxu0 %v11996_v2  ;;  %4011 = vst [vmem:[#allocation1 + $0x7] ss:$9 sm:$0xff] %v9731_v46  ;;  %3663 = vmatpush.msrb.mxu2 %v11997_v40  ;;  %v12005_v2 = vld [vmem:[#allocation39_spill] sm:$0xff] }
 0x2a0   : > { %3702 = vmatpush.msrb.mxu3 %v11991_v63  ;;  %3620 = vmatpush.msrb.mxu1 %v11936_v42  ;;  %v9796_v42 = vand.u32 4294901760, %v3311_v34  ;;  %v12000_v63 = vld [vmem:[#allocation76_spill] sm:$0xff] }
 0x2a1   : > { %3577 = vmatpush.msrb.mxu0 %v11999_v17  ;;  %3665 = vmatpush.msrb.mxu2 %v12000_v63  ;;  %v12007_v17 = vld [vmem:[#allocation113_spill] sm:$0xff] }
 0x2a2   : > { %3708 = vmatpush.msrb.mxu3 %v11995_v32  ;;  %3622 = vmatpush.msrb.mxu1 %v11937_v56  ;;  %v12003_v56 = vld [vmem:[#allocation82_spill] sm:$0xff]  ;;  %v12004_v32 = vld [vmem:[#allocation109_spill] sm:$0xff] }
 0x2a3   : > { %3581 = vmatpush.msrb.mxu0 %v12002_v45  ;;  %3667 = vmatpush.msrb.mxu2 %v12003_v56  ;;  %v12011_v45 = vld [vmem:[#allocation43_spill] sm:$0xff] }
 0x2a4   : > { %3714 = vmatpush.msrb.mxu3 %v11998_v20  ;;  %3624 = vmatpush.msrb.mxu1 %v11938_v11  ;;  %v3348_v11 = vsub.f32 %v3311_v34, %v9796_v42  ;;  %v12006_v20 = vld [vmem:[#allocation83_spill] sm:$0xff]  ;;  %v12013_v34 = vld [vmem:[#allocation120_spill] sm:$0xff] }
 0x2a5   : > { %3585 = vmatpush.msrb.mxu0 %v12005_v2  ;;  %3669 = vmatpush.msrb.mxu2 %v12006_v20  ;;  %v12014_v2 = vld [vmem:[#allocation56_spill] sm:$0xff] }
 0x2a6   : > { %3720 = vmatpush.msrb.mxu3 %v12001_v48  ;;  %3626 = vmatpush.msrb.mxu1 %v11940_v62  ;;  %v12009_v48 = vld [vmem:[#allocation87_spill] sm:$0xff]  ;;  %v12010_v62 = vld [vmem:[#allocation116_spill] sm:$0xff] }
 0x2a7   : > { %3589 = vmatpush.msrb.mxu0 %v12008_v23  ;;  %3671 = vmatpush.msrb.mxu2 %v12009_v48  ;;  %v12015_v23 = vld [vmem:[#allocation100_spill] sm:$0xff] }
 0x2a8   : > { %3726 = vmatpush.msrb.mxu3 %v12004_v32  ;;  %3628 = vmatpush.msrb.mxu1 %v11942_v47  ;;  %v3349_v32 = vand.u32 4294901760, %v3348_v11  ;;  %v12012_v47 = vld [vmem:[#allocation95_spill] sm:$0xff] }
 0x2a9   : > { %3593 = vmatpush.msrb.mxu0 %v12011_v45  ;;  %3673 = vmatpush.msrb.mxu2 %v12012_v47  ;;  %v12018_v45 = vld [vmem:[#allocation104_spill] sm:$0xff] }
 0x2aa   : > { %3732 = vmatpush.msrb.mxu3 %v12007_v17  ;;  %3630 = vmatpush.msrb.mxu1 %v11946_v0  ;;  %v12016_v0 = vld [vmem:[#allocation123_spill] sm:$0xff]  ;;  %v12017_v17 = vld [vmem:[#allocation60_spill] sm:$0xff] }
 0x2ab   : > { %3597 = vmatpush.msrb.mxu0 %v12014_v2  ;;  %3675 = vmatpush.msrb.mxu2 %v12015_v23  ;;  %v12022_v2 = vld [vmem:[#allocation129_spill] sm:$0xff] }
 0x2ac   : > { %3738 = vmatpush.msrb.mxu3 %v12010_v62  ;;  %3632 = vmatpush.msrb.mxu1 %v11949_v58  ;;  %v3350_v62 = vsub.f32 %v3348_v11, %v3349_v32  ;;  %v9824_v58 = vand.u32 4294901760, %v9764_v36 }
 0x2ad   : > { %3601 = vmatpush.msrb.mxu0 %v12017_v17  ;;  %3677 = vmatpush.msrb.mxu2 %v12018_v45 }
 0x2ae   : > { %3744 = vmatpush.msrb.mxu3 %v12013_v34  ;;  %3634 = vmatpush.msrb.mxu1 %v11952_v5  ;;  %v12020_v34 = vld [vmem:[#allocation64_spill] sm:$0xff]  ;;  %v9836_v17 = vsub.f32 %v9764_v36, %v9824_v58  ;;  %v12030_v36 = vld [vmem:[#allocation122_spill] sm:$0xff] }
 0x2af   : > { %3605 = vmatpush.msrb.mxu0 %v12020_v34  ;;  %v12021_v5 = vld [vmem:[#allocation108_spill] sm:$0xff]  ;;  %v12026_v34 = vld [vmem:[#allocation78_spill] sm:$0xff]  ;;  %3507 = vmatmul.f32.vlgmr.msra.gmra.mxu2 %v3348_v11 }
 0x2b0   : > { %3750 = vmatpush.msrb.mxu3 %v12016_v0  ;;  %3636 = vmatpush.msrb.mxu1 %v11955_v55  ;;  %v12023_v0 = vld [vmem:[#allocation68_spill] sm:$0xff]  ;;  %v3351_v55 = vand.u32 4294901760, %v3350_v62  ;;  %v12029_v62 = vld [vmem:[#allocation61_spill] sm:$0xff]  ;;  %v12037_v11 = vld [vmem:[#allocation138_spill] sm:$0xff] }
 0x2b1   : > { %3679 = vmatpush.msrb.mxu2 %v12021_v5  ;;  %3609 = vmatpush.msrb.mxu0 %v12023_v0  ;;  %v12031_v0 = vld [vmem:[#allocation136_spill] sm:$0xff] }
 0x2b2   : > { %3756 = vmatpush.msrb.mxu3 %v12019_v49  ;;  %3638 = vmatpush.msrb.mxu1 %v11958_v30  ;;  %v12025_v49 = vld [vmem:[#allocation132_spill] sm:$0xff]  ;;  %v12027_v30 = vld [vmem:[#allocation118_spill] sm:$0xff] }
 0x2b3   : > { %3681 = vmatpush.msrb.mxu2 %v12024_v4  ;;  %3613 = vmatpush.msrb.mxu0 %v12026_v34  ;;  %v12034_v34 = vld [vmem:[#allocation137_spill] sm:$0xff] }
 0x2b4   : > { %3762 = vmatpush.msrb.mxu3 %v12022_v2  ;;  %3640 = vmatpush.msrb.mxu1 %v11961_v19  ;;  %v12028_v2 = vld [vmem:[#allocation134_spill] sm:$0xff]  ;;  %v3690_v19 = vand.u32 4294901760, %v9836_v17 }
 0x2b5   : > { %3683 = vmatpush.msrb.mxu2 %v12027_v30  ;;  %3352 = vmatmul.f32.vlgmr.msra.gmra.mxu0 %v3351_v55  ;;  %v12035_v55 = vld [vmem:[#allocation75_spill] sm:$0xff] }
 0x2b6   : > { %3768 = vmatpush.msrb.mxu3 %v12025_v49  ;;  %3642 = vmatpush.msrb.mxu1 %v11964_v59  ;;  %v12032_v49 = vld [vmem:[#allocation69_spill] sm:$0xff]  ;;  %v12033_v59 = vld [vmem:[#allocation126_spill] sm:$0xff] }
 0x2b7   : > { %3800 = vmatpush.msra.mxu0 %v12029_v62  ;;  %3685 = vmatpush.msrb.mxu2 %v12030_v36  ;;  %v12039_v62 = vld [vmem:[#allocation79_spill] sm:$0xff] }
 0x2b8   : > { %3774 = vmatpush.msrb.mxu3 %v12028_v2  ;;  %3644 = vmatpush.msrb.mxu1 %v11967_v3  ;;  %v3691_v3 = vsub.f32 %v9836_v17, %v3690_v19  ;;  %v12036_v2 = vld [vmem:[#allocation73_spill] sm:$0xff] }
 0x2b9   : > { %3803 = vmatpush.msra.mxu0 %v12032_v49  ;;  %3687 = vmatpush.msrb.mxu2 %v12033_v59  ;;  %v12041_v49 = vld [vmem:[#allocation85_spill] sm:$0xff] }
 0x2ba   : > { %3780 = vmatpush.msrb.mxu3 %v12031_v0  ;;  %3646 = vmatpush.msrb.mxu1 %v11970_v29  ;;  %v12038_v29 = vld [vmem:[#allocation81_spill] sm:$0xff]  ;;  %v3692_v0 = vand.u32 4294901760, %v3691_v3 }
 0x2bb   : > { %3546 = vmatmul.f32.vlgmr.msra.gmra.mxu3 %v3349_v32  ;;  %3806 = vmatpush.msra.mxu0 %v12035_v55  ;;  %v12040_v32 = vld [vmem:[#allocation86_spill] sm:$0xff]  ;;  %v12046_v3 = vld [vmem:[#allocation97_spill] sm:$0xff]  ;;  %v12048_v55 = vld [vmem:[#allocation103_spill] sm:$0xff] }
 0x2bc   : > { %3786 = vmatpush.msrb.mxu3 %v12034_v34  ;;  %3894 = vmatpush.msra.mxu2 %v12036_v2  ;;  %v12043_v34 = vld [vmem:[#allocation89_spill] sm:$0xff] }
 0x2bd   : > { %3648 = vmatpush.msrb.mxu1 %v11973_v38  ;;  %3809 = vmatpush.msra.mxu0 %v12038_v29  ;;  %v12042_v38 = vld [vmem:[#allocation90_spill] sm:$0xff]  ;;  %v12049_v2 = vld [vmem:[#allocation101_spill] sm:$0xff] }
 0x2be   : > { %3792 = vmatpush.msrb.mxu3 %v12037_v11  ;;  %3453 = vmatmul.f32.vlgmr.msra.gmra.mxu1 %v9796_v42  ;;  %v12053_v11 = vld [vmem:[#allocation110_spill] sm:$0xff] }
 0x2bf   : > { %3898 = vmatpush.msra.mxu2 %v12039_v62  ;;  %3650 = vmatpush.msrb.mxu1 %v11976_v14  ;;  %v12044_v14 = vld [vmem:[#allocation92_spill] sm:$0xff]  ;;  %v12055_v29 = vld [vmem:[#allocation114_spill] sm:$0xff]  ;;  %v12056_v62 = vld [vmem:[#allocation119_spill] sm:$0xff] }
 0x2c0   : > { %3961 = vmatpush.msra.mxu3 %v11986_v37  ;;  %3812 = vmatpush.msra.mxu0 %v12040_v32  ;;  %v2745_v32 = vpop.f32.mrf.mxu1 }
 0x2c1   : > { %3853 = vmatpush.msra.mxu1 %v11986_v37  ;;  %3902 = vmatpush.msra.mxu2 %v12041_v49  ;;  %v12045_v37 = vld [vmem:[#allocation94_spill] sm:$0xff]  ;;  %v12059_v49 = vld [vmem:[#allocation121_spill] sm:$0xff] }
 0x2c2   : > { %3963 = vmatpush.msra.mxu3 %v11990_v13  ;;  %3693 = vmatmul.f32.vlgmr.msrb.gmra.mxu2 %v3692_v0  ;;  %v12057_v0 = vld [vmem:[#allocation117_spill] sm:$0xff] }
 0x2c3   : > { %3815 = vmatpush.msra.mxu0 %v12042_v38  ;;  %3855 = vmatpush.msra.mxu1 %v11990_v13  ;;  %v12047_v13 = vld [vmem:[#allocation99_spill] sm:$0xff] }
 0x2c4   : > { %3906 = vmatpush.msra.mxu2 %v12043_v34  ;;  %3965 = vmatpush.msra.mxu3 %v11994_v51  ;;  %v12060_v34 = vld [vmem:[#allocation128_spill] sm:$0xff] }
 0x2c5   : > { %3615 = vmatmul.f32.vlgmr.msrb.gmra.mxu0 %v9796_v42  ;;  %3794 = vmatmul.f32.vlgmr.msrb.gmra.mxu3 %v9824_v58 }
 0x2c6   : > { %3818 = vmatpush.msra.mxu0 %v12044_v14  ;;  %3857 = vmatpush.msra.mxu1 %v11994_v51  ;;  %v12050_v51 = vld [vmem:[#allocation107_spill] sm:$0xff]  ;;  %v2799_v38 = vpop.f32.mrf.mxu2 }
 0x2c7   : > { %3910 = vmatpush.msra.mxu2 %v12045_v37  ;;  %3967 = vmatpush.msra.mxu3 %v11997_v40  ;;  %v12062_v37 = vld [vmem:[#allocation131_spill] sm:$0xff] }
 0x2c8   : > { %3652 = vmatmul.f32.vlgmr.msrb.gmra.mxu1 %v9796_v42  ;;  %3821 = vmatpush.msra.mxu0 %v12046_v3  ;;  %v12051_v42 = vld [vmem:[#allocation105_spill] sm:$0xff]  ;;  %v12063_v3 = vld [vmem:[#allocation130_spill] sm:$0xff] }
 0x2c9   : > { %3859 = vmatpush.msra.mxu1 %v11997_v40  ;;  %3914 = vmatpush.msra.mxu2 %v12047_v13  ;;  %v12052_v40 = vld [vmem:[#allocation111_spill] sm:$0xff] }
 0x2ca   : > { %3969 = vmatpush.msra.mxu3 %v12000_v63  ;;  %3824 = vmatpush.msra.mxu0 %v12048_v55  ;;  %v12065_v55 = vld [vmem:[#allocation133_spill] sm:$0xff] }
 0x2cb   : > { %3861 = vmatpush.msra.mxu1 %v12000_v63  ;;  %3918 = vmatpush.msra.mxu2 %v12049_v2  ;;  %v12054_v63 = vld [vmem:[#allocation115_spill] sm:$0xff] }
 0x2cc   : > { %3971 = vmatpush.msra.mxu3 %v12003_v56  ;;  %3827 = vmatpush.msra.mxu0 %v12050_v51  ;;  %v12066_v51 = vld [vmem:[#allocation140_spill] sm:$0xff] }
 0x2cd   : > { %3863 = vmatpush.msra.mxu1 %v12003_v56  ;;  %3922 = vmatpush.msra.mxu2 %v12051_v42  ;;  %v2644_v56 = vpop.f32.mrf.mxu0  ;;  %v12067_v42 = vld [vmem:[#allocation135_spill] sm:$0xff] }
 0x2ce   : > { %3973 = vmatpush.msra.mxu3 %v12006_v20  ;;  %3830 = vmatpush.msra.mxu0 %v12052_v40 }
 0x2cf   : > { %3865 = vmatpush.msra.mxu1 %v12006_v20  ;;  %3926 = vmatpush.msra.mxu2 %v12053_v11  ;;  %v12058_v20 = vld [vmem:[#allocation125_spill] sm:$0xff]  ;;  %v12069_v11 = vld [vmem:[#allocation142_spill] sm:$0xff] }
 0x2d0   : > { %3975 = vmatpush.msra.mxu3 %v12009_v48  ;;  %3833 = vmatpush.msra.mxu0 %v12054_v63 }
 0x2d1   : > { %3867 = vmatpush.msra.mxu1 %v12009_v48  ;;  %3930 = vmatpush.msra.mxu2 %v12055_v29  ;;  %v2746_v48 = vadd.f32 %v2745_v32, %v2644_v56 }
 0x2d2   : > { %3977 = vmatpush.msra.mxu3 %v12012_v47  ;;  %3836 = vmatpush.msra.mxu0 %v12056_v62  ;;  %v12071_v62 = vld [vmem:[#allocation144_spill] sm:$0xff] }
 0x2d3   : > { %3869 = vmatpush.msra.mxu1 %v12012_v47  ;;  %3934 = vmatpush.msra.mxu2 %v12057_v0  ;;  %v12061_v47 = vld [vmem:[#allocation124_spill] sm:$0xff]  ;;  %v2800_v14 = vadd.f32 %v2799_v38, %v2746_v48  ;;  %v12076_v48 = vld [vmem:[#allocation150_spill] sm:$0xff] }
 0x2d4   : > { %3979 = vmatpush.msra.mxu3 %v12015_v23  ;;  %3839 = vmatpush.msra.mxu0 %v12058_v20  ;;  %v12072_v20 = vld [vmem:[#allocation145_spill] sm:$0xff]  ;;  %v12077_v38 = vld [vmem:[#allocation162_spill] sm:$0xff] }
 0x2d5   : > { %3871 = vmatpush.msra.mxu1 %v12015_v23  ;;  %3938 = vmatpush.msra.mxu2 %v12059_v49  ;;  %v2838_v23 = vpop.f32.mrf.mxu3  ;;  %v2907_v2 = vpop.f32.mrf.mxu0  ;;  %v12074_v49 = vld [vmem:[#allocation158_spill] sm:$0xff] }
 0x2d6   : > { %3981 = vmatpush.msra.mxu3 %v12018_v45  ;;  %3842 = vmatpush.msra.mxu0 %v12060_v34  ;;  %v2839_v13 = vadd.f32 %v2838_v23, %v2800_v14  ;;  %v12079_v34 = vld [vmem:[#allocation153_spill] sm:$0xff]  ;;  %v12083_v14 = vld [vmem:[#allocation170_spill] sm:$0xff]  ;;  %v12085_v23 = vld [vmem:[#allocation160_spill] sm:$0xff] }
 0x2d7   : > { %3873 = vmatpush.msra.mxu1 %v12018_v45  ;;  %3942 = vmatpush.msra.mxu2 %v12061_v47  ;;  %v12064_v45 = vld [vmem:[#allocation139_spill] sm:$0xff]  ;;  %v12082_v47 = vld [vmem:[#allocation156_spill] sm:$0xff] }
 0x2d8   : > { %3983 = vmatpush.msra.mxu3 %v12021_v5  ;;  %3845 = vmatpush.msra.mxu0 %v12062_v37  ;;  %v2944_v40 = vpop.f32.mrf.mxu1  ;;  %v12084_v37 = vld [vmem:[#allocation157_spill] sm:$0xff] }
 0x2d9   : > { %3875 = vmatpush.msra.mxu1 %v12021_v5  ;;  %3946 = vmatpush.msra.mxu2 %v12063_v3  ;;  %v2908_v5 = vadd.f32 %v2907_v2, %v2839_v13  ;;  %v12086_v3 = vld [vmem:[#allocation174_spill] sm:$0xff]  ;;  %v12087_v13 = vld [vmem:[#allocation161_spill] sm:$0xff] }
 0x2da   : > { %3985 = vmatpush.msra.mxu3 %v12024_v4  ;;  %3848 = vmatmul.f32.vlgmr.msra.gmra.mxu0 %v9836_v17  ;;  %v12080_v17 = vld [vmem:[#allocation166_spill] sm:$0xff] }
 0x2db   : > { %3877 = vmatpush.msra.mxu1 %v12024_v4  ;;  %4017 = vmatpush.msrb.mxu0 %v12064_v45  ;;  %v12068_v4 = vld [vmem:[#allocation141_spill] sm:$0xff]  ;;  %v2945_v63 = vadd.f32 %v2944_v40, %v2908_v5  ;;  %v12089_v2 = vld [vmem:[#allocation178_spill] sm:$0xff]  ;;  %v12090_v5 = vld [vmem:[#allocation167_spill] sm:$0xff] }
 0x2dc   : > { %3950 = vmatpush.msra.mxu2 %v12065_v55  ;;  %3987 = vmatpush.msra.mxu3 %v12027_v30  ;;  %v12088_v55 = vld [vmem:[#allocation164_spill] sm:$0xff]  ;;  %v12092_v40 = vld [vmem:[#allocation181_spill] sm:$0xff] }
 0x2dd   : > { %3879 = vmatpush.msra.mxu1 %v12027_v30  ;;  %4019 = vmatpush.msrb.mxu0 %v12066_v51  ;;  %v12070_v30 = vld [vmem:[#allocation143_spill] sm:$0xff] }
 0x2de   : > { %3954 = vmatpush.msra.mxu2 %v12067_v42  ;;  %3989 = vmatpush.msra.mxu3 %v12030_v36  ;;  %v12091_v42 = vld [vmem:[#allocation165_spill] sm:$0xff] }
 0x2df   : > { %3956 = vmatmul.f32.vlgmr.msra.gmra.mxu2 %v9824_v58  ;;  %4021 = vmatpush.msrb.mxu0 %v12068_v4 }
 0x2e0   : > { %4160 = vmatpush.msrb.mxu2 %v12069_v11  ;;  %3881 = vmatpush.msra.mxu1 %v12030_v36  ;;  %v12073_v36 = vld [vmem:[#allocation147_spill] sm:$0xff] }
 0x2e1   : > { %3991 = vmatpush.msra.mxu3 %v12033_v59  ;;  %4023 = vmatpush.msrb.mxu0 %v12070_v30  ;;  %v12093_v11 = vld [vmem:[#allocation171_spill] sm:$0xff] }
 0x2e2   : > { %3993 = vmatmul.f32.vlgmr.msra.gmra.mxu3 %v9824_v58  ;;  %4163 = vmatpush.msrb.mxu2 %v12071_v62  ;;  %v3086_v0 = vpop.f32.mrf.mxu3  ;;  %v12075_v58 = vld [vmem:[#allocation148_spill] sm:$0xff] }
 0x2e3   : > { %4213 = vmatpush.msrb.mxu3 %v12064_v45  ;;  %3883 = vmatpush.msra.mxu1 %v12033_v59  ;;  %v12078_v59 = vld [vmem:[#allocation151_spill] sm:$0xff]  ;;  %v12097_v62 = vld [vmem:[#allocation176_spill] sm:$0xff] }
 0x2e4   : > { %v2985_v29 = vpop.f32.mrf.mxu2  ;;  %4025 = vmatpush.msrb.mxu0 %v12072_v20  ;;  %3887 = vmatmul.f32.vlgmr.msra.gmra.mxu1 %v3690_v19  ;;  %v12081_v19 = vld [vmem:[#allocation154_spill] sm:$0xff] }
 0x2e5   : > { %v2986_v56 = vadd.f32 %v2985_v29, %v2945_v63  ;;  %4166 = vmatpush.msrb.mxu2 %v12073_v36  ;;  %4062 = vmatpush.msrb.mxu1 %v12074_v49  ;;  %v12094_v63 = vld [vmem:[#allocation169_spill] sm:$0xff]  ;;  %v12095_v29 = vld [vmem:[#allocation186_spill] sm:$0xff]  ;;  %v12099_v36 = vld [vmem:[#allocation179_spill] sm:$0xff] }
 0x2e6   : > { %4215 = vmatpush.msrb.mxu3 %v12066_v51  ;;  %4027 = vmatpush.msrb.mxu0 %v12075_v58  ;;  %v12100_v49 = vld [vmem:[#allocation180_spill] sm:$0xff] }
 0x2e7   : > { %v3087_v32 = vadd.f32 %v3086_v0, %v2986_v56  ;;  %4169 = vmatpush.msrb.mxu2 %v12076_v48  ;;  %4068 = vmatpush.msrb.mxu1 %v12077_v38  ;;  %v12096_v56 = vld [vmem:[#allocation175_spill] sm:$0xff]  ;;  %v12098_v0 = vld [vmem:[#allocation190_spill] sm:$0xff] }
 0x2e8   : > { %4217 = vmatpush.msrb.mxu3 %v12068_v4  ;;  %4029 = vmatpush.msrb.mxu0 %v12078_v59  ;;  %v12101_v48 = vld [vmem:[#allocation194_spill] sm:$0xff] }
 0x2e9   : > { %4172 = vmatpush.msrb.mxu2 %v12079_v34  ;;  %4074 = vmatpush.msrb.mxu1 %v12080_v17  ;;  %v12102_v34 = vld [vmem:[#allocation182_spill] sm:$0xff]  ;;  %v12103_v17 = vld [vmem:[#allocation184_spill] sm:$0xff] }
 0x2ea   : > { %4219 = vmatpush.msrb.mxu3 %v12070_v30  ;;  %4031 = vmatpush.msrb.mxu0 %v12081_v19 }
 0x2eb   : > { %4175 = vmatpush.msrb.mxu2 %v12082_v47  ;;  %4080 = vmatpush.msrb.mxu1 %v12083_v14  ;;  %v12104_v47 = vld [vmem:[#allocation200_spill] sm:$0xff]  ;;  %v12105_v14 = vld [vmem:[#allocation187_spill] sm:$0xff] }
 0x2ec   : > { %4221 = vmatpush.msrb.mxu3 %v12072_v20  ;;  %4033 = vmatpush.msrb.mxu0 %v12084_v37 }
 0x2ed   : > { %4178 = vmatpush.msrb.mxu2 %v12085_v23  ;;  %4086 = vmatpush.msrb.mxu1 %v12086_v3  ;;  %v12106_v23 = vld [vmem:[#allocation189_spill] sm:$0xff] }
 0x2ee   : > { %4223 = vmatpush.msrb.mxu3 %v12075_v58  ;;  %4035 = vmatpush.msrb.mxu0 %v12087_v13  ;;  %v3140_v38 = vpop.f32.mrf.mxu0 }
 0x2ef   : > { %4181 = vmatpush.msrb.mxu2 %v12088_v55  ;;  %4092 = vmatpush.msrb.mxu1 %v12089_v2  ;;  %v3141_v3 = vadd.f32 %v3140_v38, %v3087_v32  ;;  %v12107_v55 = vld [vmem:[#allocation205_spill] sm:$0xff]  ;;  %v4012_v38 = vld [vmem:[#allocation1] sm:$0xff] }
 0x2f0   : > { %4225 = vmatpush.msrb.mxu3 %v12078_v59  ;;  %4037 = vmatpush.msrb.mxu0 %v12090_v5 }
 0x2f1   : > { %4184 = vmatpush.msrb.mxu2 %v12091_v42  ;;  %4098 = vmatpush.msrb.mxu1 %v12092_v40  ;;  %v12108_v40 = vld [vmem:[#allocation146_spill] sm:$0xff] }
 0x2f2   : > { %4227 = vmatpush.msrb.mxu3 %v12081_v19  ;;  %4039 = vmatpush.msrb.mxu0 %v12093_v11 }
 0x2f3   : > { %4187 = vmatpush.msrb.mxu2 %v12094_v63  ;;  %4104 = vmatpush.msrb.mxu1 %v12095_v29  ;;  %v12109_v63 = vld [vmem:[#allocation192_spill] sm:$0xff] }
 0x2f4   : > { %4229 = vmatpush.msrb.mxu3 %v12084_v37  ;;  %4041 = vmatpush.msrb.mxu0 %v12096_v56 }
 0x2f5   : > { %4190 = vmatpush.msrb.mxu2 %v12097_v62  ;;  %4110 = vmatpush.msrb.mxu1 %v12098_v0  ;;  %v12110_v62 = vld [vmem:[#allocation209_spill] sm:$0xff] }
 0x2f6   : > { %4231 = vmatpush.msrb.mxu3 %v12087_v13  ;;  %4043 = vmatpush.msrb.mxu0 %v12099_v36  ;;  %v12111_v0 = vld [vmem:[#allocation149_spill] sm:$0xff] }
 0x2f7   : > { %4193 = vmatpush.msrb.mxu2 %v12100_v49  ;;  %4116 = vmatpush.msrb.mxu1 %v12101_v48  ;;  %v12112_v49 = vld [vmem:[#allocation197_spill] sm:$0xff] }
 0x2f8   : > { %4233 = vmatpush.msrb.mxu3 %v12090_v5  ;;  %4045 = vmatpush.msrb.mxu0 %v12102_v34 }
 0x2f9   : > { %4196 = vmatpush.msrb.mxu2 %v12103_v17  ;;  %4122 = vmatpush.msrb.mxu1 %v12104_v47  ;;  %v3179_v2 = vpop.f32.mrf.mxu1  ;;  %v9991_v17 = vld [vmem:[#allocation1 + $0x9] sm:$0xff]  ;;  %v12113_v47 = vld [vmem:[#allocation213_spill] sm:$0xff] }
 0x2fa   : > { %4235 = vmatpush.msrb.mxu3 %v12093_v11  ;;  %4047 = vmatpush.msrb.mxu0 %v12105_v14  ;;  %v3248_v42 = vpop.f32.mrf.mxu2  ;;  %v3180_v29 = vadd.f32 %v3179_v2, %v3141_v3  ;;  %4698 = vst [vmem:[#allocation1] ss:$9 sm:$0xff] %v9692_v35  ;;  %v12115_v3 = vld [vmem:[#allocation185_spill] sm:$0xff] }
 0x2fb   : > { %4199 = vmatpush.msrb.mxu2 %v12106_v23  ;;  %4128 = vmatpush.msrb.mxu1 %v12107_v55  ;;  %v12114_v23 = vld [vmem:[#allocation152_spill] sm:$0xff]  ;;  %4700 = vst [vmem:[#allocation1 + $0x1] ss:$9 sm:$0xff] %v9697_v25  ;;  %v12117_v2 = vld [vmem:[#allocation217_spill] sm:$0xff] }
 0x2fc   : > { %4237 = vmatpush.msrb.mxu3 %v12096_v56  ;;  %4254 = vmatpush.msra.mxu0 %v12108_v40  ;;  %v3249_v32 = vadd.f32 %v3248_v42, %v3180_v29  ;;  %4702 = vst [vmem:[#allocation1 + $0x2] ss:$9 sm:$0xff] %v9702_v24  ;;  %v12118_v42 = vld [vmem:[#allocation155_spill] sm:$0xff]  ;;  %v12119_v40 = vld [vmem:[#allocation193_spill] sm:$0xff]  ;;  %v12121_v29 = vld [vmem:[#allocation222_spill] sm:$0xff] }
 0x2fd   : > { %4202 = vmatpush.msrb.mxu2 %v12109_v63  ;;  %4134 = vmatpush.msrb.mxu1 %v12110_v62  ;;  %4704 = vst [vmem:[#allocation1 + $0x3] ss:$9 sm:$0xff] %v9707_v27  ;;  %v12120_v63 = vld [vmem:[#allocation220_spill] sm:$0xff]  ;;  %v12122_v62 = vld [vmem:[#allocation159_spill] sm:$0xff] }
 0x2fe   : > { %4239 = vmatpush.msrb.mxu3 %v12099_v36  ;;  %4258 = vmatpush.msra.mxu0 %v12111_v0  ;;  %4706 = vst [vmem:[#allocation1 + $0x4] ss:$9 sm:$0xff] %v9713_v26  ;;  %v12123_v0 = vld [vmem:[#allocation198_spill] sm:$0xff] }
 0x2ff   : > { %4205 = vmatpush.msrb.mxu2 %v12112_v49  ;;  %4140 = vmatpush.msrb.mxu1 %v12113_v47  ;;  %4708 = vst [vmem:[#allocation1 + $0x5] ss:$9 sm:$0xff] %v9719_v6  ;;  %v12124_v49 = vld [vmem:[#allocation225_spill] sm:$0xff] }
 0x300   : > { %4241 = vmatpush.msrb.mxu3 %v12102_v34  ;;  %4262 = vmatpush.msra.mxu0 %v12114_v23  ;;  %4710 = vst [vmem:[#allocation1 + $0x6] ss:$9 sm:$0xff] %v9725_v43  ;;  %v12127_v47 = vld [vmem:[#allocation229_spill] sm:$0xff]  ;;  %v12128_v23 = vld [vmem:[#allocation168_spill] sm:$0xff] }
 0x301   : > { %4358 = vmatpush.msra.mxu2 %v12115_v3  ;;  %4146 = vmatpush.msrb.mxu1 %v12117_v2  ;;  %4712 = vst [vmem:[#allocation1 + $0x7] ss:$9 sm:$0xff] %v9731_v46  ;;  %v12129_v2 = vld [vmem:[#allocation204_spill] sm:$0xff] }
 0x302   : > { %v3285_v48 = vpop.f32.mrf.mxu3  ;;  %4243 = vmatpush.msrb.mxu3 %v12105_v14  ;;  %4266 = vmatpush.msra.mxu0 %v12118_v42  ;;  %v12130_v42 = vld [vmem:[#allocation233_spill] sm:$0xff] }
 0x303   : > { %v9998_v55 = vadd.f32 %v3285_v48, %v3249_v32  ;;  %4360 = vmatpush.msra.mxu2 %v12119_v40  ;;  %4152 = vmatpush.msrb.mxu1 %v12121_v29  ;;  %v12125_v32 = vld [vmem:[#allocation163_spill] sm:$0xff]  ;;  %v12133_v29 = vld [vmem:[#allocation237_spill] sm:$0xff] }
 0x304   : > { %4403 = vmatpush.msra.mxu3 %v12120_v63  ;;  %4270 = vmatpush.msra.mxu0 %v12122_v62  ;;  %v12126_v48 = vld [vmem:[#allocation199_spill] sm:$0xff]  ;;  %v12131_v63 = vld [vmem:[#allocation172_spill] sm:$0xff]  ;;  %v12134_v62 = vld [vmem:[#allocation173_spill] sm:$0xff] }
 0x305   : > { %12116 = vst [vmem:[#allocation4_spill] sm:$0xff] %v9998_v55  ;;  %4321 = vmatpush.msra.mxu1 %v12064_v45  ;;  %4362 = vmatpush.msra.mxu2 %v12123_v0  ;;  %v10023_v45 = vand.u32 4294901760, %v4012_v38  ;;  %v12153_v55 = vld [vmem:[#allocation240_spill] sm:$0xff] }
 0x306   : > { %4409 = vmatpush.msra.mxu3 %v12124_v49  ;;  %4274 = vmatpush.msra.mxu0 %v12125_v32  ;;  %v12135_v49 = vld [vmem:[#allocation215_spill] sm:$0xff]  ;;  %v12136_v32 = vld [vmem:[#allocation241_spill] sm:$0xff] }
 0x307   : > { %4323 = vmatpush.msra.mxu1 %v12066_v51  ;;  %4364 = vmatpush.msra.mxu2 %v12126_v48  ;;  %v12132_v51 = vld [vmem:[#allocation211_spill] sm:$0xff] }
 0x308   : > { %4415 = vmatpush.msra.mxu3 %v12127_v47  ;;  %4278 = vmatpush.msra.mxu0 %v12128_v23  ;;  %v12137_v47 = vld [vmem:[#allocation177_spill] sm:$0xff]  ;;  %v12138_v23 = vld [vmem:[#allocation219_spill] sm:$0xff] }
 0x309   : > { %4325 = vmatpush.msra.mxu1 %v12068_v4  ;;  %4366 = vmatpush.msra.mxu2 %v12129_v2  ;;  %v4049_v4 = vsub.f32 %v4012_v38, %v10023_v45  ;;  %v12142_v38 = vld [vmem:[#allocation249_spill] sm:$0xff] }
 0x30a   : > { %4421 = vmatpush.msra.mxu3 %v12130_v42  ;;  %4282 = vmatpush.msra.mxu0 %v12131_v63  ;;  %v12140_v42 = vld [vmem:[#allocation183_spill] sm:$0xff] }
 0x30b   : > { %4327 = vmatpush.msra.mxu1 %v12070_v30  ;;  %4368 = vmatpush.msra.mxu2 %v12132_v51  ;;  %v12139_v30 = vld [vmem:[#allocation245_spill] sm:$0xff]  ;;  %v4050_v63 = vand.u32 4294901760, %v4049_v4 }
 0x30c   : > { %4427 = vmatpush.msra.mxu3 %v12133_v29  ;;  %4286 = vmatpush.msra.mxu0 %v12134_v62  ;;  %v12143_v29 = vld [vmem:[#allocation188_spill] sm:$0xff] }
 0x30d   : > { %4329 = vmatpush.msra.mxu1 %v12072_v20  ;;  %4370 = vmatpush.msra.mxu2 %v12135_v49  ;;  %v12141_v20 = vld [vmem:[#allocation224_spill] sm:$0xff] }
 0x30e   : > { %4433 = vmatpush.msra.mxu3 %v12136_v32  ;;  %4290 = vmatpush.msra.mxu0 %v12137_v47  ;;  %v12144_v62 = vld [vmem:[#allocation228_spill] sm:$0xff]  ;;  %v12146_v32 = vld [vmem:[#allocation191_spill] sm:$0xff]  ;;  %v4051_v47 = vsub.f32 %v4049_v4, %v4050_v63 }
 0x30f   : > { %4331 = vmatpush.msra.mxu1 %v12075_v58  ;;  %4372 = vmatpush.msra.mxu2 %v12138_v23  ;;  %v12145_v58 = vld [vmem:[#allocation252_spill] sm:$0xff] }
 0x310   : > { %4439 = vmatpush.msra.mxu3 %v12139_v30  ;;  %4294 = vmatpush.msra.mxu0 %v12140_v42  ;;  %v12147_v30 = vld [vmem:[#allocation232_spill] sm:$0xff] }
 0x311   : > { %4333 = vmatpush.msra.mxu1 %v12078_v59  ;;  %4374 = vmatpush.msra.mxu2 %v12141_v20  ;;  %v10051_v59 = vand.u32 4294901760, %v9991_v17  ;;  %v12148_v42 = vld [vmem:[#allocation256_spill] sm:$0xff] }
 0x312   : > { %4445 = vmatpush.msra.mxu3 %v12142_v38  ;;  %4298 = vmatpush.msra.mxu0 %v12143_v29  ;;  %v12149_v38 = vld [vmem:[#allocation196_spill] sm:$0xff]  ;;  %v12151_v29 = vld [vmem:[#allocation258_spill] sm:$0xff] }
 0x313   : > { %4335 = vmatpush.msra.mxu1 %v12081_v19  ;;  %4376 = vmatpush.msra.mxu2 %v12144_v62  ;;  %v12150_v19 = vld [vmem:[#allocation236_spill] sm:$0xff] }
 0x314   : > { %4451 = vmatpush.msra.mxu3 %v12145_v58  ;;  %4302 = vmatpush.msra.mxu0 %v12146_v32  ;;  %v12152_v58 = vld [vmem:[#allocation201_spill] sm:$0xff]  ;;  %v10063_v32 = vsub.f32 %v9991_v17, %v10051_v59  ;;  %v12159_v17 = vld [vmem:[#allocation248_spill] sm:$0xff] }
 0x315   : > { %4337 = vmatpush.msra.mxu1 %v12084_v37  ;;  %4378 = vmatpush.msra.mxu2 %v12147_v30  ;;  %v4052_v37 = vand.u32 4294901760, %v4051_v47  ;;  %v12158_v47 = vld [vmem:[#allocation195_spill] sm:$0xff] }
 0x316   : > { %4457 = vmatpush.msra.mxu3 %v12148_v42  ;;  %4306 = vmatpush.msra.mxu0 %v12149_v38  ;;  %v12154_v42 = vld [vmem:[#allocation261_spill] sm:$0xff]  ;;  %v12155_v38 = vld [vmem:[#allocation206_spill] sm:$0xff] }
 0x317   : > { %4339 = vmatpush.msra.mxu1 %v12087_v13  ;;  %4380 = vmatpush.msra.mxu2 %v12150_v19  ;;  %v12156_v13 = vld [vmem:[#allocation244_spill] sm:$0xff] }
 0x318   : > { %4463 = vmatpush.msra.mxu3 %v12151_v29  ;;  %4310 = vmatpush.msra.mxu0 %v12152_v58  ;;  %v12157_v29 = vld [vmem:[#allocation262_spill] sm:$0xff]  ;;  %v12160_v58 = vld [vmem:[#allocation264_spill] sm:$0xff] }
 0x319   : > { %4341 = vmatpush.msra.mxu1 %v12090_v5  ;;  %4382 = vmatpush.msra.mxu2 %v12153_v55  ;;  %v4391_v5 = vand.u32 4294901760, %v10063_v32 }
 0x31a   : > { %4469 = vmatpush.msra.mxu3 %v12154_v42  ;;  %4314 = vmatpush.msra.mxu0 %v12155_v38  ;;  %v12161_v42 = vld [vmem:[#allocation202_spill] sm:$0xff]  ;;  %v12163_v38 = vld [vmem:[#allocation265_spill] sm:$0xff] }
 0x31b   : > { %4343 = vmatpush.msra.mxu1 %v12093_v11  ;;  %4384 = vmatpush.msra.mxu2 %v12156_v13  ;;  %v12162_v11 = vld [vmem:[#allocation254_spill] sm:$0xff] }
 0x31c   : > { %4475 = vmatpush.msra.mxu3 %v12157_v29  ;;  %4053 = vmatmul.f32.vlgmr.msrb.gmra.mxu0 %v4052_v37  ;;  %v12164_v37 = vld [vmem:[#allocation207_spill] sm:$0xff] }
 0x31d   : > { %4345 = vmatpush.msra.mxu1 %v12096_v56  ;;  %4501 = vmatpush.msrb.mxu0 %v12158_v47  ;;  %v4392_v56 = vsub.f32 %v10063_v32, %v4391_v5  ;;  %v12165_v29 = vld [vmem:[#allocation203_spill] sm:$0xff]  ;;  %v12168_v47 = vld [vmem:[#allocation210_spill] sm:$0xff] }
 0x31e   : > { %4386 = vmatpush.msra.mxu2 %v12159_v17  ;;  %4481 = vmatpush.msra.mxu3 %v12160_v58 }
 0x31f   : > { %4208 = vmatmul.f32.vlgmr.msrb.gmra.mxu2 %v4049_v4  ;;  %4504 = vmatpush.msrb.mxu0 %v12161_v42  ;;  %v12166_v4 = vld [vmem:[#allocation266_spill] sm:$0xff]  ;;  %v4393_v58 = vand.u32 4294901760, %v4392_v56  ;;  %v12175_v56 = vld [vmem:[#allocation227_spill] sm:$0xff] }
 0x320   : > { %4347 = vmatpush.msra.mxu1 %v12099_v36  ;;  %4388 = vmatpush.msra.mxu2 %v12162_v11  ;;  %v12167_v36 = vld [vmem:[#allocation208_spill] sm:$0xff]  ;;  %v12170_v42 = vld [vmem:[#allocation214_spill] sm:$0xff] }
 0x321   : > { %4487 = vmatpush.msra.mxu3 %v12163_v38  ;;  %4507 = vmatpush.msrb.mxu0 %v12164_v37  ;;  %v12172_v38 = vld [vmem:[#allocation216_spill] sm:$0xff]  ;;  %v12177_v37 = vld [vmem:[#allocation231_spill] sm:$0xff] }
 0x322   : > { %4247 = vmatmul.f32.vlgmr.msrb.gmra.mxu3 %v4050_v63  ;;  %4595 = vmatpush.msrb.mxu2 %v12165_v29  ;;  %v12169_v63 = vld [vmem:[#allocation212_spill] sm:$0xff]  ;;  %v12178_v29 = vld [vmem:[#allocation230_spill] sm:$0xff] }
 0x323   : > { %4349 = vmatpush.msra.mxu1 %v12102_v34  ;;  %4493 = vmatpush.msra.mxu3 %v12166_v4  ;;  %v12171_v34 = vld [vmem:[#allocation218_spill] sm:$0xff] }
 0x324   : > { %4154 = vmatmul.f32.vlgmr.msrb.gmra.mxu1 %v10023_v45  ;;  %4510 = vmatpush.msrb.mxu0 %v12167_v36  ;;  %v12182_v4 = vld [vmem:[#allocation238_spill] sm:$0xff] }
 0x325   : > { %4599 = vmatpush.msrb.mxu2 %v12168_v47  ;;  %4662 = vmatpush.msrb.mxu3 %v12115_v3  ;;  %v12184_v36 = vld [vmem:[#allocation242_spill] sm:$0xff]  ;;  %v12185_v47 = vld [vmem:[#allocation247_spill] sm:$0xff] }
 0x326   : > { %4351 = vmatpush.msra.mxu1 %v12105_v14  ;;  %4513 = vmatpush.msrb.mxu0 %v12169_v63  ;;  %v12173_v14 = vld [vmem:[#allocation223_spill] sm:$0xff] }
 0x327   : > { %4603 = vmatpush.msrb.mxu2 %v12170_v42  ;;  %4664 = vmatpush.msrb.mxu3 %v12119_v40  ;;  %v12188_v42 = vld [vmem:[#allocation250_spill] sm:$0xff] }
 0x328   : > { %4554 = vmatpush.msrb.mxu1 %v12115_v3  ;;  %4394 = vmatmul.f32.vlgmr.msra.gmra.mxu2 %v4393_v58  ;;  %v12174_v3 = vld [vmem:[#allocation221_spill] sm:$0xff]  ;;  %v12186_v58 = vld [vmem:[#allocation246_spill] sm:$0xff] }
 0x329   : > { %4516 = vmatpush.msrb.mxu0 %v12171_v34  ;;  %4607 = vmatpush.msrb.mxu2 %v12172_v38  ;;  %v12189_v38 = vld [vmem:[#allocation255_spill] sm:$0xff] }
 0x32a   : > { %4556 = vmatpush.msrb.mxu1 %v12119_v40  ;;  %4666 = vmatpush.msrb.mxu3 %v12123_v0  ;;  %v12176_v40 = vld [vmem:[#allocation226_spill] sm:$0xff] }
 0x32b   : > { %4316 = vmatmul.f32.vlgmr.msra.gmra.mxu0 %v10023_v45  ;;  %4495 = vmatmul.f32.vlgmr.msra.gmra.mxu3 %v10051_v59 }
 0x32c   : > { %4519 = vmatpush.msrb.mxu0 %v12173_v14  ;;  %4558 = vmatpush.msrb.mxu1 %v12123_v0  ;;  %v12179_v0 = vld [vmem:[#allocation235_spill] sm:$0xff] }
 0x32d   : > { %4611 = vmatpush.msrb.mxu2 %v12174_v3  ;;  %4668 = vmatpush.msrb.mxu3 %v12126_v48  ;;  %v12191_v3 = vld [vmem:[#allocation259_spill] sm:$0xff] }
 0x32e   : > { %4353 = vmatmul.f32.vlgmr.msra.gmra.mxu1 %v10023_v45  ;;  %4522 = vmatpush.msrb.mxu0 %v12175_v56  ;;  %v12180_v45 = vld [vmem:[#allocation234_spill] sm:$0xff]  ;;  %v12192_v56 = vld [vmem:[#allocation257_spill] sm:$0xff] }
 0x32f   : > { %4560 = vmatpush.msrb.mxu1 %v12126_v48  ;;  %4615 = vmatpush.msrb.mxu2 %v12176_v40  ;;  %v12181_v48 = vld [vmem:[#allocation239_spill] sm:$0xff] }
 0x330   : > { %4670 = vmatpush.msrb.mxu3 %v12129_v2  ;;  %4525 = vmatpush.msrb.mxu0 %v12177_v37  ;;  %v12194_v37 = vld [vmem:[#allocation260_spill] sm:$0xff] }
 0x331   : > { %4562 = vmatpush.msrb.mxu1 %v12129_v2  ;;  %4619 = vmatpush.msrb.mxu2 %v12178_v29  ;;  %v12183_v2 = vld [vmem:[#allocation243_spill] sm:$0xff] }
 0x332   : > { %4672 = vmatpush.msrb.mxu3 %v12132_v51  ;;  %4528 = vmatpush.msrb.mxu0 %v12179_v0  ;;  %v3508_v34 = vpop.f32.mrf.mxu2  ;;  %v12195_v0 = vld [vmem:[#allocation268_spill] sm:$0xff] }
 0x333   : > { %4564 = vmatpush.msrb.mxu1 %v12132_v51  ;;  %4623 = vmatpush.msrb.mxu2 %v12180_v45  ;;  %v3353_v51 = vpop.f32.mrf.mxu0  ;;  %v12196_v45 = vld [vmem:[#allocation263_spill] sm:$0xff] }
 0x334   : > { %4674 = vmatpush.msrb.mxu3 %v12135_v49  ;;  %4531 = vmatpush.msrb.mxu0 %v12181_v48 }
 0x335   : > { %4566 = vmatpush.msrb.mxu1 %v12135_v49  ;;  %4627 = vmatpush.msrb.mxu2 %v12182_v4  ;;  %v12187_v49 = vld [vmem:[#allocation251_spill] sm:$0xff]  ;;  %v12198_v4 = vld [vmem:[#allocation269_spill] sm:$0xff] }
 0x336   : > { %4676 = vmatpush.msrb.mxu3 %v12138_v23  ;;  %4534 = vmatpush.msrb.mxu0 %v12183_v2 }
 0x337   : > { %4568 = vmatpush.msrb.mxu1 %v12138_v23  ;;  %4631 = vmatpush.msrb.mxu2 %v12184_v36 }
 0x338   : > { %4678 = vmatpush.msrb.mxu3 %v12141_v20  ;;  %4537 = vmatpush.msrb.mxu0 %v12185_v47  ;;  %v12200_v47 = vld [vmem:[#allocation271_spill] sm:$0xff] }
 0x339   : > { %4570 = vmatpush.msrb.mxu1 %v12141_v20  ;;  %4635 = vmatpush.msrb.mxu2 %v12186_v58  ;;  %v12190_v20 = vld [vmem:[#allocation253_spill] sm:$0xff] }
 0x33a   : > { %4680 = vmatpush.msrb.mxu3 %v12144_v62  ;;  %4540 = vmatpush.msrb.mxu0 %v12187_v49  ;;  %v12201_v49 = vld [vmem:[#allocation274_spill] sm:$0xff] }
 0x33b   : > { %4572 = vmatpush.msrb.mxu1 %v12144_v62  ;;  %v3454_v63 = vpop.f32.mrf.mxu1  ;;  %4639 = vmatpush.msrb.mxu2 %v12188_v42  ;;  %v12203_v42 = vld [vmem:[#allocation285_spill] sm:$0xff] }
 0x33c   : > { %4682 = vmatpush.msrb.mxu3 %v12147_v30  ;;  %v3455_v23 = vadd.f32 %v3454_v63, %v3353_v51  ;;  %4543 = vmatpush.msrb.mxu0 %v12189_v38  ;;  %v12208_v38 = vld [vmem:[#allocation281_spill] sm:$0xff] }
 0x33d   : > { %4574 = vmatpush.msrb.mxu1 %v12147_v30  ;;  %4643 = vmatpush.msrb.mxu2 %v12190_v20  ;;  %v12193_v30 = vld [vmem:[#allocation267_spill] sm:$0xff]  ;;  %v12211_v20 = vld [vmem:[#allocation284_spill] sm:$0xff] }
 0x33e   : > { %4684 = vmatpush.msrb.mxu3 %v12150_v19  ;;  %v3509_v14 = vadd.f32 %v3508_v34, %v3455_v23  ;;  %4546 = vmatpush.msrb.mxu0 %v12191_v3  ;;  %v3547_v62 = vpop.f32.mrf.mxu3  ;;  %v12205_v23 = vld [vmem:[#allocation278_spill] sm:$0xff]  ;;  %v12206_v34 = vld [vmem:[#allocation289_spill] sm:$0xff] }
 0x33f   : > { %4576 = vmatpush.msrb.mxu1 %v12150_v19  ;;  %4647 = vmatpush.msrb.mxu2 %v12192_v56  ;;  %v12213_v3 = vld [vmem:[#allocation286_spill] sm:$0xff] }
 0x340   : > { %4686 = vmatpush.msrb.mxu3 %v12153_v55  ;;  %v3548_v40 = vadd.f32 %v3547_v62, %v3509_v14  ;;  %4549 = vmatmul.f32.vlgmr.msrb.gmra.mxu0 %v10063_v32  ;;  %v12209_v32 = vld [vmem:[#allocation294_spill] sm:$0xff]  ;;  %v12214_v62 = vld [vmem:[#allocation288_spill] sm:$0xff] }
 0x341   : > { %4578 = vmatpush.msrb.mxu1 %v12153_v55  ;;  %4718 = vmatpush.msra.mxu0 %v12193_v30  ;;  %v12197_v55 = vld [vmem:[#allocation270_spill] sm:$0xff] }
 0x342   : > { %4651 = vmatpush.msrb.mxu2 %v12194_v37  ;;  %v3616_v29 = vpop.f32.mrf.mxu0  ;;  %4688 = vmatpush.msrb.mxu3 %v12156_v13  ;;  %v12212_v14 = vld [vmem:[#allocation298_spill] sm:$0xff]  ;;  %v12217_v37 = vld [vmem:[#allocation292_spill] sm:$0xff] }
 0x343   : > { %4580 = vmatpush.msrb.mxu1 %v12156_v13  ;;  %v3617_v19 = vadd.f32 %v3616_v29, %v3548_v40  ;;  %4720 = vmatpush.msra.mxu0 %v12195_v0  ;;  %v12199_v13 = vld [vmem:[#allocation272_spill] sm:$0xff]  ;;  %v12215_v56 = vld [vmem:[#allocation302_spill] sm:$0xff] }
 0x344   : > { %4655 = vmatpush.msrb.mxu2 %v12196_v45  ;;  %4690 = vmatpush.msrb.mxu3 %v12159_v17  ;;  %v12216_v40 = vld [vmem:[#allocation290_spill] sm:$0xff]  ;;  %v12220_v45 = vld [vmem:[#allocation293_spill] sm:$0xff] }
 0x345   : > { %4657 = vmatmul.f32.vlgmr.msrb.gmra.mxu2 %v10051_v59  ;;  %v3653_v48 = vpop.f32.mrf.mxu1  ;;  %4722 = vmatpush.msra.mxu0 %v12197_v55  ;;  %v3694_v36 = vpop.f32.mrf.mxu2  ;;  %v12218_v29 = vld [vmem:[#allocation306_spill] sm:$0xff] }
 0x346   : > { %4861 = vmatpush.msra.mxu2 %v12198_v4  ;;  %v3654_v2 = vadd.f32 %v3653_v48, %v3617_v19  ;;  %4582 = vmatpush.msrb.mxu1 %v12159_v17  ;;  %v12202_v17 = vld [vmem:[#allocation275_spill] sm:$0xff]  ;;  %v12221_v48 = vld [vmem:[#allocation309_spill] sm:$0xff] }
 0x347   : > { %4692 = vmatpush.msrb.mxu3 %v12162_v11  ;;  %4724 = vmatpush.msra.mxu0 %v12199_v13  ;;  %v12219_v19 = vld [vmem:[#allocation295_spill] sm:$0xff] }
 0x348   : > { %4694 = vmatmul.f32.vlgmr.msrb.gmra.mxu3 %v10051_v59  ;;  %v3695_v51 = vadd.f32 %v3694_v36, %v3654_v2  ;;  %4864 = vmatpush.msra.mxu2 %v12200_v47  ;;  %v3795_v58 = vpop.f32.mrf.mxu3  ;;  %v12204_v59 = vld [vmem:[#allocation277_spill] sm:$0xff]  ;;  %v12222_v4 = vld [vmem:[#allocation299_spill] sm:$0xff]  ;;  %v12224_v36 = vld [vmem:[#allocation314_spill] sm:$0xff] }
 0x349   : > { %4914 = vmatpush.msra.mxu3 %v12193_v30  ;;  %4584 = vmatpush.msrb.mxu1 %v12162_v11  ;;  %v12207_v11 = vld [vmem:[#allocation279_spill] sm:$0xff]  ;;  %v12223_v2 = vld [vmem:[#allocation297_spill] sm:$0xff]  ;;  %v12226_v47 = vld [vmem:[#allocation304_spill] sm:$0xff] }
 0x34a   : > { %4726 = vmatpush.msra.mxu0 %v12201_v49  ;;  %v3796_v63 = vadd.f32 %v3795_v58, %v3695_v51  ;;  %4588 = vmatmul.f32.vlgmr.msrb.gmra.mxu1 %v4391_v5  ;;  %v12210_v5 = vld [vmem:[#allocation282_spill] sm:$0xff]  ;;  %v12225_v51 = vld [vmem:[#allocation303_spill] sm:$0xff] }
 0x34b   : > { %4867 = vmatpush.msra.mxu2 %v12202_v17  ;;  %4763 = vmatpush.msra.mxu1 %v12203_v42  ;;  %v12227_v58 = vld [vmem:[#allocation318_spill] sm:$0xff]  ;;  %v12228_v17 = vld [vmem:[#allocation307_spill] sm:$0xff]  ;;  %v12229_v42 = vld [vmem:[#allocation308_spill] sm:$0xff] }
 0x34c   : > { %4916 = vmatpush.msra.mxu3 %v12195_v0  ;;  %4728 = vmatpush.msra.mxu0 %v12204_v59 }
 0x34d   : > { %4870 = vmatpush.msra.mxu2 %v12205_v23  ;;  %4769 = vmatpush.msra.mxu1 %v12206_v34  ;;  %v12230_v23 = vld [vmem:[#allocation322_spill] sm:$0xff] }
 0x34e   : > { %4918 = vmatpush.msra.mxu3 %v12197_v55  ;;  %4730 = vmatpush.msra.mxu0 %v12207_v11 }
 0x34f   : > { %4873 = vmatpush.msra.mxu2 %v12208_v38  ;;  %4775 = vmatpush.msra.mxu1 %v12209_v32  ;;  %v12231_v38 = vld [vmem:[#allocation310_spill] sm:$0xff]  ;;  %v12232_v32 = vld [vmem:[#allocation312_spill] sm:$0xff] }
 0x350   : > { %4920 = vmatpush.msra.mxu3 %v12199_v13  ;;  %4732 = vmatpush.msra.mxu0 %v12210_v5 }
 0x351   : > { %4876 = vmatpush.msra.mxu2 %v12211_v20  ;;  %4781 = vmatpush.msra.mxu1 %v12212_v14  ;;  %v12233_v20 = vld [vmem:[#allocation328_spill] sm:$0xff]  ;;  %v12234_v14 = vld [vmem:[#allocation315_spill] sm:$0xff] }
 0x352   : > { %4922 = vmatpush.msra.mxu3 %v12201_v49  ;;  %4734 = vmatpush.msra.mxu0 %v12213_v3 }
 0x353   : > { %4879 = vmatpush.msra.mxu2 %v12214_v62  ;;  %4787 = vmatpush.msra.mxu1 %v12215_v56  ;;  %v12235_v62 = vld [vmem:[#allocation317_spill] sm:$0xff] }
 0x354   : > { %4924 = vmatpush.msra.mxu3 %v12204_v59  ;;  %4736 = vmatpush.msra.mxu0 %v12216_v40 }
 0x355   : > { %4882 = vmatpush.msra.mxu2 %v12217_v37  ;;  %4793 = vmatpush.msra.mxu1 %v12218_v29  ;;  %v12236_v37 = vld [vmem:[#allocation333_spill] sm:$0xff] }
 0x356   : > { %4926 = vmatpush.msra.mxu3 %v12207_v11  ;;  %4738 = vmatpush.msra.mxu0 %v12219_v19 }
 0x357   : > { %4885 = vmatpush.msra.mxu2 %v12220_v45  ;;  %4799 = vmatpush.msra.mxu1 %v12221_v48  ;;  %v3849_v34 = vpop.f32.mrf.mxu0  ;;  %v12237_v48 = vld [vmem:[#allocation273_spill] sm:$0xff] }
 0x358   : > { %4928 = vmatpush.msra.mxu3 %v12210_v5  ;;  %4740 = vmatpush.msra.mxu0 %v12222_v4  ;;  %v3850_v56 = vadd.f32 %v3849_v34, %v3796_v63  ;;  %v4713_v34 = vld [vmem:[#allocation1] sm:$0xff] }
 0x359   : > { %4888 = vmatpush.msra.mxu2 %v12223_v2  ;;  %4805 = vmatpush.msra.mxu1 %v12224_v36  ;;  %v12238_v2 = vld [vmem:[#allocation320_spill] sm:$0xff] }
 0x35a   : > { %4930 = vmatpush.msra.mxu3 %v12213_v3  ;;  %4742 = vmatpush.msra.mxu0 %v12225_v51 }
 0x35b   : > { %4891 = vmatpush.msra.mxu2 %v12226_v47  ;;  %4811 = vmatpush.msra.mxu1 %v12227_v58  ;;  %v12239_v47 = vld [vmem:[#allocation337_spill] sm:$0xff]  ;;  %v12240_v58 = vld [vmem:[#allocation276_spill] sm:$0xff] }
 0x35c   : > { %4932 = vmatpush.msra.mxu3 %v12216_v40  ;;  %4744 = vmatpush.msra.mxu0 %v12228_v17 }
 0x35d   : > { %4894 = vmatpush.msra.mxu2 %v12229_v42  ;;  %4817 = vmatpush.msra.mxu1 %v12230_v23  ;;  %v12241_v42 = vld [vmem:[#allocation325_spill] sm:$0xff] }
 0x35e   : > { %4934 = vmatpush.msra.mxu3 %v12219_v19  ;;  %4746 = vmatpush.msra.mxu0 %v12231_v38 }
 0x35f   : > { %4897 = vmatpush.msra.mxu2 %v12232_v32  ;;  %4823 = vmatpush.msra.mxu1 %v12233_v20  ;;  %v10218_v32 = vld [vmem:[#allocation1 + $0x9] sm:$0xff]  ;;  %v12242_v20 = vld [vmem:[#allocation341_spill] sm:$0xff] }
 0x360   : > { %4936 = vmatpush.msra.mxu3 %v12222_v4  ;;  %4748 = vmatpush.msra.mxu0 %v12234_v14  ;;  %5399 = vst [vmem:[#allocation1] ss:$9 sm:$0xff] %v9692_v35  ;;  %v12248_v35 = vld [vmem:[#allocation348_spill] sm:$0xff] }
 0x361   : > { %4900 = vmatpush.msra.mxu2 %v12235_v62  ;;  %4829 = vmatpush.msra.mxu1 %v12236_v37  ;;  %v3888_v29 = vpop.f32.mrf.mxu1  ;;  %v12243_v62 = vld [vmem:[#allocation280_spill] sm:$0xff]  ;;  %5401 = vst [vmem:[#allocation1 + $0x1] ss:$9 sm:$0xff] %v9697_v25  ;;  %v12251_v25 = vld [vmem:[#allocation326_spill] sm:$0xff] }
 0x362   : > { %4938 = vmatpush.msra.mxu3 %v12225_v51  ;;  %v3957_v45 = vpop.f32.mrf.mxu2  ;;  %4955 = vmatpush.msrb.mxu0 %v12237_v48  ;;  %v3889_v36 = vadd.f32 %v3888_v29, %v3850_v56  ;;  %v12244_v56 = vld [vmem:[#allocation313_spill] sm:$0xff]  ;;  %5403 = vst [vmem:[#allocation1 + $0x2] ss:$9 sm:$0xff] %v9702_v24 }
 0x363   : > { %4903 = vmatpush.msra.mxu2 %v12238_v2  ;;  %4835 = vmatpush.msra.mxu1 %v12239_v47  ;;  %v12245_v29 = vld [vmem:[#allocation345_spill] sm:$0xff]  ;;  %5405 = vst [vmem:[#allocation1 + $0x3] ss:$9 sm:$0xff] %v9707_v27  ;;  %v12249_v2 = vld [vmem:[#allocation350_spill] sm:$0xff]  ;;  %v12253_v47 = vld [vmem:[#allocation291_spill] sm:$0xff] }
 0x364   : > { %4940 = vmatpush.msra.mxu3 %v12228_v17  ;;  %4959 = vmatpush.msrb.mxu0 %v12240_v58  ;;  %v3958_v63 = vadd.f32 %v3957_v45, %v3889_v36  ;;  %v12246_v45 = vld [vmem:[#allocation283_spill] sm:$0xff]  ;;  %v12247_v48 = vld [vmem:[#allocation321_spill] sm:$0xff]  ;;  %5407 = vst [vmem:[#allocation1 + $0x4] ss:$9 sm:$0xff] %v9713_v26  ;;  %v12255_v26 = vld [vmem:[#allocation62_spill] sm:$0xff] }
 0x365   : > { %4906 = vmatpush.msra.mxu2 %v12241_v42  ;;  %v3994_v23 = vpop.f32.mrf.mxu3  ;;  %4841 = vmatpush.msra.mxu1 %v12242_v20  ;;  %v12250_v36 = vld [vmem:[#allocation287_spill] sm:$0xff]  ;;  %5409 = vst [vmem:[#allocation1 + $0x5] ss:$9 sm:$0xff] %v9719_v6  ;;  %v12252_v24 = vld [vmem:[#allocation57_spill] sm:$0xff]  ;;  %v12256_v58 = vld [vmem:[#allocation296_spill] sm:$0xff]  ;;  %v10250_v6 = vand.u32 4294901760, %v4713_v34 }
 0x366   : > { %4942 = vmatpush.msra.mxu3 %v12231_v38  ;;  %4963 = vmatpush.msrb.mxu0 %v12243_v62  ;;  %v10225_v37 = vadd.f32 %v3994_v23, %v3958_v63  ;;  %5411 = vst [vmem:[#allocation1 + $0x6] ss:$9 sm:$0xff] %v9725_v43  ;;  %v12254_v27 = vld [vmem:[#allocation327_spill] sm:$0xff]  ;;  %v12258_v42 = vld [vmem:[#allocation70_spill] sm:$0xff]  ;;  %v12259_v43 = vld [vmem:[#allocation300_spill] sm:$0xff] }
 0x367   : > { %5059 = vmatpush.msrb.mxu2 %v12244_v56  ;;  %4847 = vmatpush.msra.mxu1 %v12245_v29  ;;  %5413 = vst [vmem:[#allocation1 + $0x7] ss:$9 sm:$0xff] %v9731_v46  ;;  %v12261_v46 = vld [vmem:[#allocation74_spill] sm:$0xff]  ;;  %v12262_v63 = vld [vmem:[#allocation301_spill] sm:$0xff]  ;;  %v12263_v23 = vld [vmem:[#allocation343_spill] sm:$0xff] }
 0x368   : > { %4944 = vmatpush.msra.mxu3 %v12234_v14  ;;  %4967 = vmatpush.msrb.mxu0 %v12246_v45  ;;  %v12264_v20 = vld [vmem:[#allocation362_spill] sm:$0xff]  ;;  %v12265_v62 = vld [vmem:[#allocation305_spill] sm:$0xff]  ;;  %v12266_v29 = vld [vmem:[#allocation347_spill] sm:$0xff] }
 0x369   : > { %5061 = vmatpush.msrb.mxu2 %v12247_v48  ;;  %4853 = vmatpush.msra.mxu1 %v12249_v2  ;;  %v12268_v45 = vld [vmem:[#allocation311_spill] sm:$0xff]  ;;  %v12271_v2 = vld [vmem:[#allocation316_spill] sm:$0xff] }
 0x36a   : > { %5104 = vmatpush.msrb.mxu3 %v12248_v35  ;;  %4971 = vmatpush.msrb.mxu0 %v12250_v36  ;;  %v12272_v36 = vld [vmem:[#allocation355_spill] sm:$0xff] }
 0x36b   : > { %5022 = vmatpush.msrb.mxu1 %v12193_v30  ;;  %5063 = vmatpush.msrb.mxu2 %v12251_v25  ;;  %v12257_v30 = vld [vmem:[#allocation332_spill] sm:$0xff] }
 0x36c   : > { %5110 = vmatpush.msrb.mxu3 %v12252_v24  ;;  %4975 = vmatpush.msrb.mxu0 %v12253_v47  ;;  %v12274_v24 = vld [vmem:[#allocation319_spill] sm:$0xff] }
 0x36d   : > { %5024 = vmatpush.msrb.mxu1 %v12195_v0  ;;  %5065 = vmatpush.msrb.mxu2 %v12254_v27  ;;  %v12260_v0 = vld [vmem:[#allocation339_spill] sm:$0xff] }
 0x36e   : > { %5116 = vmatpush.msrb.mxu3 %v12255_v26  ;;  %4979 = vmatpush.msrb.mxu0 %v12256_v58  ;;  %v12275_v26 = vld [vmem:[#allocation357_spill] sm:$0xff] }
 0x36f   : > { %5026 = vmatpush.msrb.mxu1 %v12197_v55  ;;  %5067 = vmatpush.msrb.mxu2 %v12257_v30  ;;  %v4750_v55 = vsub.f32 %v4713_v34, %v10250_v6  ;;  %v12270_v34 = vld [vmem:[#allocation370_spill] sm:$0xff]  ;;  %v12276_v58 = vld [vmem:[#allocation377_spill] sm:$0xff] }
 0x370   : > { %5122 = vmatpush.msrb.mxu3 %v12258_v42  ;;  %4983 = vmatpush.msrb.mxu0 %v12259_v43  ;;  %v12277_v42 = vld [vmem:[#allocation324_spill] sm:$0xff]  ;;  %v12279_v43 = vld [vmem:[#allocation379_spill] sm:$0xff] }
 0x371   : > { %5028 = vmatpush.msrb.mxu1 %v12199_v13  ;;  %5069 = vmatpush.msrb.mxu2 %v12260_v0  ;;  %v12267_v13 = vld [vmem:[#allocation366_spill] sm:$0xff]  ;;  %v4751_v35 = vand.u32 4294901760, %v4750_v55 }
 0x372   : > { %5128 = vmatpush.msrb.mxu3 %v12261_v46  ;;  %4987 = vmatpush.msrb.mxu0 %v12262_v63  ;;  %v12280_v46 = vld [vmem:[#allocation329_spill] sm:$0xff] }
 0x373   : > { %5030 = vmatpush.msrb.mxu1 %v12201_v49  ;;  %5071 = vmatpush.msrb.mxu2 %v12263_v23  ;;  %v12269_v49 = vld [vmem:[#allocation352_spill] sm:$0xff]  ;;  %v4752_v47 = vsub.f32 %v4750_v55, %v4751_v35 }
 0x374   : > { %5134 = vmatpush.msrb.mxu3 %v12264_v20  ;;  %4991 = vmatpush.msrb.mxu0 %v12265_v62  ;;  %v12281_v20 = vld [vmem:[#allocation361_spill] sm:$0xff]  ;;  %v12282_v62 = vld [vmem:[#allocation382_spill] sm:$0xff] }
 0x375   : > { %5032 = vmatpush.msrb.mxu1 %v12204_v59  ;;  %5073 = vmatpush.msrb.mxu2 %v12266_v29  ;;  %v12273_v59 = vld [vmem:[#allocation373_spill] sm:$0xff] }
 0x376   : > { %5140 = vmatpush.msrb.mxu3 %v12267_v13  ;;  %4995 = vmatpush.msrb.mxu0 %v12268_v45  ;;  %v12283_v13 = vld [vmem:[#allocation334_spill] sm:$0xff]  ;;  %v12285_v45 = vld [vmem:[#allocation383_spill] sm:$0xff] }
 0x377   : > { %5034 = vmatpush.msrb.mxu1 %v12207_v11  ;;  %5075 = vmatpush.msrb.mxu2 %v12269_v49  ;;  %v10278_v11 = vand.u32 4294901760, %v10218_v32 }
 0x378   : > { %5146 = vmatpush.msrb.mxu3 %v12270_v34  ;;  %4999 = vmatpush.msrb.mxu0 %v12271_v2  ;;  %v12286_v34 = vld [vmem:[#allocation323_spill] sm:$0xff]  ;;  %v12288_v2 = vld [vmem:[#allocation385_spill] sm:$0xff] }
 0x379   : > { %5036 = vmatpush.msrb.mxu1 %v12210_v5  ;;  %5077 = vmatpush.msrb.mxu2 %v12272_v36  ;;  %v12278_v5 = vld [vmem:[#allocation359_spill] sm:$0xff]  ;;  %v10290_v63 = vsub.f32 %v10218_v32, %v10278_v11  ;;  %v12287_v32 = vld [vmem:[#allocation369_spill] sm:$0xff] }
 0x37a   : > { %5152 = vmatpush.msrb.mxu3 %v12273_v59  ;;  %5003 = vmatpush.msrb.mxu0 %v12274_v24  ;;  %v12289_v59 = vld [vmem:[#allocation330_spill] sm:$0xff] }
 0x37b   : > { %5038 = vmatpush.msrb.mxu1 %v12213_v3  ;;  %5079 = vmatpush.msrb.mxu2 %v12275_v26  ;;  %v4753_v3 = vand.u32 4294901760, %v4752_v47  ;;  %v12291_v24 = vld [vmem:[#allocation386_spill] sm:$0xff]  ;;  %v12292_v47 = vld [vmem:[#allocation335_spill] sm:$0xff] }
 0x37c   : > { %5158 = vmatpush.msrb.mxu3 %v12276_v58  ;;  %5007 = vmatpush.msrb.mxu0 %v12277_v42  ;;  %v12293_v58 = vld [vmem:[#allocation331_spill] sm:$0xff]  ;;  %v12296_v42 = vld [vmem:[#allocation338_spill] sm:$0xff] }
 0x37d   : > { %5040 = vmatpush.msrb.mxu1 %v12216_v40  ;;  %5081 = vmatpush.msrb.mxu2 %v12278_v5  ;;  %v12284_v40 = vld [vmem:[#allocation365_spill] sm:$0xff] }
 0x37e   : > { %5164 = vmatpush.msrb.mxu3 %v12279_v43  ;;  %5011 = vmatpush.msrb.mxu0 %v12280_v46  ;;  %v12298_v46 = vld [vmem:[#allocation342_spill] sm:$0xff] }
 0x37f   : > { %5042 = vmatpush.msrb.mxu1 %v12219_v19  ;;  %5083 = vmatpush.msrb.mxu2 %v12281_v20  ;;  %v5092_v19 = vand.u32 4294901760, %v10290_v63 }
 0x380   : > { %5170 = vmatpush.msrb.mxu3 %v12282_v62  ;;  %5015 = vmatpush.msrb.mxu0 %v12283_v13  ;;  %v12303_v62 = vld [vmem:[#allocation354_spill] sm:$0xff]  ;;  %v12305_v13 = vld [vmem:[#allocation356_spill] sm:$0xff] }
 0x381   : > { %5044 = vmatpush.msrb.mxu1 %v12222_v4  ;;  %5085 = vmatpush.msrb.mxu2 %v12284_v40  ;;  %v12290_v4 = vld [vmem:[#allocation375_spill] sm:$0xff] }
 0x382   : > { %5176 = vmatpush.msrb.mxu3 %v12285_v45  ;;  %4754 = vmatmul.f32.vlgmr.msra.gmra.mxu0 %v4753_v3  ;;  %v12300_v3 = vld [vmem:[#allocation344_spill] sm:$0xff]  ;;  %v12306_v45 = vld [vmem:[#allocation66_spill] sm:$0xff] }
 0x383   : > { %5046 = vmatpush.msrb.mxu1 %v12225_v51  ;;  %5202 = vmatpush.msra.mxu0 %v12286_v34  ;;  %v5093_v51 = vsub.f32 %v10290_v63, %v5092_v19  ;;  %v12310_v34 = vld [vmem:[#allocation77_spill] sm:$0xff] }
 0x384   : > { %5087 = vmatpush.msrb.mxu2 %v12287_v32  ;;  %5182 = vmatpush.msrb.mxu3 %v12288_v2  ;;  %v12312_v2 = vld [vmem:[#allocation363_spill] sm:$0xff] }
 0x385   : > { %4909 = vmatmul.f32.vlgmr.msra.gmra.mxu2 %v4750_v55  ;;  %5205 = vmatpush.msra.mxu0 %v12289_v59  ;;  %v12294_v55 = vld [vmem:[#allocation387_spill] sm:$0xff]  ;;  %v5094_v43 = vand.u32 4294901760, %v5093_v51  ;;  %v12318_v51 = vld [vmem:[#allocation374_spill] sm:$0xff] }
 0x386   : > { %5048 = vmatpush.msrb.mxu1 %v12228_v17  ;;  %5089 = vmatpush.msrb.mxu2 %v12290_v4  ;;  %v12295_v17 = vld [vmem:[#allocation336_spill] sm:$0xff]  ;;  %v12314_v59 = vld [vmem:[#allocation367_spill] sm:$0xff] }
 0x387   : > { %5188 = vmatpush.msrb.mxu3 %v12291_v24  ;;  %5208 = vmatpush.msra.mxu0 %v12292_v47  ;;  %v12316_v24 = vld [vmem:[#allocation371_spill] sm:$0xff]  ;;  %v12320_v47 = vld [vmem:[#allocation378_spill] sm:$0xff] }
 0x388   : > { %4948 = vmatmul.f32.vlgmr.msra.gmra.mxu3 %v4751_v35  ;;  %5296 = vmatpush.msra.mxu2 %v12293_v58  ;;  %v12297_v35 = vld [vmem:[#allocation340_spill] sm:$0xff]  ;;  %v12322_v58 = vld [vmem:[#allocation381_spill] sm:$0xff] }
 0x389   : > { %5050 = vmatpush.msrb.mxu1 %v12231_v38  ;;  %5194 = vmatpush.msrb.mxu3 %v12294_v55  ;;  %v12299_v38 = vld [vmem:[#allocation346_spill] sm:$0xff]  ;;  %v12324_v55 = vld [vmem:[#allocation384_spill] sm:$0xff] }
 0x38a   : > { %4855 = vmatmul.f32.vlgmr.msra.gmra.mxu1 %v10250_v6  ;;  %5211 = vmatpush.msra.mxu0 %v12295_v17  ;;  %v12326_v17 = vld [vmem:[#allocation390_spill] sm:$0xff] }
 0x38b   : > { %5300 = vmatpush.msra.mxu2 %v12296_v42  ;;  %5363 = vmatpush.msra.mxu3 %v12244_v56  ;;  %v12329_v42 = vld [vmem:[#allocation395_spill] sm:$0xff] }
 0x38c   : > { %5052 = vmatpush.msrb.mxu1 %v12234_v14  ;;  %5214 = vmatpush.msra.mxu0 %v12297_v35  ;;  %v12301_v14 = vld [vmem:[#allocation351_spill] sm:$0xff] }
 0x38d   : > { %5304 = vmatpush.msra.mxu2 %v12298_v46  ;;  %5365 = vmatpush.msra.mxu3 %v12247_v48  ;;  %v12333_v35 = vld [vmem:[#allocation399_spill] sm:$0xff]  ;;  %v12334_v46 = vld [vmem:[#allocation409_spill] sm:$0xff] }
 0x38e   : > { %5255 = vmatpush.msra.mxu1 %v12244_v56  ;;  %5095 = vmatmul.f32.vlgmr.msrb.gmra.mxu2 %v5094_v43  ;;  %v12302_v56 = vld [vmem:[#allocation349_spill] sm:$0xff]  ;;  %v12330_v43 = vld [vmem:[#allocation396_spill] sm:$0xff] }
 0x38f   : > { %5217 = vmatpush.msra.mxu0 %v12299_v38  ;;  %5308 = vmatpush.msra.mxu2 %v12300_v3  ;;  %v12336_v38 = vld [vmem:[#allocation402_spill] sm:$0xff]  ;;  %v12339_v3 = vld [vmem:[#allocation405_spill] sm:$0xff] }
 0x390   : > { %5257 = vmatpush.msra.mxu1 %v12247_v48  ;;  %5367 = vmatpush.msra.mxu3 %v12251_v25  ;;  %v12304_v48 = vld [vmem:[#allocation353_spill] sm:$0xff] }
 0x391   : > { %5017 = vmatmul.f32.vlgmr.msrb.gmra.mxu0 %v10250_v6  ;;  %5196 = vmatmul.f32.vlgmr.msrb.gmra.mxu3 %v10278_v11 }
 0x392   : > { %5220 = vmatpush.msra.mxu0 %v12301_v14  ;;  %5259 = vmatpush.msra.mxu1 %v12251_v25  ;;  %v12307_v25 = vld [vmem:[#allocation358_spill] sm:$0xff]  ;;  %v12340_v14 = vld [vmem:[#allocation416_spill] sm:$0xff] }
 0x393   : > { %5312 = vmatpush.msra.mxu2 %v12302_v56  ;;  %5369 = vmatpush.msra.mxu3 %v12254_v27  ;;  %v12341_v56 = vld [vmem:[#allocation408_spill] sm:$0xff] }
 0x394   : > { %5054 = vmatmul.f32.vlgmr.msrb.gmra.mxu1 %v10250_v6  ;;  %5223 = vmatpush.msra.mxu0 %v12303_v62  ;;  %v12308_v6 = vld [vmem:[#allocation72_spill] sm:$0xff]  ;;  %v12342_v62 = vld [vmem:[#allocation419_spill] sm:$0xff] }
 0x395   : > { %5261 = vmatpush.msra.mxu1 %v12254_v27  ;;  %5316 = vmatpush.msra.mxu2 %v12304_v48  ;;  %v12309_v27 = vld [vmem:[#allocation360_spill] sm:$0xff]  ;;  %v12343_v48 = vld [vmem:[#allocation411_spill] sm:$0xff] }
 0x396   : > { %5371 = vmatpush.msra.mxu3 %v12257_v30  ;;  %5226 = vmatpush.msra.mxu0 %v12305_v13  ;;  %v12344_v13 = vld [vmem:[#allocation422_spill] sm:$0xff] }
 0x397   : > { %5263 = vmatpush.msra.mxu1 %v12257_v30  ;;  %5320 = vmatpush.msra.mxu2 %v12306_v45  ;;  %v12311_v30 = vld [vmem:[#allocation364_spill] sm:$0xff] }
 0x398   : > { %5373 = vmatpush.msra.mxu3 %v12260_v0  ;;  %5229 = vmatpush.msra.mxu0 %v12307_v25  ;;  %v12345_v45 = vld [vmem:[#allocation412_spill] sm:$0xff]  ;;  %v12346_v25 = vld [vmem:[#allocation425_spill] sm:$0xff] }
 0x399   : > { %5265 = vmatpush.msra.mxu1 %v12260_v0  ;;  %5324 = vmatpush.msra.mxu2 %v12308_v6  ;;  %v12313_v0 = vld [vmem:[#allocation368_spill] sm:$0xff]  ;;  %v12347_v6 = vld [vmem:[#allocation415_spill] sm:$0xff] }
 0x39a   : > { %5375 = vmatpush.msra.mxu3 %v12263_v23  ;;  %5232 = vmatpush.msra.mxu0 %v12309_v27  ;;  %v12348_v27 = vld [vmem:[#allocation428_spill] sm:$0xff] }
 0x39b   : > { %5267 = vmatpush.msra.mxu1 %v12263_v23  ;;  %5328 = vmatpush.msra.mxu2 %v12310_v34  ;;  %v12315_v23 = vld [vmem:[#allocation372_spill] sm:$0xff] }
 0x39c   : > { %5377 = vmatpush.msra.mxu3 %v12266_v29  ;;  %5235 = vmatpush.msra.mxu0 %v12311_v30  ;;  %v12349_v34 = vld [vmem:[#allocation420_spill] sm:$0xff]  ;;  %v12350_v30 = vld [vmem:[#allocation431_spill] sm:$0xff] }
 0x39d   : > { %5269 = vmatpush.msra.mxu1 %v12266_v29  ;;  %5332 = vmatpush.msra.mxu2 %v12312_v2  ;;  %v12317_v29 = vld [vmem:[#allocation376_spill] sm:$0xff] }
 0x39e   : > { %5379 = vmatpush.msra.mxu3 %v12269_v49  ;;  %5238 = vmatpush.msra.mxu0 %v12313_v0  ;;  %v12351_v2 = vld [vmem:[#allocation424_spill] sm:$0xff]  ;;  %v12352_v0 = vld [vmem:[#allocation434_spill] sm:$0xff] }
 0x39f   : > { %5271 = vmatpush.msra.mxu1 %v12269_v49  ;;  %5336 = vmatpush.msra.mxu2 %v12314_v59  ;;  %v12319_v49 = vld [vmem:[#allocation380_spill] sm:$0xff]  ;;  %v12353_v59 = vld [vmem:[#allocation427_spill] sm:$0xff] }
 0x3a0   : > { %5381 = vmatpush.msra.mxu3 %v12272_v36  ;;  %5241 = vmatpush.msra.mxu0 %v12315_v23  ;;  %v12354_v23 = vld [vmem:[#allocation438_spill] sm:$0xff] }
 0x3a1   : > { %5273 = vmatpush.msra.mxu1 %v12272_v36  ;;  %5340 = vmatpush.msra.mxu2 %v12316_v24  ;;  %v12321_v36 = vld [vmem:[#allocation388_spill] sm:$0xff]  ;;  %v12355_v24 = vld [vmem:[#allocation430_spill] sm:$0xff] }
 0x3a2   : > { %5383 = vmatpush.msra.mxu3 %v12275_v26  ;;  %5244 = vmatpush.msra.mxu0 %v12317_v29  ;;  %v12356_v29 = vld [vmem:[#allocation441_spill] sm:$0xff] }
 0x3a3   : > { %5275 = vmatpush.msra.mxu1 %v12275_v26  ;;  %5344 = vmatpush.msra.mxu2 %v12318_v51  ;;  %v12323_v26 = vld [vmem:[#allocation389_spill] sm:$0xff]  ;;  %v12357_v51 = vld [vmem:[#allocation394_spill] sm:$0xff] }
 0x3a4   : > { %5385 = vmatpush.msra.mxu3 %v12278_v5  ;;  %5247 = vmatpush.msra.mxu0 %v12319_v49  ;;  %v12358_v49 = vld [vmem:[#allocation433_spill] sm:$0xff] }
 0x3a5   : > { %5277 = vmatpush.msra.mxu1 %v12278_v5  ;;  %5348 = vmatpush.msra.mxu2 %v12320_v47  ;;  %v12325_v5 = vld [vmem:[#allocation391_spill] sm:$0xff]  ;;  %v12359_v47 = vld [vmem:[#allocation444_spill] sm:$0xff] }
 0x3a6   : > { %5387 = vmatpush.msra.mxu3 %v12281_v20  ;;  %5250 = vmatmul.f32.vlgmr.msra.gmra.mxu0 %v10290_v63  ;;  %v12337_v63 = vld [vmem:[#allocation413_spill] sm:$0xff] }
 0x3a7   : > { %5279 = vmatpush.msra.mxu1 %v12281_v20  ;;  %5419 = vmatpush.msrb.mxu0 %v12321_v36  ;;  %v12327_v20 = vld [vmem:[#allocation393_spill] sm:$0xff] }
 0x3a8   : > { %5352 = vmatpush.msra.mxu2 %v12322_v58  ;;  %5389 = vmatpush.msra.mxu3 %v12284_v40  ;;  %v12360_v58 = vld [vmem:[#allocation397_spill] sm:$0xff] }
 0x3a9   : > { %5281 = vmatpush.msra.mxu1 %v12284_v40  ;;  %5421 = vmatpush.msrb.mxu0 %v12323_v26  ;;  %v12328_v40 = vld [vmem:[#allocation392_spill] sm:$0xff] }
 0x3aa   : > { %5356 = vmatpush.msra.mxu2 %v12324_v55  ;;  %5391 = vmatpush.msra.mxu3 %v12287_v32  ;;  %v12361_v55 = vld [vmem:[#allocation437_spill] sm:$0xff] }
 0x3ab   : > { %5358 = vmatmul.f32.vlgmr.msra.gmra.mxu2 %v10278_v11  ;;  %5423 = vmatpush.msrb.mxu0 %v12325_v5 }
 0x3ac   : > { %5562 = vmatpush.msrb.mxu2 %v12326_v17  ;;  %5283 = vmatpush.msra.mxu1 %v12287_v32  ;;  %v12331_v32 = vld [vmem:[#allocation406_spill] sm:$0xff]  ;;  %v12362_v17 = vld [vmem:[#allocation447_spill] sm:$0xff] }
 0x3ad   : > { %5393 = vmatpush.msra.mxu3 %v12290_v4  ;;  %5425 = vmatpush.msrb.mxu0 %v12327_v20 }
 0x3ae   : > { %5395 = vmatmul.f32.vlgmr.msra.gmra.mxu3 %v10278_v11  ;;  %5565 = vmatpush.msrb.mxu2 %v12328_v40  ;;  %v12332_v11 = vld [vmem:[#allocation398_spill] sm:$0xff]  ;;  %v12363_v40 = vld [vmem:[#allocation401_spill] sm:$0xff] }
 0x3af   : > { %5615 = vmatpush.msrb.mxu3 %v12321_v36  ;;  %5285 = vmatpush.msra.mxu1 %v12290_v4  ;;  %v12335_v4 = vld [vmem:[#allocation400_spill] sm:$0xff] }
 0x3b0   : > { %5427 = vmatpush.msrb.mxu0 %v12329_v42  ;;  %5289 = vmatmul.f32.vlgmr.msra.gmra.mxu1 %v5092_v19  ;;  %v12338_v19 = vld [vmem:[#allocation403_spill] sm:$0xff] }
 0x3b1   : > { %5568 = vmatpush.msrb.mxu2 %v12330_v43  ;;  %5464 = vmatpush.msrb.mxu1 %v12331_v32  ;;  %v12364_v43 = vld [vmem:[#allocation450_spill] sm:$0xff]  ;;  %v12365_v32 = vld [vmem:[#allocation404_spill] sm:$0xff] }
 0x3b2   : > { %5617 = vmatpush.msrb.mxu3 %v12323_v26  ;;  %5429 = vmatpush.msrb.mxu0 %v12332_v11 }
 0x3b3   : > { %5571 = vmatpush.msrb.mxu2 %v12333_v35  ;;  %5470 = vmatpush.msrb.mxu1 %v12334_v46  ;;  %v12366_v35 = vld [vmem:[#allocation452_spill] sm:$0xff]  ;;  %v12367_v46 = vld [vmem:[#allocation454_spill] sm:$0xff] }
 0x3b4   : > { %5619 = vmatpush.msrb.mxu3 %v12325_v5  ;;  %5431 = vmatpush.msrb.mxu0 %v12335_v4 }
 0x3b5   : > { %5574 = vmatpush.msrb.mxu2 %v12336_v38  ;;  %5476 = vmatpush.msrb.mxu1 %v12337_v63  ;;  %v12368_v38 = vld [vmem:[#allocation407_spill] sm:$0xff]  ;;  %v12369_v63 = vld [vmem:[#allocation457_spill] sm:$0xff] }
 0x3b6   : > { %5621 = vmatpush.msrb.mxu3 %v12327_v20  ;;  %5433 = vmatpush.msrb.mxu0 %v12338_v19 }
 0x3b7   : > { %5577 = vmatpush.msrb.mxu2 %v12339_v3  ;;  %5482 = vmatpush.msrb.mxu1 %v12340_v14  ;;  %v5414_v3 = vld [vmem:[#allocation1] sm:$0xff] }
 0x3b8   : > { %5623 = vmatpush.msrb.mxu3 %v12329_v42  ;;  %5435 = vmatpush.msrb.mxu0 %v9047_v41  ;;  %v12370_v14 = vld [vmem:[#allocation410_spill] sm:$0xff] }
 0x3b9   : > { %5580 = vmatpush.msrb.mxu2 %v12341_v56  ;;  %5488 = vmatpush.msrb.mxu1 %v12342_v62  ;;  %v12371_v56 = vld [vmem:[#allocation460_spill] sm:$0xff]  ;;  %v12372_v62 = vld [vmem:[#allocation414_spill] sm:$0xff] }
 0x3ba   : > { %5625 = vmatpush.msrb.mxu3 %v12332_v11  ;;  %5437 = vmatpush.msrb.mxu0 %v9063_v22 }
 0x3bb   : > { %5583 = vmatpush.msrb.mxu2 %v12343_v48  ;;  %5494 = vmatpush.msrb.mxu1 %v12344_v13  ;;  %v10465_v48 = vand.u32 4294901760, %v5414_v3  ;;  %v12374_v13 = vld [vmem:[#allocation417_spill] sm:$0xff] }
 0x3bc   : > { %5627 = vmatpush.msrb.mxu3 %v12335_v4  ;;  %5439 = vmatpush.msrb.mxu0 %v9095_v33 }
 0x3bd   : > { %5586 = vmatpush.msrb.mxu2 %v12345_v45  ;;  %5500 = vmatpush.msrb.mxu1 %v12346_v25  ;;  %v12376_v45 = vld [vmem:[#allocation418_spill] sm:$0xff]  ;;  %v12377_v25 = vld [vmem:[#allocation469_spill] sm:$0xff] }
 0x3be   : > { %5629 = vmatpush.msrb.mxu3 %v12338_v19  ;;  %5441 = vmatpush.msrb.mxu0 %v9114_v9 }
 0x3bf   : > { %5589 = vmatpush.msrb.mxu2 %v12347_v6  ;;  %5506 = vmatpush.msrb.mxu1 %v12348_v27  ;;  %v12378_v6 = vld [vmem:[#allocation421_spill] sm:$0xff]  ;;  %v12380_v27 = vld [vmem:[#allocation426_spill] sm:$0xff] }
 0x3c0   : > { %5631 = vmatpush.msrb.mxu3 %v9047_v41  ;;  %5443 = vmatpush.msrb.mxu0 %v9133_v15 }
 0x3c1   : > { %5592 = vmatpush.msrb.mxu2 %v12349_v34  ;;  %5512 = vmatpush.msrb.mxu1 %v12350_v30  ;;  %v5415_v30 = vld [vmem:[#allocation1 + $0x9] sm:$0xff] }
 0x3c2   : > { %5633 = vmatpush.msrb.mxu3 %v9063_v22  ;;  %5445 = vmatpush.msrb.mxu0 %v11927_v44 }
 0x3c3   : > { %5595 = vmatpush.msrb.mxu2 %v12351_v2  ;;  %5518 = vmatpush.msrb.mxu1 %v12352_v0  ;;  %v12382_v2 = vld [vmem:[#allocation429_spill] sm:$0xff]  ;;  %v12384_v0 = vld [vmem:[#allocation432_spill] sm:$0xff] }
 0x3c4   : > { %5635 = vmatpush.msrb.mxu3 %v9095_v33  ;;  %5447 = vmatpush.msrb.mxu0 %v9171_v57 }
 0x3c5   : > { %5598 = vmatpush.msrb.mxu2 %v12353_v59  ;;  %5524 = vmatpush.msrb.mxu1 %v12354_v23  ;;  %v12385_v23 = vld [vmem:[#allocation484_spill] sm:$0xff] }
 0x3c6   : > { %5637 = vmatpush.msrb.mxu3 %v9114_v9  ;;  %5449 = vmatpush.msrb.mxu0 %v9192_v7 }
 0x3c7   : > { %5601 = vmatpush.msrb.mxu2 %v12355_v24  ;;  %5530 = vmatpush.msrb.mxu1 %v12356_v29  ;;  %v12386_v24 = vld [vmem:[#allocation436_spill] sm:$0xff] }
 0x3c8   : > { %5639 = vmatpush.msrb.mxu3 %v9133_v15  ;;  %5656 = vmatpush.msra.mxu0 %v12357_v51  ;;  %v12387_v29 = vld [vmem:[#allocation488_spill] sm:$0xff]  ;;  %v12389_v51 = vld [vmem:[#allocation489_spill] sm:$0xff] }
 0x3c9   : > { %5604 = vmatpush.msrb.mxu2 %v12358_v49  ;;  %5536 = vmatpush.msrb.mxu1 %v12359_v47  ;;  %v12392_v49 = vld [vmem:[#allocation491_spill] sm:$0xff] }
 0x3ca   : > { %5641 = vmatpush.msrb.mxu3 %v11927_v44  ;;  %5660 = vmatpush.msra.mxu0 %v12360_v58  ;;  %v12393_v47 = vld [vmem:[#allocation439_spill] sm:$0xff]  ;;  %v12396_v58 = vld [vmem:[#allocation442_spill] sm:$0xff] }
 0x3cb   : > { %5607 = vmatpush.msrb.mxu2 %v12361_v55  ;;  %5542 = vmatpush.msrb.mxu1 %v12362_v17  ;;  %v12397_v55 = vld [vmem:[#allocation440_spill] sm:$0xff]  ;;  %v12398_v17 = vld [vmem:[#allocation423_spill] sm:$0xff] }
 0x3cc   : > { %5643 = vmatpush.msrb.mxu3 %v9171_v57  ;;  %5664 = vmatpush.msra.mxu0 %v12363_v40  ;;  %v12400_v40 = vld [vmem:[#allocation445_spill] sm:$0xff] }
 0x3cd   : > { %5760 = vmatpush.msra.mxu2 %v9183_v60  ;;  %5548 = vmatpush.msrb.mxu1 %v12364_v43 }
 0x3ce   : > { %5645 = vmatpush.msrb.mxu3 %v9192_v7  ;;  %5668 = vmatpush.msra.mxu0 %v12365_v32  ;;  %v12401_v32 = vld [vmem:[#allocation446_spill] sm:$0xff] }
 0x3cf   : > { %5762 = vmatpush.msra.mxu2 %v9217_v28  ;;  %5554 = vmatpush.msrb.mxu1 %v12367_v46  ;;  %v12404_v46 = vld [vmem:[#allocation449_spill] sm:$0xff] }
 0x3d0   : > { %5805 = vmatpush.msra.mxu3 %v12366_v35  ;;  %5672 = vmatpush.msra.mxu0 %v12368_v38  ;;  %v12402_v35 = vld [vmem:[#allocation448_spill] sm:$0xff]  ;;  %v12407_v38 = vld [vmem:[#allocation459_spill] sm:$0xff] }
 0x3d1   : > { %5723 = vmatpush.msra.mxu1 %v12321_v36  ;;  %5764 = vmatpush.msra.mxu2 %v9239_v50  ;;  %v12373_v36 = vld [vmem:[#allocation463_spill] sm:$0xff] }
 0x3d2   : > { %5811 = vmatpush.msra.mxu3 %v12369_v63  ;;  %5676 = vmatpush.msra.mxu0 %v12370_v14  ;;  %v12409_v63 = vld [vmem:[#allocation462_spill] sm:$0xff]  ;;  %v12412_v14 = vld [vmem:[#allocation464_spill] sm:$0xff] }
 0x3d3   : > { %5725 = vmatpush.msra.mxu1 %v12323_v26  ;;  %5766 = vmatpush.msra.mxu2 %v9246_v54  ;;  %v12375_v26 = vld [vmem:[#allocation466_spill] sm:$0xff] }
 0x3d4   : > { %5817 = vmatpush.msra.mxu3 %v12371_v56  ;;  %5680 = vmatpush.msra.mxu0 %v12372_v62  ;;  %v12414_v56 = vld [vmem:[#allocation467_spill] sm:$0xff]  ;;  %v12416_v62 = vld [vmem:[#allocation470_spill] sm:$0xff] }
 0x3d5   : > { %5727 = vmatpush.msra.mxu1 %v12325_v5  ;;  %5768 = vmatpush.msra.mxu2 %v9265_v1  ;;  %v5451_v5 = vsub.f32 %v5414_v3, %v10465_v48  ;;  %v12410_v3 = vld [vmem:[#allocation461_spill] sm:$0xff] }
 0x3d6   : > { %5823 = vmatpush.msra.mxu3 %v12373_v36  ;;  %5684 = vmatpush.msra.mxu0 %v12374_v13  ;;  %v12420_v36 = vld [vmem:[#allocation478_spill] sm:$0xff]  ;;  %v12422_v13 = vld [vmem:[#allocation481_spill] sm:$0xff] }
 0x3d7   : > { %5729 = vmatpush.msra.mxu1 %v12327_v20  ;;  %5770 = vmatpush.msra.mxu2 %v9299_v61  ;;  %v12379_v20 = vld [vmem:[#allocation473_spill] sm:$0xff]  ;;  %v5452_v34 = vand.u32 4294901760, %v5451_v5 }
 0x3d8   : > { %5829 = vmatpush.msra.mxu3 %v12375_v26  ;;  %5688 = vmatpush.msra.mxu0 %v12376_v45  ;;  %v12424_v26 = vld [vmem:[#allocation485_spill] sm:$0xff]  ;;  %v4209_v45 = vpop.f32.mrf.mxu2 }
 0x3d9   : > { %5731 = vmatpush.msra.mxu1 %v12329_v42  ;;  %5772 = vmatpush.msra.mxu2 %v9321_v31  ;;  %v12381_v42 = vld [vmem:[#allocation477_spill] sm:$0xff]  ;;  %v5453_v59 = vsub.f32 %v5451_v5, %v5452_v34 }
 0x3da   : > { %5835 = vmatpush.msra.mxu3 %v12377_v25  ;;  %5692 = vmatpush.msra.mxu0 %v12378_v6 }
 0x3db   : > { %5733 = vmatpush.msra.mxu1 %v12332_v11  ;;  %5774 = vmatpush.msra.mxu2 %v9340_v12  ;;  %v12383_v11 = vld [vmem:[#allocation480_spill] sm:$0xff] }
 0x3dc   : > { %5841 = vmatpush.msra.mxu3 %v12379_v20  ;;  %5696 = vmatpush.msra.mxu0 %v12380_v27 }
 0x3dd   : > { %5735 = vmatpush.msra.mxu1 %v12335_v4  ;;  %5776 = vmatpush.msra.mxu2 %v9361_v53  ;;  %v10492_v4 = vand.u32 4294901760, %v5415_v30 }
 0x3de   : > { %5847 = vmatpush.msra.mxu3 %v12381_v42  ;;  %5700 = vmatpush.msra.mxu0 %v12382_v2 }
 0x3df   : > { %5737 = vmatpush.msra.mxu1 %v12338_v19  ;;  %5778 = vmatpush.msra.mxu2 %v9382_v18  ;;  %v10503_v19 = vsub.f32 %v5415_v30, %v10492_v4 }
 0x3e0   : > { %5853 = vmatpush.msra.mxu3 %v12383_v11  ;;  %5704 = vmatpush.msra.mxu0 %v12384_v0  ;;  %v4395_v20 = vpop.f32.mrf.mxu2 }
 0x3e1   : > { %5739 = vmatpush.msra.mxu1 %v9047_v41  ;;  %5780 = vmatpush.msra.mxu2 %v9401_v39  ;;  %v5454_v41 = vand.u32 4294901760, %v5453_v59 }
 0x3e2   : > { %5859 = vmatpush.msra.mxu3 %v12385_v23  ;;  %5708 = vmatpush.msra.mxu0 %v12386_v24 }
 0x3e3   : > { %5741 = vmatpush.msra.mxu1 %v9063_v22  ;;  %5782 = vmatpush.msra.mxu2 %v9420_v10  ;;  %v12388_v22 = vld [vmem:[#allocation472_spill] sm:$0xff] }
 0x3e4   : > { %5865 = vmatpush.msra.mxu3 %v9530_v16  ;;  %5712 = vmatpush.msra.mxu0 %v9255_v8  ;;  %v12390_v8 = vld [vmem:[#allocation435_spill] sm:$0xff]  ;;  %v12391_v16 = vld [vmem:[#allocation476_spill] sm:$0xff] }
 0x3e5   : > { %5743 = vmatpush.msra.mxu1 %v9095_v33  ;;  %5784 = vmatpush.msra.mxu2 %v9436_v52  ;;  %v5793_v33 = vand.u32 4294901760, %v10503_v19 }
 0x3e6   : > { %5871 = vmatpush.msra.mxu3 %v12387_v29  ;;  %5716 = vmatpush.msra.mxu0 %v9277_v21  ;;  %v12394_v21 = vld [vmem:[#allocation482_spill] sm:$0xff] }
 0x3e7   : > { %5745 = vmatpush.msra.mxu1 %v9114_v9  ;;  %5786 = vmatpush.msra.mxu2 %v12388_v22  ;;  %v12395_v9 = vld [vmem:[#allocation492_spill] sm:$0xff] }
 0x3e8   : > { %5877 = vmatpush.msra.mxu3 %v12389_v51  ;;  %5455 = vmatmul.f32.vlgmr.msrb.gmra.mxu0 %v5454_v41  ;;  %v4658_v30 = vpop.f32.mrf.mxu2 }
 0x3e9   : > { %5747 = vmatpush.msra.mxu1 %v9133_v15  ;;  %5903 = vmatpush.msrb.mxu0 %v12390_v8  ;;  %v5794_v15 = vsub.f32 %v10503_v19, %v5793_v33 }
 0x3ea   : > { %5788 = vmatpush.msra.mxu2 %v12391_v16  ;;  %5883 = vmatpush.msra.mxu3 %v12392_v49 }
 0x3eb   : > { %5610 = vmatmul.f32.vlgmr.msrb.gmra.mxu2 %v5451_v5  ;;  %5906 = vmatpush.msrb.mxu0 %v12393_v47  ;;  %v5795_v43 = vand.u32 4294901760, %v5794_v15  ;;  %v4248_v5 = vpop.f32.mrf.mxu3 }
 0x3ec   : > { %5749 = vmatpush.msra.mxu1 %v11927_v44  ;;  %5790 = vmatpush.msra.mxu2 %v12394_v21  ;;  %v12399_v44 = vld [vmem:[#allocation443_spill] sm:$0xff] }
 0x3ed   : > { %5889 = vmatpush.msra.mxu3 %v12395_v9  ;;  %5909 = vmatpush.msrb.mxu0 %v12396_v58 }
 0x3ee   : > { %5649 = vmatmul.f32.vlgmr.msrb.gmra.mxu3 %v5452_v34  ;;  %5997 = vmatpush.msrb.mxu2 %v12397_v55 }
 0x3ef   : > { %5751 = vmatpush.msra.mxu1 %v9171_v57  ;;  %5895 = vmatpush.msra.mxu3 %v12398_v17  ;;  %v12403_v57 = vld [vmem:[#allocation451_spill] sm:$0xff] }
 0x3f0   : > { %5556 = vmatmul.f32.vlgmr.msrb.gmra.mxu1 %v10465_v48  ;;  %5912 = vmatpush.msrb.mxu0 %v12399_v44 }
 0x3f1   : > { %6001 = vmatpush.msrb.mxu2 %v12400_v40  ;;  %6064 = vmatpush.msrb.mxu3 %v9183_v60 }
 0x3f2   : > { %5753 = vmatpush.msra.mxu1 %v9192_v7  ;;  %5915 = vmatpush.msrb.mxu0 %v12401_v32  ;;  %v12405_v7 = vld [vmem:[#allocation455_spill] sm:$0xff] }
 0x3f3   : > { %6005 = vmatpush.msrb.mxu2 %v12402_v35  ;;  %6066 = vmatpush.msrb.mxu3 %v9217_v28  ;;  %v4496_v27 = vpop.f32.mrf.mxu3 }
 0x3f4   : > { %5956 = vmatpush.msrb.mxu1 %v9183_v60  ;;  %5796 = vmatmul.f32.vlgmr.msra.gmra.mxu2 %v5795_v43  ;;  %v12406_v60 = vld [vmem:[#allocation453_spill] sm:$0xff] }
 0x3f5   : > { %5918 = vmatpush.msrb.mxu0 %v12403_v57  ;;  %6009 = vmatpush.msrb.mxu2 %v12404_v46 }
 0x3f6   : > { %5958 = vmatpush.msrb.mxu1 %v9217_v28  ;;  %6068 = vmatpush.msrb.mxu3 %v9239_v50  ;;  %v12408_v28 = vld [vmem:[#allocation458_spill] sm:$0xff] }
 0x3f7   : > { %5718 = vmatmul.f32.vlgmr.msra.gmra.mxu0 %v10465_v48  ;;  %5897 = vmatmul.f32.vlgmr.msra.gmra.mxu3 %v10492_v4 }
 0x3f8   : > { %5921 = vmatpush.msrb.mxu0 %v12405_v7  ;;  %5960 = vmatpush.msrb.mxu1 %v9239_v50  ;;  %v12411_v50 = vld [vmem:[#allocation465_spill] sm:$0xff] }
 0x3f9   : > { %6013 = vmatpush.msrb.mxu2 %v12406_v60  ;;  %6070 = vmatpush.msrb.mxu3 %v9246_v54 }
 0x3fa   : > { %5755 = vmatmul.f32.vlgmr.msra.gmra.mxu1 %v10465_v48  ;;  %5924 = vmatpush.msrb.mxu0 %v12407_v38  ;;  %v12418_v48 = vld [vmem:[#allocation474_spill] sm:$0xff] }
 0x3fb   : > { %5962 = vmatpush.msrb.mxu1 %v9246_v54  ;;  %6017 = vmatpush.msrb.mxu2 %v12408_v28  ;;  %v12413_v54 = vld [vmem:[#allocation468_spill] sm:$0xff]  ;;  %v4695_v2 = vpop.f32.mrf.mxu3 }
 0x3fc   : > { %6072 = vmatpush.msrb.mxu3 %v9265_v1  ;;  %5927 = vmatpush.msrb.mxu0 %v12409_v63 }
 0x3fd   : > { %5964 = vmatpush.msrb.mxu1 %v9265_v1  ;;  %6021 = vmatpush.msrb.mxu2 %v12410_v3  ;;  %v12415_v1 = vld [vmem:[#allocation471_spill] sm:$0xff] }
 0x3fe   : > { %6074 = vmatpush.msrb.mxu3 %v9299_v61  ;;  %5930 = vmatpush.msrb.mxu0 %v12411_v50 }
 0x3ff   : > { %5966 = vmatpush.msrb.mxu1 %v9299_v61  ;;  %6025 = vmatpush.msrb.mxu2 %v12412_v14  ;;  %v12417_v61 = vld [vmem:[#allocation475_spill] sm:$0xff] }
 0x400   : > { %6076 = vmatpush.msrb.mxu3 %v9321_v31  ;;  %5933 = vmatpush.msrb.mxu0 %v12413_v54 }
 0x401   : > { %5968 = vmatpush.msrb.mxu1 %v9321_v31  ;;  %6029 = vmatpush.msrb.mxu2 %v12414_v56  ;;  %v12419_v31 = vld [vmem:[#allocation479_spill] sm:$0xff] }
 0x402   : > { %6078 = vmatpush.msrb.mxu3 %v9340_v12  ;;  %5936 = vmatpush.msrb.mxu0 %v12415_v1 }
 0x403   : > { %5970 = vmatpush.msrb.mxu1 %v9340_v12  ;;  %6033 = vmatpush.msrb.mxu2 %v12416_v62  ;;  %v12421_v12 = vld [vmem:[#allocation483_spill] sm:$0xff] }
 0x404   : > { %6080 = vmatpush.msrb.mxu3 %v9361_v53  ;;  %5939 = vmatpush.msrb.mxu0 %v12417_v61 }
 0x405   : > { %5972 = vmatpush.msrb.mxu1 %v9361_v53  ;;  %6037 = vmatpush.msrb.mxu2 %v12418_v48  ;;  %v12423_v53 = vld [vmem:[#allocation486_spill] sm:$0xff] }
 0x406   : > { %6082 = vmatpush.msrb.mxu3 %v9382_v18  ;;  %5942 = vmatpush.msrb.mxu0 %v12419_v31 }
 0x407   : > { %5974 = vmatpush.msrb.mxu1 %v9382_v18  ;;  %6041 = vmatpush.msrb.mxu2 %v12420_v36  ;;  %v12425_v18 = vld [vmem:[#allocation487_spill] sm:$0xff] }
 0x408   : > { %6084 = vmatpush.msrb.mxu3 %v9401_v39  ;;  %5945 = vmatpush.msrb.mxu0 %v12421_v12  ;;  %v4910_v59 = vpop.f32.mrf.mxu2 }
 0x409   : > { %5976 = vmatpush.msrb.mxu1 %v9401_v39  ;;  %6045 = vmatpush.msrb.mxu2 %v12422_v13  ;;  %v12426_v39 = vld [vmem:[#allocation490_spill] sm:$0xff] }
 0x40a   : > { %6086 = vmatpush.msrb.mxu3 %v9420_v10  ;;  %5948 = vmatpush.msrb.mxu0 %v12423_v53 }
 0x40b   : > { %5978 = vmatpush.msrb.mxu1 %v9420_v10  ;;  %6049 = vmatpush.msrb.mxu2 %v12424_v26  ;;  %v4054_v10 = vpop.f32.mrf.mxu0 }
 0x40c   : > { %6088 = vmatpush.msrb.mxu3 %v9436_v52  ;;  %5951 = vmatmul.f32.vlgmr.msrb.gmra.mxu0 %v10503_v19 }
 0x40d   : > { %5980 = vmatpush.msrb.mxu1 %v9436_v52  ;;  %6053 = vmatpush.msrb.mxu2 %v12425_v18  ;;  %v4155_v52 = vpop.f32.mrf.mxu1 }
 0x40e   : > { %6090 = vmatpush.msrb.mxu3 %v12388_v22  ;;  %v4156_v51 = vadd.f32 %v4155_v52, %v4054_v10 }
 0x40f   : > { %5982 = vmatpush.msrb.mxu1 %v12388_v22  ;;  %6057 = vmatpush.msrb.mxu2 %v12426_v39 }
 0x410   : > { %6092 = vmatpush.msrb.mxu3 %v12391_v16  ;;  %6059 = vmatmul.f32.vlgmr.msrb.gmra.mxu2 %v10492_v4  ;;  %v4210_v49 = vadd.f32 %v4209_v45, %v4156_v51  ;;  %v6100_v45 = vld [vmem:[%s10733_s1] sm:$0xff] }
 0x411   : > { %5984 = vmatpush.msrb.mxu1 %v12391_v16  ;;  %v5096_v41 = vpop.f32.mrf.mxu2 }
 0x412   : > { %6094 = vmatpush.msrb.mxu3 %v12394_v21  ;;  %v4249_v15 = vadd.f32 %v4248_v5, %v4210_v49 }
 0x413   : > { %6096 = vmatmul.f32.vlgmr.msrb.gmra.mxu3 %v10492_v4  ;;  %5986 = vmatpush.msrb.mxu1 %v12394_v21  ;;  %v4317_v6 = vpop.f32.mrf.mxu0  ;;  %v4949_v4 = vpop.f32.mrf.mxu3 }
 0x414   : > { %5990 = vmatmul.f32.vlgmr.msrb.gmra.mxu1 %v5793_v33  ;;  %v4318_v40 = vadd.f32 %v4317_v6, %v4249_v15 }
 0x415   : > { %v4354_v25 = vpop.f32.mrf.mxu1 }
 0x416   : > { %v4355_v57 = vadd.f32 %v4354_v25, %v4318_v40 }
 0x418   : > { %v4396_v38 = vadd.f32 %v4395_v20, %v4355_v57 }
 0x41a   : > { %v4497_v50 = vadd.f32 %v4496_v27, %v4396_v38  ;;  %v6109_v27 = vsel %vm6107_vm0, %v6100_v45, 0 }
 0x41b   : > { %v4550_v42 = vpop.f32.mrf.mxu0  ;;  %v5197_v29 = vpop.f32.mrf.mxu3 }
 0x41c   : > { %v4551_v56 = vadd.f32 %v4550_v42, %v4497_v50  ;;  %v10606_v42 = vand.u32 4294901760, %v10225_v37 }
 0x41d   : > { %v4589_v34 = vpop.f32.mrf.mxu1 }
 0x41e   : > { %v4590_v61 = vadd.f32 %v4589_v34, %v4551_v56 }
 0x420   : > { %v4659_v12 = vadd.f32 %v4658_v30, %v4590_v61 }
 0x422   : > { %v4696_v39 = vadd.f32 %v4695_v2, %v4659_v12 }
 0x423   : > { %v4755_v0 = vpop.f32.mrf.mxu0 }
 0x424   : > { %v10602_v6 = vand.u32 4294901760, %v4696_v39 }
 0x425   : > { %v4856_v11 = vpop.f32.mrf.mxu1 }
 0x426   : > { %v4857_v19 = vadd.f32 %v4856_v11, %v4755_v0  ;;  %v10611_v11 = vand.u32 4294901760, %v6109_v27  ;;  %v12427_v0 = vld [vmem:[#allocation4_spill] sm:$0xff] }
 0x428   : > { %v4911_v8 = vadd.f32 %v4910_v59, %v4857_v19  ;;  %v10614_v59 = vand.u32 4294901760, %v12427_v0  ;;  %v10626_v19 = vsub.f32 %v10225_v37, %v10606_v42  ;;  %v10633_v51 = vsub.f32 %v6109_v27, %v10611_v11 }
 0x42a   : > { %v4950_v47 = vadd.f32 %v4949_v4, %v4911_v8  ;;  %v10617_v4 = vsub.f32 %v4696_v39, %v10602_v6 }
 0x42b   : > { %v5018_v24 = vpop.f32.mrf.mxu0 }
 0x42c   : > { %v5019_v17 = vadd.f32 %v5018_v24, %v4950_v47  ;;  %v12428_v24 = vld [vmem:[#allocation3_spill] sm:$0xff]  ;;  %v6166_v49 = vand.u32 4294901760, %v10617_v4  ;;  %v12430_v47 = vld [vmem:[#allocation45_spill] sm:$0xff] }
 0x42d   : > { %v5055_v23 = vpop.f32.mrf.mxu1 }
 0x42e   : > { %v5359_v16 = vpop.f32.mrf.mxu2  ;;  %v5056_v32 = vadd.f32 %v5055_v23, %v5019_v17  ;;  %v6137_v17 = vand.u32 4294901760, %v10633_v51 }
 0x430   : > { %v5097_v7 = vadd.f32 %v5096_v41, %v5056_v32  ;;  %v10622_v41 = vand.u32 4294901760, %v12428_v24  ;;  %v6138_v38 = vsub.f32 %v10633_v51, %v6137_v17 }
 0x431   : > { %v5396_v21 = vpop.f32.mrf.mxu3 }
 0x432   : > { %v5198_v63 = vadd.f32 %v5197_v29, %v5097_v7  ;;  %v6139_v56 = vand.u32 4294901760, %v6138_v38 }
 0x433   : > { %v5251_v33 = vpop.f32.mrf.mxu0 }
 0x434   : > { %v5252_v14 = vadd.f32 %v5251_v33, %v5198_v63  ;;  %v12429_v33 = vld [vmem:[#allocation456_spill] sm:$0xff] }
 0x435   : > { %v5290_v22 = vpop.f32.mrf.mxu1  ;;  %v10636_v8 = vand.u32 4294901760, %v12429_v33 }
 0x436   : > { %v5291_v1 = vadd.f32 %v5290_v22, %v5252_v14 }
 0x438   : > { %v5360_v31 = vadd.f32 %v5359_v16, %v5291_v1  ;;  %v10640_v16 = vsub.f32 %v12427_v0, %v10614_v59 }
 0x43a   : > { %v5397_v26 = vadd.f32 %v5396_v21, %v5360_v31  ;;  %v10645_v21 = vand.u32 4294901760, %v12430_v47  ;;  %v6178_v32 = vand.u32 4294901760, %v10640_v16 }
 0x43c   : > { %v10600_v5 = vand.u32 4294901760, %v5397_v26  ;;  %v6195_v57 = vsub.f32 %v12430_v47, %v10645_v21  ;;  %v6179_v63 = vsub.f32 %v10640_v16, %v6178_v32 }
 0x43e   : > { %v10609_v30 = vsub.f32 %v5397_v26, %v10600_v5  ;;  %v6180_v1 = vand.u32 4294901760, %v6179_v63 }
 0x440   : > { %v6160_v22 = vand.u32 4294901760, %v10609_v30 }
 0x465   : > { %v5456_v58 = vpop.f32.mrf.mxu0 }
 0x46d   : > { %v5557_v9 = vpop.f32.mrf.mxu1 }
 0x46e   : > { %v5558_v55 = vadd.f32 %v5557_v9, %v5456_v58  ;;  %v5611_v44 = vpop.f32.mrf.mxu2  ;;  %v10650_v9 = vsub.f32 %v12428_v24, %v10622_v41  ;;  %v6161_v58 = vsub.f32 %v10609_v30, %v6160_v22 }
 0x470   : > { %v5612_v43 = vadd.f32 %v5611_v44, %v5558_v55  ;;  %v6172_v55 = vand.u32 4294901760, %v10626_v19  ;;  %v10660_v44 = vsub.f32 %v12429_v33, %v10636_v8 }
 0x471   : > { %v5650_v35 = vpop.f32.mrf.mxu3 }
 0x472   : > { %v5651_v46 = vadd.f32 %v5650_v35, %v5612_v43  ;;  %v6167_v43 = vsub.f32 %v10617_v4, %v6166_v49  ;;  %v6692_v35 = vmov 0   ;;  %v6173_v7 = vsub.f32 %v10626_v19, %v6172_v55 }
 0x473   : > { %6635 = vset.pattern.permute.xlu0 %v6692_v35 }
 0x474   : > { %v5719_v60 = vpop.f32.mrf.mxu0  ;;  %v6174_v50 = vand.u32 4294901760, %v6173_v7 }
 0x475   : > { %v5720_v28 = vadd.f32 %v5719_v60, %v5651_v46  ;;  %v6162_v46 = vand.u32 4294901760, %v6161_v58  ;;  %v6184_v60 = vand.u32 4294901760, %v10650_v9 }
 0x477   : > { %v5756_v3 = vpop.f32.mrf.mxu1  ;;  %v5797_v62 = vpop.f32.mrf.mxu2  ;;  %v6185_v14 = vsub.f32 %v10650_v9, %v6184_v60 }
 0x478   : > { %v5757_v54 = vadd.f32 %v5756_v3, %v5720_v28  ;;  %v6168_v28 = vand.u32 4294901760, %v6167_v43  ;;  %v6190_v3 = vand.u32 4294901760, %v10660_v44 }
 0x479   : > { %v6186_v61 = vand.u32 4294901760, %v6185_v14 }
 0x47a   : > { %v5798_v48 = vadd.f32 %v5797_v62, %v5757_v54  ;;  %v5898_v36 = vpop.f32.mrf.mxu3  ;;  %v6196_v54 = vand.u32 4294901760, %v6195_v57  ;;  %v6191_v62 = vsub.f32 %v10660_v44, %v6190_v3 }
 0x47c   : > { %v5899_v53 = vadd.f32 %v5898_v36, %v5798_v48  ;;  %v6197_v48 = vsub.f32 %v6195_v57, %v6196_v54  ;;  %v6192_v31 = vand.u32 4294901760, %v6191_v62  ;;  %v6101_v36 = vld [vmem:[%s10735_s3] sm:$0xff] }
 0x47d   : > { %6104 = vperm.xlu0 %6635, %v6101_v36  }
 0x47e   : > { %v6198_v12 = vand.u32 4294901760, %v6197_v48 }
 0x489   : > { %v5952_v13 = vpop.f32.mrf.mxu0 }
 0x48a   : > { %v5953_v18 = vadd.f32 %v5952_v13, %v5899_v53 }
 0x491   : > { %v5991_v52 = vpop.f32.mrf.mxu1 }
 0x492   : > { %v5992_v10 = vadd.f32 %v5991_v52, %v5953_v18 }
 0x493   : > { %v6060_v25 = vpop.f32.mrf.mxu2 }
 0x494   : > { %v6061_v20 = vadd.f32 %v6060_v25, %v5992_v10 }
 0x496   : > { %v6097_v34 = vpop.f32.mrf.mxu3 }
 0x497   : > { %v6098_v2 = vadd.f32 %v6097_v34, %v6061_v20 }
 0x499   : > { %v10619_v23 = vand.u32 4294901760, %v6098_v2 }
 0x49b   : > { %v6153_v29 = vsub.f32 %v6098_v2, %v10619_v23  ;;  %6120 = vmatpush.msra.mxu0 %v10619_v23  ;;  %6252 = vmatpush.msra.mxu3 %v10619_v23 }
 0x49d   : > { %v6154_v37 = vand.u32 4294901760, %v6153_v29  ;;  %6122 = vmatpush.msra.mxu0 %v10600_v5  ;;  %6215 = vmatpush.msra.mxu2 %v6153_v29 }
 0x49e   : > { %6254 = vmatpush.msra.mxu3 %v10600_v5 }
 0x49f   : > { %v6155_v15 = vsub.f32 %v6153_v29, %v6154_v37  ;;  %6124 = vmatpush.msra.mxu0 %v10602_v6  ;;  %6218 = vmatpush.msra.mxu2 %v10609_v30 }
 0x4a0   : > { %6256 = vmatpush.msra.mxu3 %v10602_v6 }
 0x4a1   : > { %6126 = vmatpush.msra.mxu0 %v10606_v42  ;;  %6221 = vmatpush.msra.mxu2 %v10617_v4  ;;  %v6156_v40 = vand.u32 4294901760, %v6155_v15 }
 0x4a2   : > { %6258 = vmatpush.msra.mxu3 %v10606_v42 }
 0x4a3   : > { %6128 = vmatpush.msra.mxu0 %v10614_v59  ;;  %6157 = vmatpush.msra.mxu1 %v6156_v40 }
 0x4a4   : > { %6224 = vmatpush.msra.mxu2 %v10626_v19  ;;  %6260 = vmatpush.msra.mxu3 %v10614_v59 }
 0x4a5   : > { %6130 = vmatpush.msra.mxu0 %v10622_v41  ;;  %6163 = vmatpush.msra.mxu1 %v6162_v46 }
 0x4a6   : > { %6227 = vmatpush.msra.mxu2 %v10640_v16  ;;  %6262 = vmatpush.msra.mxu3 %v10622_v41 }
 0x4a7   : > { %6132 = vmatpush.msra.mxu0 %v10636_v8  ;;  %6169 = vmatpush.msra.mxu1 %v6168_v28 }
 0x4a8   : > { %6230 = vmatpush.msra.mxu2 %v10650_v9  ;;  %6264 = vmatpush.msra.mxu3 %v10636_v8 }
 0x4a9   : > { %6134 = vmatpush.msra.mxu0 %v10645_v21  ;;  %6175 = vmatpush.msra.mxu1 %v6174_v50 }
 0x4aa   : > { %6233 = vmatpush.msra.mxu2 %v10660_v44  ;;  %6266 = vmatpush.msra.mxu3 %v10645_v21 }
 0x4ab   : > { %6285 = vmatpush.msrb.mxu0 %v6154_v37  ;;  %6181 = vmatpush.msra.mxu1 %v6180_v1 }
 0x4ac   : > { %6236 = vmatpush.msra.mxu2 %v6195_v57  ;;  %6140 = vmatmul.f32.vlgmr.msra.gmra.mxu0 %v6139_v56 }
 0x4ad   : > { %6289 = vmatpush.msrb.mxu0 %v6160_v22  ;;  %6187 = vmatpush.msra.mxu1 %v6186_v61 }
 0x4ae   : > { %6239 = vmatmul.f32.vlgmr.msra.gmra.mxu2 %v10633_v51  ;;  %6270 = vmatmul.f32.vlgmr.msra.gmra.mxu3 %v6137_v17 }
 0x4af   : > { %6293 = vmatpush.msrb.mxu0 %v6166_v49  ;;  %6193 = vmatpush.msra.mxu1 %v6192_v31 }
 0x4b1   : > { %6297 = vmatpush.msrb.mxu0 %v6172_v55  ;;  %6199 = vmatpush.msra.mxu1 %v6198_v12 }
 0x4b2   : > { %6201 = vmatmul.f32.vlgmr.msra.gmra.mxu1 %v10611_v11 }
 0x4b3   : > { %6328 = vmatpush.msrb.mxu1 %v10619_v23  ;;  %6301 = vmatpush.msrb.mxu0 %v6178_v32 }
 0x4b5   : > { %6330 = vmatpush.msrb.mxu1 %v10600_v5  ;;  %6305 = vmatpush.msrb.mxu0 %v6184_v60 }
 0x4b7   : > { %6332 = vmatpush.msrb.mxu1 %v10602_v6  ;;  %6309 = vmatpush.msrb.mxu0 %v6190_v3 }
 0x4b9   : > { %6334 = vmatpush.msrb.mxu1 %v10606_v42  ;;  %6313 = vmatpush.msrb.mxu0 %v6196_v54 }
 0x4ba   : > { %6315 = vmatmul.f32.vlgmr.msrb.gmra.mxu0 %v10611_v11 }
 0x4bb   : > { %6336 = vmatpush.msrb.mxu1 %v10614_v59 }
 0x4bd   : > { %6338 = vmatpush.msrb.mxu1 %v10622_v41 }
 0x4bf   : > { %6340 = vmatpush.msrb.mxu1 %v10636_v8 }
 0x4c1   : > { %6342 = vmatpush.msrb.mxu1 %v10645_v21 }
 0x4c2   : > { %6344 = vmatmul.f32.vlgmr.msrb.gmra.mxu1 %v10611_v11 }
 0x4ef   : > { %v6105_v13 = vpop.permute.xlu0 %6104 }
 0x529   : > { %v6141_v53 = vpop.f32.mrf.mxu0 }
 0x52a   : > { %v6142_v26 = vadd.f32 %v6141_v53, %v6105_v13 }
 0x52f   : > { %v6202_v18 = vpop.f32.mrf.mxu1 }
 0x530   : > { %v6203_v39 = vadd.f32 %v6202_v18, %v6142_v26 }
 0x531   : > { %v6240_v52 = vpop.f32.mrf.mxu2  ;;  %v6271_v45 = vpop.f32.mrf.mxu3 }
 0x532   : > { %v6241_v10 = vadd.f32 %v6240_v52, %v6203_v39 }
 0x534   : > { %v6272_v5 = vadd.f32 %v6271_v45, %v6241_v10 }
 0x537   : > { %v6316_v25 = vpop.f32.mrf.mxu0 }
 0x538   : > { %v6317_v6 = vadd.f32 %v6316_v25, %v6272_v5 }
 0x53f   : > { %v6345_v20 = vpop.f32.mrf.mxu1 }
 0x540   : > { %v6346_v27 = vadd.f32 %v6345_v20, %v6317_v6 }
 0x542   : > { %6348 = vst.msk [vmem:[%s313_s6] sm:$0xff] %vm6107_vm0, %v6346_v27 }
 0x543 PF: > { %s14_s21 = sadd.s32 1, %s6690_s21   ;;  %s12431_s15 = smov %s6670_s16 }
 0x544   : > { %p11_p12 = scmp.ge.s32.totalorder %s14_s21, 18   ;;  %s12432_s16 = smov %s6769_s28 }
 0x545   : > { %s12433_s17 = smov %s6682_s19  ;;  %s12434_s18 = smov %s6686_s20 }
 0x546   : > { %s12435_s19 = smov %s12438_s22  ;;  %s12436_s20 = smov %s12442_s23 }
 0x547   :  { %13 = sbr.rel (!%p11_p12) target bundleno = 4 (0x4), region = 186 }

</bundles_post_ra>
